<compile_context>
chip_gen: v7x
topology: tpu7x:2x2x1
jax: 0.10.0
libtpu: 0.0.40
codegen_flags: <defaults>
</compile_context>

<pallas_src>
import functools

import jax
import jax.numpy as jnp
from jax import lax
from jax.experimental import pallas as pl
from jax.experimental.pallas import tpu as pltpu


# ----------------------------------------------------------------------------
# Fused kernel: conv1 -> conv2 -> conv3 -> GAP -> fc, NB samples per grid step.
# ----------------------------------------------------------------------------
def _classifier_kernel(x_ref, masks_ref, w1_ref, b1_ref, w2_ref, b2_ref,
                       w3_ref, b3_ref, wfc_ref, bfc_ref, pool_ref, o_ref,
                       *, W, L, NB, cdtype):
    NBL = NB * L
    f32 = jnp.float32
    # Static tap table: index i = (dy+1)*3 + (dx+1) matches the weight packing.
    taps = [(dy, dx, dy * W + dx) for dy in (-1, 0, 1) for dx in (-1, 0, 1)]

    def conv3x3(act, w_ref, b_ref, relu):
        # act: (Cin_pad, NBL) lane-dense.  Nine accumulating MXU dots; each tap
        # is a lane rotation (XLU) + precomputed-mask multiply (VPU).  BN scale
        # is already folded into w_ref.
        acc = None
        for i, (dy, dx, s) in enumerate(taps):
            tap = act if s == 0 else pltpu.roll(act, shift=(NBL - s) % NBL, axis=1)
            if (dy, dx) != (0, 0):                      # center tap: mask is all-ones
                tap = tap * masks_ref[pl.ds(i, 1), :].astype(tap.dtype)
            part = jnp.dot(w_ref[i].astype(cdtype), tap,
                           preferred_element_type=f32)  # (Cout_pad, NBL) f32
            acc = part if acc is None else acc + part
        y = acc + b_ref[...]
        if relu:
            y = jnp.maximum(y, 0.0)
        return y.astype(cdtype)

    act = x_ref[0].astype(cdtype)                       # (Cin_pad, NBL)
    act = conv3x3(act, w1_ref, b1_ref, relu=True)       # conv1+BN+ReLU (Dropout: id)
    act = conv3x3(act, w2_ref, b2_ref, relu=True)       # conv2+BN+ReLU (Dropout: id)
    act = conv3x3(act, w3_ref, b3_ref, relu=False)      # conv3

    # fc (1x1 conv) first as a lane-dense MXU dot, then the per-sample GAP as
    # one MXU dot against the block-diagonal (NBL, NB) 1/L pooling matrix.
    # Exact by linearity (eval-mode Dropout between GAP and fc is identity).
    scores = jnp.dot(wfc_ref[...].astype(cdtype), act,
                     preferred_element_type=f32)                        # (K, NBL)
    logits = jnp.dot(scores.astype(cdtype), pool_ref[...].astype(cdtype),
                     preferred_element_type=f32) + bfc_ref[...]         # (K, NB)
    o_ref[0] = logits.astype(o_ref.dtype)


# ----------------------------------------------------------------------------
# Wrapper: parameter folding / packing in plain JAX, compute in Pallas.
# ----------------------------------------------------------------------------
def _round_up(x, m):
    return (x + m - 1) // m * m


def _cdiv(a, b):
    return -(-a // b)


def _choose_nb(N, L, target_lanes=1024):
    """Samples per grid step: widen lanes, but keep >=2 grid steps (v7x 2 TCs)."""
    nb = max(1, min(target_lanes // max(L, 1), N))
    if N >= 2:
        nb = min(nb, max(1, N // 2))
    return nb


def _fold_bn(conv_b, gamma, beta, mean, var, eps=1e-5):
    scale = gamma / jnp.sqrt(var + eps)
    bias = scale * conv_b + (beta - mean * scale)
    return scale, bias


def _pack_conv_weight(w_oihw, scale, cout_pad, cin_pad):
    """(Cout, Cin, 3, 3) -> (9, cout_pad, cin_pad); BN scale folded, zero-padded."""
    cout, cin = w_oihw.shape[:2]
    w = w_oihw * scale[:, None, None, None]
    w = jnp.pad(w, ((0, cout_pad - cout), (0, cin_pad - cin), (0, 0), (0, 0)))
    w = jnp.transpose(w, (2, 3, 0, 1)).reshape(9, cout_pad, cin_pad)
    return w.astype(jnp.float32)


def _pad_col(v, pad_to):
    return jnp.pad(v, (0, pad_to - v.shape[0])).reshape(pad_to, 1).astype(jnp.float32)


def _make_border_masks(H, W, NB):
    """(9, NB*L) 0/1 validity masks; also kill cross-sample roll contamination."""
    L = H * W
    pos = jnp.arange(NB * L, dtype=jnp.int32) % L
    yy = pos // W
    xx = pos % W
    rows = []
    for dy in (-1, 0, 1):
        for dx in (-1, 0, 1):
            rows.append((yy + dy >= 0) & (yy + dy < H) & (xx + dx >= 0) & (xx + dx < W))
    return jnp.stack(rows).astype(jnp.float32)


def _make_pool_matrix(NB, L):
    """(NB*L, NB) block-diagonal 1/L pooling matrix (segmented mean via MXU)."""
    return jnp.repeat(jnp.eye(NB, dtype=jnp.float32), L, axis=0) / float(L)


def classifier_forward(x_nchw, params, *, compute_dtype=jnp.float32):
    """Eval-mode forward pass. Input x: (N, C, H, W) like PyTorch."""
    N, C, H, W = x_nchw.shape
    L = H * W
    K = params["bfc"].shape[0]
    c4, c8, c16 = params["w1"].shape[0], params["w2"].shape[0], params["w3"].shape[0]

    cin_p = _round_up(C, 8)
    p1, p2, p3 = _round_up(c4, 8), _round_up(c8, 8), _round_up(c16, 8)

    NB = _choose_nb(N, L)
    num_steps = _cdiv(N, NB)
    n_pad = num_steps * NB
    NBL = NB * L

    # Lane-dense activations, NB samples stacked along the lane axis per step.
    x = x_nchw.astype(jnp.float32).reshape(N, C, L)
    x = jnp.pad(x, ((0, n_pad - N), (0, cin_p - C), (0, 0)))
    x = x.reshape(num_steps, NB, cin_p, L).transpose(0, 2, 1, 3).reshape(
        num_steps, cin_p, NBL)

    s1, b1 = _fold_bn(params["b1"], params["g1"], params["be1"], params["m1"], params["v1"])
    s2, b2 = _fold_bn(params["b2"], params["g2"], params["be2"], params["m2"], params["v2"])

    w1s = _pack_conv_weight(params["w1"], s1, p1, cin_p)              # (9, p1, cin_p)
    w2s = _pack_conv_weight(params["w2"], s2, p2, p1)                 # (9, p2, p1)
    w3s = _pack_conv_weight(params["w3"], jnp.ones((c16,), jnp.float32), p3, p2)
    b1c, b2c, b3c = _pad_col(b1, p1), _pad_col(b2, p2), _pad_col(params["b3"], p3)

    wfc = params["wfc"][:, :, 0, 0].astype(jnp.float32)               # (K, c16)
    wfc = jnp.pad(wfc, ((0, 0), (0, p3 - c16)))                       # (K, p3)
    bfc = params["bfc"].reshape(K, 1).astype(jnp.float32)             # (K, 1)

    masks = _make_border_masks(H, W, NB)                              # (9, NBL)
    pool = _make_pool_matrix(NB, L)                                   # (NBL, NB)

    # VMEM budget from the actual working set (double-buffered input block +
    # activation/tap working set + resident weights), clamped for v7x (64 MiB).
    est = (2 * cin_p * NBL * 4
           + 3 * (cin_p + p1 + p2 + p3 + K) * NBL * 4
           + (w1s.size + w2s.size + w3s.size + wfc.size) * 4
           + (masks.size + pool.size) * 4
           + 2 * K * NB * 4)
    vmem_limit = int(min(max(4 * est, 16 << 20), 64 << 20))

    kernel = functools.partial(_classifier_kernel, W=W, L=L, NB=NB,
                               cdtype=compute_dtype)
    out = pl.pallas_call(
        kernel,
        out_shape=jax.ShapeDtypeStruct((num_steps, K, NB), jnp.float32),
        grid=(num_steps,),
        in_specs=[
            pl.BlockSpec((1, cin_p, NBL), lambda n: (n, 0, 0)),
            pl.BlockSpec(masks.shape, lambda n: (0, 0)),
            pl.BlockSpec(w1s.shape, lambda n: (0, 0, 0)),
            pl.BlockSpec(b1c.shape, lambda n: (0, 0)),
            pl.BlockSpec(w2s.shape, lambda n: (0, 0, 0)),
            pl.BlockSpec(b2c.shape, lambda n: (0, 0)),
            pl.BlockSpec(w3s.shape, lambda n: (0, 0, 0)),
            pl.BlockSpec(b3c.shape, lambda n: (0, 0)),
            pl.BlockSpec(wfc.shape, lambda n: (0, 0)),
            pl.BlockSpec(bfc.shape, lambda n: (0, 0)),
            pl.BlockSpec(pool.shape, lambda n: (0, 0)),
        ],
        out_specs=pl.BlockSpec((1, K, NB), lambda n: (n, 0, 0)),
        compiler_params=pltpu.CompilerParams(
            dimension_semantics=("parallel",),
            vmem_limit_bytes=vmem_limit),
    )(x, masks, w1s, b1c, w2s, b2c, w3s, b3c, wfc, bfc, pool)

    # (num_steps, K, NB) -> (N, K)
    return out.transpose(0, 2, 1).reshape(n_pad, K)[:N]


# ----------------------------------------------------------------------------
# Pure-JAX reference (same folded-BN math) for a correctness check
# ----------------------------------------------------------------------------
def _ref_conv(x_nhwc, w_oihw):
    w_hwio = jnp.transpose(w_oihw, (2, 3, 1, 0))
    return lax.conv_general_dilated(x_nhwc, w_hwio, (1, 1), "SAME",
                                    dimension_numbers=("NHWC", "HWIO", "NHWC"))


def classifier_reference(x_nchw, params):
    x = jnp.transpose(x_nchw, (0, 2, 3, 1)).astype(jnp.float32)
    s1, b1 = _fold_bn(params["b1"], params["g1"], params["be1"], params["m1"], params["v1"])
    s2, b2 = _fold_bn(params["b2"], params["g2"], params["be2"], params["m2"], params["v2"])
    x = jnp.maximum(_ref_conv(x, params["w1"]) * s1 + b1, 0.0)
    x = jnp.maximum(_ref_conv(x, params["w2"]) * s2 + b2, 0.0)
    x = _ref_conv(x, params["w3"]) + params["b3"]
    gap = jnp.mean(x, axis=(1, 2))                                    # (N, C/16)
    wfc = jnp.transpose(params["wfc"][:, :, 0, 0], (1, 0))
    return gap @ wfc + params["bfc"]


# ----------------------------------------------------------------------------
# Main
# ----------------------------------------------------------------------------
if __name__ == "__main__":
    N, C, H, W = 4, 32, 16, 16           # num_features = 32
    NUM_CLASSES = 10
    c4, c8, c16 = C // 4, C // 8, C // 16

    key = jax.random.PRNGKey(0)
    ks = jax.random.split(key, 17)

    params = {
        "w1": jax.random.normal(ks[0], (c4, C, 3, 3), jnp.float32) * 0.1,
        "b1": jax.random.normal(ks[1], (c4,), jnp.float32) * 0.1,
        "g1": 1.0 + 0.1 * jax.random.normal(ks[2], (c4,), jnp.float32),
        "be1": 0.1 * jax.random.normal(ks[3], (c4,), jnp.float32),
        "m1": 0.1 * jax.random.normal(ks[4], (c4,), jnp.float32),
        "v1": 1.0 + 0.1 * jax.random.uniform(ks[5], (c4,), jnp.float32),

        "w2": jax.random.normal(ks[6], (c8, c4, 3, 3), jnp.float32) * 0.1,
        "b2": jax.random.normal(ks[7], (c8,), jnp.float32) * 0.1,
        "g2": 1.0 + 0.1 * jax.random.normal(ks[8], (c8,), jnp.float32),
        "be2": 0.1 * jax.random.normal(ks[9], (c8,), jnp.float32),
        "m2": 0.1 * jax.random.normal(ks[10], (c8,), jnp.float32),
        "v2": 1.0 + 0.1 * jax.random.uniform(ks[11], (c8,), jnp.float32),

        "w3": jax.random.normal(ks[12], (c16, c8, 3, 3), jnp.float32) * 0.1,
        "b3": jax.random.normal(ks[13], (c16,), jnp.float32) * 0.1,

        "wfc": jax.random.normal(ks[14], (NUM_CLASSES, c16, 1, 1), jnp.float32) * 0.1,
        "bfc": jax.random.normal(ks[15], (NUM_CLASSES,), jnp.float32) * 0.1,
    }

    x = jax.random.normal(ks[16], (N, C, H, W), jnp.float32)

    out = jax.block_until_ready(classifier_forward(x, params))
    ref = jax.block_until_ready(classifier_reference(x, params))

    assert out.shape == (N, NUM_CLASSES), out.shape
    assert jnp.allclose(out, ref, rtol=1e-3, atol=1e-3), (
        f"max abs err {jnp.max(jnp.abs(out - ref))}")

    print("KERNEL_OK")
</pallas_src>

<mosaic_0001>
module attributes {stable_mosaic.version = 11 : i64} {
  func.func @_classifier_kernel(%arg0: i32, %arg1: memref<1x32x512xf32, #tpu.memory_space<vmem>>, %arg2: memref<9x512xf32, #tpu.memory_space<vmem>>, %arg3: memref<9x8x32xf32, #tpu.memory_space<vmem>>, %arg4: memref<8x1xf32, #tpu.memory_space<vmem>>, %arg5: memref<9x8x8xf32, #tpu.memory_space<vmem>>, %arg6: memref<8x1xf32, #tpu.memory_space<vmem>>, %arg7: memref<9x8x8xf32, #tpu.memory_space<vmem>>, %arg8: memref<8x1xf32, #tpu.memory_space<vmem>>, %arg9: memref<10x8xf32, #tpu.memory_space<vmem>>, %arg10: memref<10x1xf32, #tpu.memory_space<vmem>>, %arg11: memref<512x2xf32, #tpu.memory_space<vmem>>, %arg12: memref<1x10x2xf32, #tpu.memory_space<vmem>>) attributes {dimension_semantics = [#tpu.dimension_semantics<parallel>], iteration_bounds = array<i64: 2>, scalar_prefetch = 0 : i64, scratch_operands = 0 : i64, tpu.core_type = #tpu.core_type<tc>, window_params = [{transform_indices = @transform_0, window_bounds = array<i64: 1, 32, 512>}, {pipeline_mode = #tpu.pipeline_mode<synchronous>, transform_indices = @transform_1, window_bounds = array<i64: 9, 512>}, {pipeline_mode = #tpu.pipeline_mode<synchronous>, transform_indices = @transform_2, window_bounds = array<i64: 9, 8, 32>}, {pipeline_mode = #tpu.pipeline_mode<synchronous>, transform_indices = @transform_3, window_bounds = array<i64: 8, 1>}, {pipeline_mode = #tpu.pipeline_mode<synchronous>, transform_indices = @transform_4, window_bounds = array<i64: 9, 8, 8>}, {pipeline_mode = #tpu.pipeline_mode<synchronous>, transform_indices = @transform_5, window_bounds = array<i64: 8, 1>}, {pipeline_mode = #tpu.pipeline_mode<synchronous>, transform_indices = @transform_6, window_bounds = array<i64: 9, 8, 8>}, {pipeline_mode = #tpu.pipeline_mode<synchronous>, transform_indices = @transform_7, window_bounds = array<i64: 8, 1>}, {pipeline_mode = #tpu.pipeline_mode<synchronous>, transform_indices = @transform_8, window_bounds = array<i64: 10, 8>}, {pipeline_mode = #tpu.pipeline_mode<synchronous>, transform_indices = @transform_9, window_bounds = array<i64: 10, 1>}, {pipeline_mode = #tpu.pipeline_mode<synchronous>, transform_indices = @transform_10, window_bounds = array<i64: 512, 2>}, {transform_indices = @transform_11, window_bounds = array<i64: 1, 10, 2>}]} {
    %c0 = arith.constant 0 : index
    %c0_0 = arith.constant 0 : index
    %c0_1 = arith.constant 0 : index
    %0 = vector.load %arg1[%c0, %c0_0, %c0_1] : memref<1x32x512xf32, #tpu.memory_space<vmem>>, vector<1x32x512xf32>
    %1 = vector.shape_cast %0 : vector<1x32x512xf32> to vector<32x512xf32>
    %c17_i32 = arith.constant 17 : i32
    %2 = tpu.dynamic_rotate %1 by %c17_i32 dim 1 : vector<32x512xf32>, i32 -> vector<32x512xf32>
    %c0_2 = arith.constant 0 : index
    %c0_3 = arith.constant 0 : index
    %3 = vector.load %arg2[%c0_2, %c0_3] : memref<9x512xf32, #tpu.memory_space<vmem>>, vector<1x512xf32>
    %4 = vector.broadcast %3 : vector<1x512xf32> to vector<32x512xf32>
    %5 = arith.mulf %2, %4 : vector<32x512xf32>
    %c0_4 = arith.constant 0 : index
    %c0_5 = arith.constant 0 : index
    %c0_6 = arith.constant 0 : index
    %6 = vector.load %arg3[%c0_4, %c0_5, %c0_6] : memref<9x8x32xf32, #tpu.memory_space<vmem>>, vector<1x8x32xf32>
    %7 = vector.shape_cast %6 : vector<1x8x32xf32> to vector<8x32xf32>
    %cst = arith.constant dense<0.000000e+00> : vector<8x512xf32>
    %8 = tpu.matmul %7, %5, %cst {dimension_numbers = #tpu.dot_dimension_numbers<[1], [0], [0], [1], [0, 0, 1, 1], [], []>} : vector<8x32xf32>, vector<32x512xf32>, vector<8x512xf32> -> vector<8x512xf32>
    %c16_i32 = arith.constant 16 : i32
    %9 = tpu.dynamic_rotate %1 by %c16_i32 dim 1 : vector<32x512xf32>, i32 -> vector<32x512xf32>
    %c1 = arith.constant 1 : index
    %c0_7 = arith.constant 0 : index
    %10 = vector.load %arg2[%c1, %c0_7] : memref<9x512xf32, #tpu.memory_space<vmem>>, vector<1x512xf32>
    %11 = vector.broadcast %10 : vector<1x512xf32> to vector<32x512xf32>
    %12 = arith.mulf %9, %11 : vector<32x512xf32>
    %c1_8 = arith.constant 1 : index
    %c0_9 = arith.constant 0 : index
    %c0_10 = arith.constant 0 : index
    %13 = vector.load %arg3[%c1_8, %c0_9, %c0_10] : memref<9x8x32xf32, #tpu.memory_space<vmem>>, vector<1x8x32xf32>
    %14 = vector.shape_cast %13 : vector<1x8x32xf32> to vector<8x32xf32>
    %cst_11 = arith.constant dense<0.000000e+00> : vector<8x512xf32>
    %15 = tpu.matmul %14, %12, %cst_11 {dimension_numbers = #tpu.dot_dimension_numbers<[1], [0], [0], [1], [0, 0, 1, 1], [], []>} : vector<8x32xf32>, vector<32x512xf32>, vector<8x512xf32> -> vector<8x512xf32>
    %16 = arith.addf %8, %15 : vector<8x512xf32>
    %c15_i32 = arith.constant 15 : i32
    %17 = tpu.dynamic_rotate %1 by %c15_i32 dim 1 : vector<32x512xf32>, i32 -> vector<32x512xf32>
    %c2 = arith.constant 2 : index
    %c0_12 = arith.constant 0 : index
    %18 = vector.load %arg2[%c2, %c0_12] : memref<9x512xf32, #tpu.memory_space<vmem>>, vector<1x512xf32>
    %19 = vector.broadcast %18 : vector<1x512xf32> to vector<32x512xf32>
    %20 = arith.mulf %17, %19 : vector<32x512xf32>
    %c2_13 = arith.constant 2 : index
    %c0_14 = arith.constant 0 : index
    %c0_15 = arith.constant 0 : index
    %21 = vector.load %arg3[%c2_13, %c0_14, %c0_15] : memref<9x8x32xf32, #tpu.memory_space<vmem>>, vector<1x8x32xf32>
    %22 = vector.shape_cast %21 : vector<1x8x32xf32> to vector<8x32xf32>
    %cst_16 = arith.constant dense<0.000000e+00> : vector<8x512xf32>
    %23 = tpu.matmul %22, %20, %cst_16 {dimension_numbers = #tpu.dot_dimension_numbers<[1], [0], [0], [1], [0, 0, 1, 1], [], []>} : vector<8x32xf32>, vector<32x512xf32>, vector<8x512xf32> -> vector<8x512xf32>
    %24 = arith.addf %16, %23 : vector<8x512xf32>
    %c1_i32 = arith.constant 1 : i32
    %25 = tpu.dynamic_rotate %1 by %c1_i32 dim 1 : vector<32x512xf32>, i32 -> vector<32x512xf32>
    %c3 = arith.constant 3 : index
    %c0_17 = arith.constant 0 : index
    %26 = vector.load %arg2[%c3, %c0_17] : memref<9x512xf32, #tpu.memory_space<vmem>>, vector<1x512xf32>
    %27 = vector.broadcast %26 : vector<1x512xf32> to vector<32x512xf32>
    %28 = arith.mulf %25, %27 : vector<32x512xf32>
    %c3_18 = arith.constant 3 : index
    %c0_19 = arith.constant 0 : index
    %c0_20 = arith.constant 0 : index
    %29 = vector.load %arg3[%c3_18, %c0_19, %c0_20] : memref<9x8x32xf32, #tpu.memory_space<vmem>>, vector<1x8x32xf32>
    %30 = vector.shape_cast %29 : vector<1x8x32xf32> to vector<8x32xf32>
    %cst_21 = arith.constant dense<0.000000e+00> : vector<8x512xf32>
    %31 = tpu.matmul %30, %28, %cst_21 {dimension_numbers = #tpu.dot_dimension_numbers<[1], [0], [0], [1], [0, 0, 1, 1], [], []>} : vector<8x32xf32>, vector<32x512xf32>, vector<8x512xf32> -> vector<8x512xf32>
    %32 = arith.addf %24, %31 : vector<8x512xf32>
    %c4 = arith.constant 4 : index
    %c0_22 = arith.constant 0 : index
    %c0_23 = arith.constant 0 : index
    %33 = vector.load %arg3[%c4, %c0_22, %c0_23] : memref<9x8x32xf32, #tpu.memory_space<vmem>>, vector<1x8x32xf32>
    %34 = vector.shape_cast %33 : vector<1x8x32xf32> to vector<8x32xf32>
    %cst_24 = arith.constant dense<0.000000e+00> : vector<8x512xf32>
    %35 = tpu.matmul %34, %1, %cst_24 {dimension_numbers = #tpu.dot_dimension_numbers<[1], [0], [0], [1], [0, 0, 1, 1], [], []>} : vector<8x32xf32>, vector<32x512xf32>, vector<8x512xf32> -> vector<8x512xf32>
    %36 = arith.addf %32, %35 : vector<8x512xf32>
    %c511_i32 = arith.constant 511 : i32
    %37 = tpu.dynamic_rotate %1 by %c511_i32 dim 1 : vector<32x512xf32>, i32 -> vector<32x512xf32>
    %c5 = arith.constant 5 : index
    %c0_25 = arith.constant 0 : index
    %38 = vector.load %arg2[%c5, %c0_25] : memref<9x512xf32, #tpu.memory_space<vmem>>, vector<1x512xf32>
    %39 = vector.broadcast %38 : vector<1x512xf32> to vector<32x512xf32>
    %40 = arith.mulf %37, %39 : vector<32x512xf32>
    %c5_26 = arith.constant 5 : index
    %c0_27 = arith.constant 0 : index
    %c0_28 = arith.constant 0 : index
    %41 = vector.load %arg3[%c5_26, %c0_27, %c0_28] : memref<9x8x32xf32, #tpu.memory_space<vmem>>, vector<1x8x32xf32>
    %42 = vector.shape_cast %41 : vector<1x8x32xf32> to vector<8x32xf32>
    %cst_29 = arith.constant dense<0.000000e+00> : vector<8x512xf32>
    %43 = tpu.matmul %42, %40, %cst_29 {dimension_numbers = #tpu.dot_dimension_numbers<[1], [0], [0], [1], [0, 0, 1, 1], [], []>} : vector<8x32xf32>, vector<32x512xf32>, vector<8x512xf32> -> vector<8x512xf32>
    %44 = arith.addf %36, %43 : vector<8x512xf32>
    %c497_i32 = arith.constant 497 : i32
    %45 = tpu.dynamic_rotate %1 by %c497_i32 dim 1 : vector<32x512xf32>, i32 -> vector<32x512xf32>
    %c6 = arith.constant 6 : index
    %c0_30 = arith.constant 0 : index
    %46 = vector.load %arg2[%c6, %c0_30] : memref<9x512xf32, #tpu.memory_space<vmem>>, vector<1x512xf32>
    %47 = vector.broadcast %46 : vector<1x512xf32> to vector<32x512xf32>
    %48 = arith.mulf %45, %47 : vector<32x512xf32>
    %c6_31 = arith.constant 6 : index
    %c0_32 = arith.constant 0 : index
    %c0_33 = arith.constant 0 : index
    %49 = vector.load %arg3[%c6_31, %c0_32, %c0_33] : memref<9x8x32xf32, #tpu.memory_space<vmem>>, vector<1x8x32xf32>
    %50 = vector.shape_cast %49 : vector<1x8x32xf32> to vector<8x32xf32>
    %cst_34 = arith.constant dense<0.000000e+00> : vector<8x512xf32>
    %51 = tpu.matmul %50, %48, %cst_34 {dimension_numbers = #tpu.dot_dimension_numbers<[1], [0], [0], [1], [0, 0, 1, 1], [], []>} : vector<8x32xf32>, vector<32x512xf32>, vector<8x512xf32> -> vector<8x512xf32>
    %52 = arith.addf %44, %51 : vector<8x512xf32>
    %c496_i32 = arith.constant 496 : i32
    %53 = tpu.dynamic_rotate %1 by %c496_i32 dim 1 : vector<32x512xf32>, i32 -> vector<32x512xf32>
    %c7 = arith.constant 7 : index
    %c0_35 = arith.constant 0 : index
    %54 = vector.load %arg2[%c7, %c0_35] : memref<9x512xf32, #tpu.memory_space<vmem>>, vector<1x512xf32>
    %55 = vector.broadcast %54 : vector<1x512xf32> to vector<32x512xf32>
    %56 = arith.mulf %53, %55 : vector<32x512xf32>
    %c7_36 = arith.constant 7 : index
    %c0_37 = arith.constant 0 : index
    %c0_38 = arith.constant 0 : index
    %57 = vector.load %arg3[%c7_36, %c0_37, %c0_38] : memref<9x8x32xf32, #tpu.memory_space<vmem>>, vector<1x8x32xf32>
    %58 = vector.shape_cast %57 : vector<1x8x32xf32> to vector<8x32xf32>
    %cst_39 = arith.constant dense<0.000000e+00> : vector<8x512xf32>
    %59 = tpu.matmul %58, %56, %cst_39 {dimension_numbers = #tpu.dot_dimension_numbers<[1], [0], [0], [1], [0, 0, 1, 1], [], []>} : vector<8x32xf32>, vector<32x512xf32>, vector<8x512xf32> -> vector<8x512xf32>
    %60 = arith.addf %52, %59 : vector<8x512xf32>
    %c495_i32 = arith.constant 495 : i32
    %61 = tpu.dynamic_rotate %1 by %c495_i32 dim 1 : vector<32x512xf32>, i32 -> vector<32x512xf32>
    %c8 = arith.constant 8 : index
    %c0_40 = arith.constant 0 : index
    %62 = vector.load %arg2[%c8, %c0_40] : memref<9x512xf32, #tpu.memory_space<vmem>>, vector<1x512xf32>
    %63 = vector.broadcast %62 : vector<1x512xf32> to vector<32x512xf32>
    %64 = arith.mulf %61, %63 : vector<32x512xf32>
    %c8_41 = arith.constant 8 : index
    %c0_42 = arith.constant 0 : index
    %c0_43 = arith.constant 0 : index
    %65 = vector.load %arg3[%c8_41, %c0_42, %c0_43] : memref<9x8x32xf32, #tpu.memory_space<vmem>>, vector<1x8x32xf32>
    %66 = vector.shape_cast %65 : vector<1x8x32xf32> to vector<8x32xf32>
    %cst_44 = arith.constant dense<0.000000e+00> : vector<8x512xf32>
    %67 = tpu.matmul %66, %64, %cst_44 {dimension_numbers = #tpu.dot_dimension_numbers<[1], [0], [0], [1], [0, 0, 1, 1], [], []>} : vector<8x32xf32>, vector<32x512xf32>, vector<8x512xf32> -> vector<8x512xf32>
    %68 = arith.addf %60, %67 : vector<8x512xf32>
    %c0_45 = arith.constant 0 : index
    %c0_46 = arith.constant 0 : index
    %69 = vector.load %arg4[%c0_45, %c0_46] : memref<8x1xf32, #tpu.memory_space<vmem>>, vector<8x1xf32>
    %70 = vector.broadcast %69 : vector<8x1xf32> to vector<8x512xf32>
    %71 = arith.addf %68, %70 : vector<8x512xf32>
    %cst_47 = arith.constant 0.000000e+00 : f32
    %72 = vector.broadcast %cst_47 : f32 to vector<8x512xf32>
    %73 = arith.maximumf %71, %72 : vector<8x512xf32>
    %c17_i32_48 = arith.constant 17 : i32
    %74 = tpu.dynamic_rotate %73 by %c17_i32_48 dim 1 : vector<8x512xf32>, i32 -> vector<8x512xf32>
    %c0_49 = arith.constant 0 : index
    %c0_50 = arith.constant 0 : index
    %75 = vector.load %arg2[%c0_49, %c0_50] : memref<9x512xf32, #tpu.memory_space<vmem>>, vector<1x512xf32>
    %76 = vector.broadcast %75 : vector<1x512xf32> to vector<8x512xf32>
    %77 = arith.mulf %74, %76 : vector<8x512xf32>
    %c0_51 = arith.constant 0 : index
    %c0_52 = arith.constant 0 : index
    %c0_53 = arith.constant 0 : index
    %78 = vector.load %arg5[%c0_51, %c0_52, %c0_53] : memref<9x8x8xf32, #tpu.memory_space<vmem>>, vector<1x8x8xf32>
    %79 = vector.shape_cast %78 : vector<1x8x8xf32> to vector<8x8xf32>
    %cst_54 = arith.constant dense<0.000000e+00> : vector<8x512xf32>
    %80 = tpu.matmul %79, %77, %cst_54 {dimension_numbers = #tpu.dot_dimension_numbers<[1], [0], [0], [1], [0, 0, 1, 1], [], []>} : vector<8x8xf32>, vector<8x512xf32>, vector<8x512xf32> -> vector<8x512xf32>
    %c16_i32_55 = arith.constant 16 : i32
    %81 = tpu.dynamic_rotate %73 by %c16_i32_55 dim 1 : vector<8x512xf32>, i32 -> vector<8x512xf32>
    %c1_56 = arith.constant 1 : index
    %c0_57 = arith.constant 0 : index
    %82 = vector.load %arg2[%c1_56, %c0_57] : memref<9x512xf32, #tpu.memory_space<vmem>>, vector<1x512xf32>
    %83 = vector.broadcast %82 : vector<1x512xf32> to vector<8x512xf32>
    %84 = arith.mulf %81, %83 : vector<8x512xf32>
    %c1_58 = arith.constant 1 : index
    %c0_59 = arith.constant 0 : index
    %c0_60 = arith.constant 0 : index
    %85 = vector.load %arg5[%c1_58, %c0_59, %c0_60] : memref<9x8x8xf32, #tpu.memory_space<vmem>>, vector<1x8x8xf32>
    %86 = vector.shape_cast %85 : vector<1x8x8xf32> to vector<8x8xf32>
    %cst_61 = arith.constant dense<0.000000e+00> : vector<8x512xf32>
    %87 = tpu.matmul %86, %84, %cst_61 {dimension_numbers = #tpu.dot_dimension_numbers<[1], [0], [0], [1], [0, 0, 1, 1], [], []>} : vector<8x8xf32>, vector<8x512xf32>, vector<8x512xf32> -> vector<8x512xf32>
    %88 = arith.addf %80, %87 : vector<8x512xf32>
    %c15_i32_62 = arith.constant 15 : i32
    %89 = tpu.dynamic_rotate %73 by %c15_i32_62 dim 1 : vector<8x512xf32>, i32 -> vector<8x512xf32>
    %c2_63 = arith.constant 2 : index
    %c0_64 = arith.constant 0 : index
    %90 = vector.load %arg2[%c2_63, %c0_64] : memref<9x512xf32, #tpu.memory_space<vmem>>, vector<1x512xf32>
    %91 = vector.broadcast %90 : vector<1x512xf32> to vector<8x512xf32>
    %92 = arith.mulf %89, %91 : vector<8x512xf32>
    %c2_65 = arith.constant 2 : index
    %c0_66 = arith.constant 0 : index
    %c0_67 = arith.constant 0 : index
    %93 = vector.load %arg5[%c2_65, %c0_66, %c0_67] : memref<9x8x8xf32, #tpu.memory_space<vmem>>, vector<1x8x8xf32>
    %94 = vector.shape_cast %93 : vector<1x8x8xf32> to vector<8x8xf32>
    %cst_68 = arith.constant dense<0.000000e+00> : vector<8x512xf32>
    %95 = tpu.matmul %94, %92, %cst_68 {dimension_numbers = #tpu.dot_dimension_numbers<[1], [0], [0], [1], [0, 0, 1, 1], [], []>} : vector<8x8xf32>, vector<8x512xf32>, vector<8x512xf32> -> vector<8x512xf32>
    %96 = arith.addf %88, %95 : vector<8x512xf32>
    %c1_i32_69 = arith.constant 1 : i32
    %97 = tpu.dynamic_rotate %73 by %c1_i32_69 dim 1 : vector<8x512xf32>, i32 -> vector<8x512xf32>
    %c3_70 = arith.constant 3 : index
    %c0_71 = arith.constant 0 : index
    %98 = vector.load %arg2[%c3_70, %c0_71] : memref<9x512xf32, #tpu.memory_space<vmem>>, vector<1x512xf32>
    %99 = vector.broadcast %98 : vector<1x512xf32> to vector<8x512xf32>
    %100 = arith.mulf %97, %99 : vector<8x512xf32>
    %c3_72 = arith.constant 3 : index
    %c0_73 = arith.constant 0 : index
    %c0_74 = arith.constant 0 : index
    %101 = vector.load %arg5[%c3_72, %c0_73, %c0_74] : memref<9x8x8xf32, #tpu.memory_space<vmem>>, vector<1x8x8xf32>
    %102 = vector.shape_cast %101 : vector<1x8x8xf32> to vector<8x8xf32>
    %cst_75 = arith.constant dense<0.000000e+00> : vector<8x512xf32>
    %103 = tpu.matmul %102, %100, %cst_75 {dimension_numbers = #tpu.dot_dimension_numbers<[1], [0], [0], [1], [0, 0, 1, 1], [], []>} : vector<8x8xf32>, vector<8x512xf32>, vector<8x512xf32> -> vector<8x512xf32>
    %104 = arith.addf %96, %103 : vector<8x512xf32>
    %c4_76 = arith.constant 4 : index
    %c0_77 = arith.constant 0 : index
    %c0_78 = arith.constant 0 : index
    %105 = vector.load %arg5[%c4_76, %c0_77, %c0_78] : memref<9x8x8xf32, #tpu.memory_space<vmem>>, vector<1x8x8xf32>
    %106 = vector.shape_cast %105 : vector<1x8x8xf32> to vector<8x8xf32>
    %cst_79 = arith.constant dense<0.000000e+00> : vector<8x512xf32>
    %107 = tpu.matmul %106, %73, %cst_79 {dimension_numbers = #tpu.dot_dimension_numbers<[1], [0], [0], [1], [0, 0, 1, 1], [], []>} : vector<8x8xf32>, vector<8x512xf32>, vector<8x512xf32> -> vector<8x512xf32>
    %108 = arith.addf %104, %107 : vector<8x512xf32>
    %c511_i32_80 = arith.constant 511 : i32
    %109 = tpu.dynamic_rotate %73 by %c511_i32_80 dim 1 : vector<8x512xf32>, i32 -> vector<8x512xf32>
    %c5_81 = arith.constant 5 : index
    %c0_82 = arith.constant 0 : index
    %110 = vector.load %arg2[%c5_81, %c0_82] : memref<9x512xf32, #tpu.memory_space<vmem>>, vector<1x512xf32>
    %111 = vector.broadcast %110 : vector<1x512xf32> to vector<8x512xf32>
    %112 = arith.mulf %109, %111 : vector<8x512xf32>
    %c5_83 = arith.constant 5 : index
    %c0_84 = arith.constant 0 : index
    %c0_85 = arith.constant 0 : index
    %113 = vector.load %arg5[%c5_83, %c0_84, %c0_85] : memref<9x8x8xf32, #tpu.memory_space<vmem>>, vector<1x8x8xf32>
    %114 = vector.shape_cast %113 : vector<1x8x8xf32> to vector<8x8xf32>
    %cst_86 = arith.constant dense<0.000000e+00> : vector<8x512xf32>
    %115 = tpu.matmul %114, %112, %cst_86 {dimension_numbers = #tpu.dot_dimension_numbers<[1], [0], [0], [1], [0, 0, 1, 1], [], []>} : vector<8x8xf32>, vector<8x512xf32>, vector<8x512xf32> -> vector<8x512xf32>
    %116 = arith.addf %108, %115 : vector<8x512xf32>
    %c497_i32_87 = arith.constant 497 : i32
    %117 = tpu.dynamic_rotate %73 by %c497_i32_87 dim 1 : vector<8x512xf32>, i32 -> vector<8x512xf32>
    %c6_88 = arith.constant 6 : index
    %c0_89 = arith.constant 0 : index
    %118 = vector.load %arg2[%c6_88, %c0_89] : memref<9x512xf32, #tpu.memory_space<vmem>>, vector<1x512xf32>
    %119 = vector.broadcast %118 : vector<1x512xf32> to vector<8x512xf32>
    %120 = arith.mulf %117, %119 : vector<8x512xf32>
    %c6_90 = arith.constant 6 : index
    %c0_91 = arith.constant 0 : index
    %c0_92 = arith.constant 0 : index
    %121 = vector.load %arg5[%c6_90, %c0_91, %c0_92] : memref<9x8x8xf32, #tpu.memory_space<vmem>>, vector<1x8x8xf32>
    %122 = vector.shape_cast %121 : vector<1x8x8xf32> to vector<8x8xf32>
    %cst_93 = arith.constant dense<0.000000e+00> : vector<8x512xf32>
    %123 = tpu.matmul %122, %120, %cst_93 {dimension_numbers = #tpu.dot_dimension_numbers<[1], [0], [0], [1], [0, 0, 1, 1], [], []>} : vector<8x8xf32>, vector<8x512xf32>, vector<8x512xf32> -> vector<8x512xf32>
    %124 = arith.addf %116, %123 : vector<8x512xf32>
    %c496_i32_94 = arith.constant 496 : i32
    %125 = tpu.dynamic_rotate %73 by %c496_i32_94 dim 1 : vector<8x512xf32>, i32 -> vector<8x512xf32>
    %c7_95 = arith.constant 7 : index
    %c0_96 = arith.constant 0 : index
    %126 = vector.load %arg2[%c7_95, %c0_96] : memref<9x512xf32, #tpu.memory_space<vmem>>, vector<1x512xf32>
    %127 = vector.broadcast %126 : vector<1x512xf32> to vector<8x512xf32>
    %128 = arith.mulf %125, %127 : vector<8x512xf32>
    %c7_97 = arith.constant 7 : index
    %c0_98 = arith.constant 0 : index
    %c0_99 = arith.constant 0 : index
    %129 = vector.load %arg5[%c7_97, %c0_98, %c0_99] : memref<9x8x8xf32, #tpu.memory_space<vmem>>, vector<1x8x8xf32>
    %130 = vector.shape_cast %129 : vector<1x8x8xf32> to vector<8x8xf32>
    %cst_100 = arith.constant dense<0.000000e+00> : vector<8x512xf32>
    %131 = tpu.matmul %130, %128, %cst_100 {dimension_numbers = #tpu.dot_dimension_numbers<[1], [0], [0], [1], [0, 0, 1, 1], [], []>} : vector<8x8xf32>, vector<8x512xf32>, vector<8x512xf32> -> vector<8x512xf32>
    %132 = arith.addf %124, %131 : vector<8x512xf32>
    %c495_i32_101 = arith.constant 495 : i32
    %133 = tpu.dynamic_rotate %73 by %c495_i32_101 dim 1 : vector<8x512xf32>, i32 -> vector<8x512xf32>
    %c8_102 = arith.constant 8 : index
    %c0_103 = arith.constant 0 : index
    %134 = vector.load %arg2[%c8_102, %c0_103] : memref<9x512xf32, #tpu.memory_space<vmem>>, vector<1x512xf32>
    %135 = vector.broadcast %134 : vector<1x512xf32> to vector<8x512xf32>
    %136 = arith.mulf %133, %135 : vector<8x512xf32>
    %c8_104 = arith.constant 8 : index
    %c0_105 = arith.constant 0 : index
    %c0_106 = arith.constant 0 : index
    %137 = vector.load %arg5[%c8_104, %c0_105, %c0_106] : memref<9x8x8xf32, #tpu.memory_space<vmem>>, vector<1x8x8xf32>
    %138 = vector.shape_cast %137 : vector<1x8x8xf32> to vector<8x8xf32>
    %cst_107 = arith.constant dense<0.000000e+00> : vector<8x512xf32>
    %139 = tpu.matmul %138, %136, %cst_107 {dimension_numbers = #tpu.dot_dimension_numbers<[1], [0], [0], [1], [0, 0, 1, 1], [], []>} : vector<8x8xf32>, vector<8x512xf32>, vector<8x512xf32> -> vector<8x512xf32>
    %140 = arith.addf %132, %139 : vector<8x512xf32>
    %c0_108 = arith.constant 0 : index
    %c0_109 = arith.constant 0 : index
    %141 = vector.load %arg6[%c0_108, %c0_109] : memref<8x1xf32, #tpu.memory_space<vmem>>, vector<8x1xf32>
    %142 = vector.broadcast %141 : vector<8x1xf32> to vector<8x512xf32>
    %143 = arith.addf %140, %142 : vector<8x512xf32>
    %cst_110 = arith.constant 0.000000e+00 : f32
    %144 = vector.broadcast %cst_110 : f32 to vector<8x512xf32>
    %145 = arith.maximumf %143, %144 : vector<8x512xf32>
    %c17_i32_111 = arith.constant 17 : i32
    %146 = tpu.dynamic_rotate %145 by %c17_i32_111 dim 1 : vector<8x512xf32>, i32 -> vector<8x512xf32>
    %c0_112 = arith.constant 0 : index
    %c0_113 = arith.constant 0 : index
    %147 = vector.load %arg2[%c0_112, %c0_113] : memref<9x512xf32, #tpu.memory_space<vmem>>, vector<1x512xf32>
    %148 = vector.broadcast %147 : vector<1x512xf32> to vector<8x512xf32>
    %149 = arith.mulf %146, %148 : vector<8x512xf32>
    %c0_114 = arith.constant 0 : index
    %c0_115 = arith.constant 0 : index
    %c0_116 = arith.constant 0 : index
    %150 = vector.load %arg7[%c0_114, %c0_115, %c0_116] : memref<9x8x8xf32, #tpu.memory_space<vmem>>, vector<1x8x8xf32>
    %151 = vector.shape_cast %150 : vector<1x8x8xf32> to vector<8x8xf32>
    %cst_117 = arith.constant dense<0.000000e+00> : vector<8x512xf32>
    %152 = tpu.matmul %151, %149, %cst_117 {dimension_numbers = #tpu.dot_dimension_numbers<[1], [0], [0], [1], [0, 0, 1, 1], [], []>} : vector<8x8xf32>, vector<8x512xf32>, vector<8x512xf32> -> vector<8x512xf32>
    %c16_i32_118 = arith.constant 16 : i32
    %153 = tpu.dynamic_rotate %145 by %c16_i32_118 dim 1 : vector<8x512xf32>, i32 -> vector<8x512xf32>
    %c1_119 = arith.constant 1 : index
    %c0_120 = arith.constant 0 : index
    %154 = vector.load %arg2[%c1_119, %c0_120] : memref<9x512xf32, #tpu.memory_space<vmem>>, vector<1x512xf32>
    %155 = vector.broadcast %154 : vector<1x512xf32> to vector<8x512xf32>
    %156 = arith.mulf %153, %155 : vector<8x512xf32>
    %c1_121 = arith.constant 1 : index
    %c0_122 = arith.constant 0 : index
    %c0_123 = arith.constant 0 : index
    %157 = vector.load %arg7[%c1_121, %c0_122, %c0_123] : memref<9x8x8xf32, #tpu.memory_space<vmem>>, vector<1x8x8xf32>
    %158 = vector.shape_cast %157 : vector<1x8x8xf32> to vector<8x8xf32>
    %cst_124 = arith.constant dense<0.000000e+00> : vector<8x512xf32>
    %159 = tpu.matmul %158, %156, %cst_124 {dimension_numbers = #tpu.dot_dimension_numbers<[1], [0], [0], [1], [0, 0, 1, 1], [], []>} : vector<8x8xf32>, vector<8x512xf32>, vector<8x512xf32> -> vector<8x512xf32>
    %160 = arith.addf %152, %159 : vector<8x512xf32>
    %c15_i32_125 = arith.constant 15 : i32
    %161 = tpu.dynamic_rotate %145 by %c15_i32_125 dim 1 : vector<8x512xf32>, i32 -> vector<8x512xf32>
    %c2_126 = arith.constant 2 : index
    %c0_127 = arith.constant 0 : index
    %162 = vector.load %arg2[%c2_126, %c0_127] : memref<9x512xf32, #tpu.memory_space<vmem>>, vector<1x512xf32>
    %163 = vector.broadcast %162 : vector<1x512xf32> to vector<8x512xf32>
    %164 = arith.mulf %161, %163 : vector<8x512xf32>
    %c2_128 = arith.constant 2 : index
    %c0_129 = arith.constant 0 : index
    %c0_130 = arith.constant 0 : index
    %165 = vector.load %arg7[%c2_128, %c0_129, %c0_130] : memref<9x8x8xf32, #tpu.memory_space<vmem>>, vector<1x8x8xf32>
    %166 = vector.shape_cast %165 : vector<1x8x8xf32> to vector<8x8xf32>
    %cst_131 = arith.constant dense<0.000000e+00> : vector<8x512xf32>
    %167 = tpu.matmul %166, %164, %cst_131 {dimension_numbers = #tpu.dot_dimension_numbers<[1], [0], [0], [1], [0, 0, 1, 1], [], []>} : vector<8x8xf32>, vector<8x512xf32>, vector<8x512xf32> -> vector<8x512xf32>
    %168 = arith.addf %160, %167 : vector<8x512xf32>
    %c1_i32_132 = arith.constant 1 : i32
    %169 = tpu.dynamic_rotate %145 by %c1_i32_132 dim 1 : vector<8x512xf32>, i32 -> vector<8x512xf32>
    %c3_133 = arith.constant 3 : index
    %c0_134 = arith.constant 0 : index
    %170 = vector.load %arg2[%c3_133, %c0_134] : memref<9x512xf32, #tpu.memory_space<vmem>>, vector<1x512xf32>
    %171 = vector.broadcast %170 : vector<1x512xf32> to vector<8x512xf32>
    %172 = arith.mulf %169, %171 : vector<8x512xf32>
    %c3_135 = arith.constant 3 : index
    %c0_136 = arith.constant 0 : index
    %c0_137 = arith.constant 0 : index
    %173 = vector.load %arg7[%c3_135, %c0_136, %c0_137] : memref<9x8x8xf32, #tpu.memory_space<vmem>>, vector<1x8x8xf32>
    %174 = vector.shape_cast %173 : vector<1x8x8xf32> to vector<8x8xf32>
    %cst_138 = arith.constant dense<0.000000e+00> : vector<8x512xf32>
    %175 = tpu.matmul %174, %172, %cst_138 {dimension_numbers = #tpu.dot_dimension_numbers<[1], [0], [0], [1], [0, 0, 1, 1], [], []>} : vector<8x8xf32>, vector<8x512xf32>, vector<8x512xf32> -> vector<8x512xf32>
    %176 = arith.addf %168, %175 : vector<8x512xf32>
    %c4_139 = arith.constant 4 : index
    %c0_140 = arith.constant 0 : index
    %c0_141 = arith.constant 0 : index
    %177 = vector.load %arg7[%c4_139, %c0_140, %c0_141] : memref<9x8x8xf32, #tpu.memory_space<vmem>>, vector<1x8x8xf32>
    %178 = vector.shape_cast %177 : vector<1x8x8xf32> to vector<8x8xf32>
    %cst_142 = arith.constant dense<0.000000e+00> : vector<8x512xf32>
    %179 = tpu.matmul %178, %145, %cst_142 {dimension_numbers = #tpu.dot_dimension_numbers<[1], [0], [0], [1], [0, 0, 1, 1], [], []>} : vector<8x8xf32>, vector<8x512xf32>, vector<8x512xf32> -> vector<8x512xf32>
    %180 = arith.addf %176, %179 : vector<8x512xf32>
    %c511_i32_143 = arith.constant 511 : i32
    %181 = tpu.dynamic_rotate %145 by %c511_i32_143 dim 1 : vector<8x512xf32>, i32 -> vector<8x512xf32>
    %c5_144 = arith.constant 5 : index
    %c0_145 = arith.constant 0 : index
    %182 = vector.load %arg2[%c5_144, %c0_145] : memref<9x512xf32, #tpu.memory_space<vmem>>, vector<1x512xf32>
    %183 = vector.broadcast %182 : vector<1x512xf32> to vector<8x512xf32>
    %184 = arith.mulf %181, %183 : vector<8x512xf32>
    %c5_146 = arith.constant 5 : index
    %c0_147 = arith.constant 0 : index
    %c0_148 = arith.constant 0 : index
    %185 = vector.load %arg7[%c5_146, %c0_147, %c0_148] : memref<9x8x8xf32, #tpu.memory_space<vmem>>, vector<1x8x8xf32>
    %186 = vector.shape_cast %185 : vector<1x8x8xf32> to vector<8x8xf32>
    %cst_149 = arith.constant dense<0.000000e+00> : vector<8x512xf32>
    %187 = tpu.matmul %186, %184, %cst_149 {dimension_numbers = #tpu.dot_dimension_numbers<[1], [0], [0], [1], [0, 0, 1, 1], [], []>} : vector<8x8xf32>, vector<8x512xf32>, vector<8x512xf32> -> vector<8x512xf32>
    %188 = arith.addf %180, %187 : vector<8x512xf32>
    %c497_i32_150 = arith.constant 497 : i32
    %189 = tpu.dynamic_rotate %145 by %c497_i32_150 dim 1 : vector<8x512xf32>, i32 -> vector<8x512xf32>
    %c6_151 = arith.constant 6 : index
    %c0_152 = arith.constant 0 : index
    %190 = vector.load %arg2[%c6_151, %c0_152] : memref<9x512xf32, #tpu.memory_space<vmem>>, vector<1x512xf32>
    %191 = vector.broadcast %190 : vector<1x512xf32> to vector<8x512xf32>
    %192 = arith.mulf %189, %191 : vector<8x512xf32>
    %c6_153 = arith.constant 6 : index
    %c0_154 = arith.constant 0 : index
    %c0_155 = arith.constant 0 : index
    %193 = vector.load %arg7[%c6_153, %c0_154, %c0_155] : memref<9x8x8xf32, #tpu.memory_space<vmem>>, vector<1x8x8xf32>
    %194 = vector.shape_cast %193 : vector<1x8x8xf32> to vector<8x8xf32>
    %cst_156 = arith.constant dense<0.000000e+00> : vector<8x512xf32>
    %195 = tpu.matmul %194, %192, %cst_156 {dimension_numbers = #tpu.dot_dimension_numbers<[1], [0], [0], [1], [0, 0, 1, 1], [], []>} : vector<8x8xf32>, vector<8x512xf32>, vector<8x512xf32> -> vector<8x512xf32>
    %196 = arith.addf %188, %195 : vector<8x512xf32>
    %c496_i32_157 = arith.constant 496 : i32
    %197 = tpu.dynamic_rotate %145 by %c496_i32_157 dim 1 : vector<8x512xf32>, i32 -> vector<8x512xf32>
    %c7_158 = arith.constant 7 : index
    %c0_159 = arith.constant 0 : index
    %198 = vector.load %arg2[%c7_158, %c0_159] : memref<9x512xf32, #tpu.memory_space<vmem>>, vector<1x512xf32>
    %199 = vector.broadcast %198 : vector<1x512xf32> to vector<8x512xf32>
    %200 = arith.mulf %197, %199 : vector<8x512xf32>
    %c7_160 = arith.constant 7 : index
    %c0_161 = arith.constant 0 : index
    %c0_162 = arith.constant 0 : index
    %201 = vector.load %arg7[%c7_160, %c0_161, %c0_162] : memref<9x8x8xf32, #tpu.memory_space<vmem>>, vector<1x8x8xf32>
    %202 = vector.shape_cast %201 : vector<1x8x8xf32> to vector<8x8xf32>
    %cst_163 = arith.constant dense<0.000000e+00> : vector<8x512xf32>
    %203 = tpu.matmul %202, %200, %cst_163 {dimension_numbers = #tpu.dot_dimension_numbers<[1], [0], [0], [1], [0, 0, 1, 1], [], []>} : vector<8x8xf32>, vector<8x512xf32>, vector<8x512xf32> -> vector<8x512xf32>
    %204 = arith.addf %196, %203 : vector<8x512xf32>
    %c495_i32_164 = arith.constant 495 : i32
    %205 = tpu.dynamic_rotate %145 by %c495_i32_164 dim 1 : vector<8x512xf32>, i32 -> vector<8x512xf32>
    %c8_165 = arith.constant 8 : index
    %c0_166 = arith.constant 0 : index
    %206 = vector.load %arg2[%c8_165, %c0_166] : memref<9x512xf32, #tpu.memory_space<vmem>>, vector<1x512xf32>
    %207 = vector.broadcast %206 : vector<1x512xf32> to vector<8x512xf32>
    %208 = arith.mulf %205, %207 : vector<8x512xf32>
    %c8_167 = arith.constant 8 : index
    %c0_168 = arith.constant 0 : index
    %c0_169 = arith.constant 0 : index
    %209 = vector.load %arg7[%c8_167, %c0_168, %c0_169] : memref<9x8x8xf32, #tpu.memory_space<vmem>>, vector<1x8x8xf32>
    %210 = vector.shape_cast %209 : vector<1x8x8xf32> to vector<8x8xf32>
    %cst_170 = arith.constant dense<0.000000e+00> : vector<8x512xf32>
    %211 = tpu.matmul %210, %208, %cst_170 {dimension_numbers = #tpu.dot_dimension_numbers<[1], [0], [0], [1], [0, 0, 1, 1], [], []>} : vector<8x8xf32>, vector<8x512xf32>, vector<8x512xf32> -> vector<8x512xf32>
    %212 = arith.addf %204, %211 : vector<8x512xf32>
    %c0_171 = arith.constant 0 : index
    %c0_172 = arith.constant 0 : index
    %213 = vector.load %arg8[%c0_171, %c0_172] : memref<8x1xf32, #tpu.memory_space<vmem>>, vector<8x1xf32>
    %214 = vector.broadcast %213 : vector<8x1xf32> to vector<8x512xf32>
    %215 = arith.addf %212, %214 : vector<8x512xf32>
    %c0_173 = arith.constant 0 : index
    %c0_174 = arith.constant 0 : index
    %216 = vector.load %arg9[%c0_173, %c0_174] : memref<10x8xf32, #tpu.memory_space<vmem>>, vector<10x8xf32>
    %cst_175 = arith.constant dense<0.000000e+00> : vector<10x512xf32>
    %217 = tpu.matmul %216, %215, %cst_175 {dimension_numbers = #tpu.dot_dimension_numbers<[1], [0], [0], [1], [0, 0, 1, 1], [], []>} : vector<10x8xf32>, vector<8x512xf32>, vector<10x512xf32> -> vector<10x512xf32>
    %c0_176 = arith.constant 0 : index
    %c0_177 = arith.constant 0 : index
    %218 = vector.load %arg11[%c0_176, %c0_177] : memref<512x2xf32, #tpu.memory_space<vmem>>, vector<512x2xf32>
    %cst_178 = arith.constant dense<0.000000e+00> : vector<10x2xf32>
    %219 = tpu.matmul %217, %218, %cst_178 {dimension_numbers = #tpu.dot_dimension_numbers<[1], [0], [0], [1], [0, 0, 1, 1], [], []>} : vector<10x512xf32>, vector<512x2xf32>, vector<10x2xf32> -> vector<10x2xf32>
    %c0_179 = arith.constant 0 : index
    %c0_180 = arith.constant 0 : index
    %220 = vector.load %arg10[%c0_179, %c0_180] : memref<10x1xf32, #tpu.memory_space<vmem>>, vector<10x1xf32>
    %221 = vector.broadcast %220 : vector<10x1xf32> to vector<10x2xf32>
    %222 = arith.addf %219, %221 : vector<10x2xf32>
    %c0_181 = arith.constant 0 : index
    %c0_182 = arith.constant 0 : index
    %c0_183 = arith.constant 0 : index
    %223 = vector.load %arg12[%c0_181, %c0_182, %c0_183] : memref<1x10x2xf32, #tpu.memory_space<vmem>>, vector<1x10x2xf32>
    %224 = vector.shape_cast %223 : vector<1x10x2xf32> to vector<10x2xf32>
    %225 = vector.shape_cast %222 : vector<10x2xf32> to vector<1x10x2xf32>
    tpu.vector_store %arg12[%c0_181, %c0_182, %c0_183], %225 {strides = array<i32>} : memref<1x10x2xf32, #tpu.memory_space<vmem>>, vector<1x10x2xf32>,
    return
  }
  func.func @transform_0(%arg0: i32) -> (i32, i32, i32) {
    %c0_i32 = arith.constant 0 : i32
    %c0_i32_0 = arith.constant 0 : i32
    %c0_i32_1 = arith.constant 0 : i32
    return %arg0, %c0_i32, %c0_i32_0 : i32, i32, i32
  }
  func.func @transform_1(%arg0: i32) -> (i32, i32) {
    %c0_i32 = arith.constant 0 : i32
    %c0_i32_0 = arith.constant 0 : i32
    %c0_i32_1 = arith.constant 0 : i32
    return %c0_i32, %c0_i32_0 : i32, i32
  }
  func.func @transform_2(%arg0: i32) -> (i32, i32, i32) {
    %c0_i32 = arith.constant 0 : i32
    %c0_i32_0 = arith.constant 0 : i32
    %c0_i32_1 = arith.constant 0 : i32
    %c0_i32_2 = arith.constant 0 : i32
    return %c0_i32, %c0_i32_0, %c0_i32_1 : i32, i32, i32
  }
  func.func @transform_3(%arg0: i32) -> (i32, i32) {
    %c0_i32 = arith.constant 0 : i32
    %c0_i32_0 = arith.constant 0 : i32
    %c0_i32_1 = arith.constant 0 : i32
    return %c0_i32, %c0_i32_0 : i32, i32
  }
  func.func @transform_4(%arg0: i32) -> (i32, i32, i32) {
    %c0_i32 = arith.constant 0 : i32
    %c0_i32_0 = arith.constant 0 : i32
    %c0_i32_1 = arith.constant 0 : i32
    %c0_i32_2 = arith.constant 0 : i32
    return %c0_i32, %c0_i32_0, %c0_i32_1 : i32, i32, i32
  }
  func.func @transform_5(%arg0: i32) -> (i32, i32) {
    %c0_i32 = arith.constant 0 : i32
    %c0_i32_0 = arith.constant 0 : i32
    %c0_i32_1 = arith.constant 0 : i32
    return %c0_i32, %c0_i32_0 : i32, i32
  }
  func.func @transform_6(%arg0: i32) -> (i32, i32, i32) {
    %c0_i32 = arith.constant 0 : i32
    %c0_i32_0 = arith.constant 0 : i32
    %c0_i32_1 = arith.constant 0 : i32
    %c0_i32_2 = arith.constant 0 : i32
    return %c0_i32, %c0_i32_0, %c0_i32_1 : i32, i32, i32
  }
  func.func @transform_7(%arg0: i32) -> (i32, i32) {
    %c0_i32 = arith.constant 0 : i32
    %c0_i32_0 = arith.constant 0 : i32
    %c0_i32_1 = arith.constant 0 : i32
    return %c0_i32, %c0_i32_0 : i32, i32
  }
  func.func @transform_8(%arg0: i32) -> (i32, i32) {
    %c0_i32 = arith.constant 0 : i32
    %c0_i32_0 = arith.constant 0 : i32
    %c0_i32_1 = arith.constant 0 : i32
    return %c0_i32, %c0_i32_0 : i32, i32
  }
  func.func @transform_9(%arg0: i32) -> (i32, i32) {
    %c0_i32 = arith.constant 0 : i32
    %c0_i32_0 = arith.constant 0 : i32
    %c0_i32_1 = arith.constant 0 : i32
    return %c0_i32, %c0_i32_0 : i32, i32
  }
  func.func @transform_10(%arg0: i32) -> (i32, i32) {
    %c0_i32 = arith.constant 0 : i32
    %c0_i32_0 = arith.constant 0 : i32
    %c0_i32_1 = arith.constant 0 : i32
    return %c0_i32, %c0_i32_0 : i32, i32
  }
  func.func @transform_11(%arg0: i32) -> (i32, i32, i32) {
    %c0_i32 = arith.constant 0 : i32
    %c0_i32_0 = arith.constant 0 : i32
    %c0_i32_1 = arith.constant 0 : i32
    return %arg0, %c0_i32, %c0_i32_0 : i32, i32, i32
  }
}

</mosaic_0001>

<bundles_post_ra>
// kernel: tpu_custom_call.1
= control target key start
LH: loop header
LB: loop body
LE: loop exit
PB: predicated region body
PF: predicated region fallthrough
CT: control target
= control target key end

     0   :  { %s6481_s17 = smov 0   ;;  %s8100_s0 = inlined_call_operand.vmem [shape: f32[2,32,512], index: 0, kind: input, shape index: {}]   ;;  %s8101_s1 = inlined_call_operand.vmem [shape: f32[9,512], index: 1, kind: input, shape index: {}]   ;;  %s8102_s2 = inlined_call_operand.vmem [shape: f32[9,8,32], index: 2, kind: input, shape index: {}]   ;;  %s8103_s3 = inlined_call_operand.vmem [shape: f32[8,1], index: 3, kind: input, shape index: {}]   ;;  %s8104_s4 = inlined_call_operand.vmem [shape: f32[9,8,8], index: 4, kind: input, shape index: {}]   ;;  %s8105_s5 = inlined_call_operand.vmem [shape: f32[8,1], index: 5, kind: input, shape index: {}]   ;;  %s8106_s6 = inlined_call_operand.vmem [shape: f32[9,8,8], index: 6, kind: input, shape index: {}]   ;;  %s8107_s7 = inlined_call_operand.vmem [shape: f32[8,1], index: 7, kind: input, shape index: {}]   ;;  %s8108_s8 = inlined_call_operand.vmem [shape: f32[10,8], index: 8, kind: input, shape index: {}]   ;;  %s8109_s9 = inlined_call_operand.vmem [shape: f32[10,1], index: 9, kind: input, shape index: {}]   ;;  %s8110_s10 = inlined_call_operand.vmem [shape: f32[512,2], index: 10, kind: input, shape index: {}]   ;;  %s8111_s11 = inlined_call_operand.vmem [shape: f32[2,10,2], index: 11, kind: output, shape index: {}]  }
   0x1 LB: > { %s5901_s18 = sadd.s32 4294967295, %s6409_s17   ;;  %p5905_p0 = scmp.ge.s32.totalorder %s6409_s17, 1  ;;  %s6409_s17 = sphi %s6481_s17, %s21_s17  }
   0x2   : > { %p337_p1 = scmp.lt.s32.totalorder %s6409_s17, 3 }
   0x4   : > { %p338_p2 = pnand %p5905_p0, %p337_p1 }
   0x5   : > { %p377_p3 = scmp.lt.s32.totalorder (!%p338_p2), %s5901_s18, 1  ;;  %s6411_s23 = smov (!%p338_p2), 16   ;;  %v6413_v16 = vmov (!%p338_p2), 0.0   ;;  %v435_v17 = vlaneseq (!%p338_p2)  ;;  %v5910_v21 = vld [vmem:[%s8101_s1 + $0x1] ss:$8 sm:$0xf] (!%p338_p2) }
   0x6   : > { %341 = sbr.rel (%p338_p2) target bundleno = 1854 (0x73e), region = 64  ;;  %s6412_s24 = smov (!%p338_p2), 17   ;;  %651 = vmatprep.mubr.f32.mxu0 (!%p338_p2), %v6413_v16  ;;  %722 = vmatprep.mubr.f32.mxu1 (!%p338_p2), %v6413_v16  ;;  %vm583_vm2 = vcmask (!%p338_p2), 261120   ;;  %vm2508_vm9 = vcmask (!%p338_p2), 64512   ;;  %vm5842_vm10 = vcmask (!%p338_p2), 15360   ;;  %vm5844_vm11 = vcmask (!%p338_p2), 9216  }
   0x7   : > { %s6414_s25 = smov (!%p338_p2), 15   ;;  %s6415_s26 = smov (!%p338_p2), 1   ;;  %v457_v18 = vshrl.u32 (!%p338_p2), %v435_v17, 7  ;;  %v6659_v19 = vand.u32 (!%p338_p2), 127, %v435_v17 }
   0x8   : > { %s6416_s29 = smov (!%p338_p2), 127   ;;  %s6417_s15 = smov (!%p338_p2), 113  }
   0x9   : > { %v6665_v20 = vsub.s32 (!%p338_p2), 1, %v457_v18  ;;  %vm525_vm0 = vcmp.lt.s32.totalorder (!%p338_p2), %v6659_v19, 16  ;;  %v6680_v28 = vsub.s32 (!%p338_p2), 2, %v457_v18  ;;  %v6690_v32 = vsub.s32 (!%p338_p2), 0, %v457_v18  ;;  %s6419_s13 = smov (!%p338_p2), 111  }
   0xa   : > { %v6692_v33 = vsub.s32 (!%p338_p2), 3, %v457_v18  ;;  %vm437_vm1 = vcmp.lt.s32.totalorder (!%p338_p2), %v6659_v19, 17  ;;  %vm906_vm3 = vcmp.lt.s32.totalorder (!%p338_p2), %v6659_v19, 15  ;;  %vm1145_vm4 = vcmp.lt.s32.totalorder (!%p338_p2), %v6659_v19, 1 }
   0xb   : > { %v6676_v24 = vrot.slane (!%p338_p2), %v5910_v21, %v6665_v20  ;;  %v6695_v37 = vrot.slane (!%p338_p2), %v5910_v21, %v6680_v28  ;;  %v6706_v40 = vrot.slane (!%p338_p2), %v5910_v21, %v6690_v32  ;;  %vm1535_vm5 = vcmp.lt.s32.totalorder (!%p338_p2), %v6659_v19, 127 }
   0xc   : > { %v6709_v41 = vrot.slane (!%p338_p2), %v5910_v21, %v6692_v33  ;;  %vm1774_vm6 = vcmp.lt.s32.totalorder (!%p338_p2), %v6659_v19, 113  ;;  %vm2013_vm7 = vcmp.lt.s32.totalorder (!%p338_p2), %v6659_v19, 112  ;;  %vm2252_vm8 = vcmp.lt.s32.totalorder (!%p338_p2), %v6659_v19, 111  ;;  %v5992_v19 = vld [vmem:[%s8106_s6 + $0x40] sm:$0xff] (!%p338_p2) }
   0xd   : > { %s8113_s18 = smov (!%p377_p3, %s5901_s18), 1 }
   0xe   : > { %s6001_s19 = sshll.u32 %s8113_s18, 7 }
   0xf   : > { %s6495_s22 = scalar_lea.vmem %s8100_s0, %s6001_s19 }
  0x10   : > { %v6498_v0 = vld [vmem:[%s6495_s22 + $0x8] sm:$0xff]  ;;  %v6501_v1 = vld [vmem:[%s6495_s22] sm:$0xff]  ;;  %v6518_v4 = vld [vmem:[%s6495_s22 + $0x30] sm:$0xff] }
  0x11   : > { %501 = vrot.lane.b32.xlu1 %v6498_v0, %s6411_s23  ;;  %493 = vrot.lane.b32.xlu0 %v6501_v1, %s6411_s23  ;;  %v6508_v2 = vld [vmem:[%s6495_s22 + $0x28] sm:$0xff]  ;;  %v6511_v3 = vld [vmem:[%s6495_s22 + $0x20] sm:$0xff] }
  0x12   : > { %v6521_v5 = vld [vmem:[%s6495_s22 + $0x10] sm:$0xff]  ;;  %v6528_v6 = vld [vmem:[%s6495_s22 + $0x38] sm:$0xff]  ;;  %v6538_v8 = vld [vmem:[%s6495_s22 + $0x60] sm:$0xff] }
  0x13   : > { %v6531_v7 = vld [vmem:[%s6495_s22 + $0x18] sm:$0xff]  ;;  %v6541_v9 = vld [vmem:[%s6495_s22 + $0x40] sm:$0xff]  ;;  %v6548_v10 = vld [vmem:[%s6495_s22 + $0x68] sm:$0xff] }
  0x14   : > { %v6551_v11 = vld [vmem:[%s6495_s22 + $0x48] sm:$0xff]  ;;  %v6558_v12 = vld [vmem:[%s6495_s22 + $0x70] sm:$0xff]  ;;  %v6568_v14 = vld [vmem:[%s6495_s22 + $0x78] sm:$0xff] }
  0x15   : > { %503 = vrot.lane.b32.xlu1 %v6508_v2, %s6411_s23  ;;  %495 = vrot.lane.b32.xlu0 %v6511_v3, %s6411_s23  ;;  %v6561_v13 = vld [vmem:[%s6495_s22 + $0x50] sm:$0xff]  ;;  %v6571_v15 = vld [vmem:[%s6495_s22 + $0x58] sm:$0xff]  ;;  %s6418_s22 = smov 112  }
  0x19   : > { %511 = vrot.lane.b32.xlu1 %v6518_v4, %s6411_s23  ;;  %509 = vrot.lane.b32.xlu0 %v6521_v5, %s6411_s23 }
  0x1d   : > { %519 = vrot.lane.b32.xlu1 %v6528_v6, %s6411_s23  ;;  %517 = vrot.lane.b32.xlu0 %v6531_v7, %s6411_s23 }
  0x21   : > { %499 = vrot.lane.b32.xlu1 %v6538_v8, %s6411_s23  ;;  %497 = vrot.lane.b32.xlu0 %v6541_v9, %s6411_s23 }
  0x25   : > { %507 = vrot.lane.b32.xlu1 %v6548_v10, %s6411_s23  ;;  %505 = vrot.lane.b32.xlu0 %v6551_v11, %s6411_s23 }
  0x29   : > { %515 = vrot.lane.b32.xlu1 %v6558_v12, %s6411_s23  ;;  %513 = vrot.lane.b32.xlu0 %v6561_v13, %s6411_s23 }
  0x2d   : > { %523 = vrot.lane.b32.xlu1 %v6568_v14, %s6411_s23  ;;  %521 = vrot.lane.b32.xlu0 %v6571_v15, %s6411_s23 }
  0x31   : > { %405 = vrot.lane.b32.xlu1 %v6511_v3, %s6412_s24  ;;  %403 = vrot.lane.b32.xlu0 %v6501_v1, %s6412_s24 }
  0x35   : > { %413 = vrot.lane.b32.xlu1 %v6508_v2, %s6412_s24  ;;  %411 = vrot.lane.b32.xlu0 %v6498_v0, %s6412_s24 }
  0x39   : > { %421 = vrot.lane.b32.xlu1 %v6518_v4, %s6412_s24  ;;  %419 = vrot.lane.b32.xlu0 %v6521_v5, %s6412_s24 }
  0x3d   : > { %429 = vrot.lane.b32.xlu1 %v6528_v6, %s6412_s24  ;;  %427 = vrot.lane.b32.xlu0 %v6531_v7, %s6412_s24 }
  0x41   : > { %409 = vrot.lane.b32.xlu1 %v6538_v8, %s6412_s24  ;;  %407 = vrot.lane.b32.xlu0 %v6541_v9, %s6412_s24 }
  0x45   : > { %417 = vrot.lane.b32.xlu1 %v6548_v10, %s6412_s24  ;;  %415 = vrot.lane.b32.xlu0 %v6551_v11, %s6412_s24 }
  0x49   : > { %425 = vrot.lane.b32.xlu1 %v6558_v12, %s6412_s24  ;;  %423 = vrot.lane.b32.xlu0 %v6561_v13, %s6412_s24 }
  0x4d   : > { %433 = vrot.lane.b32.xlu1 %v6568_v14, %s6412_s24  ;;  %431 = vrot.lane.b32.xlu0 %v6571_v15, %s6412_s24 }
  0x51   : > { %876 = vrot.lane.b32.xlu1 %v6511_v3, %s6414_s25  ;;  %874 = vrot.lane.b32.xlu0 %v6501_v1, %s6414_s25 }
  0x55   : > { %884 = vrot.lane.b32.xlu1 %v6508_v2, %s6414_s25  ;;  %882 = vrot.lane.b32.xlu0 %v6498_v0, %s6414_s25 }
  0x59   : > { %892 = vrot.lane.b32.xlu1 %v6518_v4, %s6414_s25  ;;  %890 = vrot.lane.b32.xlu0 %v6521_v5, %s6414_s25 }
  0x5d   : > { %900 = vrot.lane.b32.xlu1 %v6528_v6, %s6414_s25  ;;  %898 = vrot.lane.b32.xlu0 %v6531_v7, %s6414_s25 }
  0x61   : > { %880 = vrot.lane.b32.xlu1 %v6538_v8, %s6414_s25  ;;  %878 = vrot.lane.b32.xlu0 %v6541_v9, %s6414_s25 }
  0x65   : > { %888 = vrot.lane.b32.xlu1 %v6548_v10, %s6414_s25  ;;  %886 = vrot.lane.b32.xlu0 %v6551_v11, %s6414_s25 }
  0x69   : > { %896 = vrot.lane.b32.xlu1 %v6558_v12, %s6414_s25  ;;  %894 = vrot.lane.b32.xlu0 %v6561_v13, %s6414_s25 }
  0x6d   : > { %904 = vrot.lane.b32.xlu1 %v6568_v14, %s6414_s25  ;;  %902 = vrot.lane.b32.xlu0 %v6571_v15, %s6414_s25 }
  0x71   : > { %1115 = vrot.lane.b32.xlu1 %v6511_v3, %s6415_s26  ;;  %1113 = vrot.lane.b32.xlu0 %v6501_v1, %s6415_s26 }
  0x75   : > { %1123 = vrot.lane.b32.xlu1 %v6508_v2, %s6415_s26  ;;  %1121 = vrot.lane.b32.xlu0 %v6498_v0, %s6415_s26 }
  0x79   : > { %1131 = vrot.lane.b32.xlu1 %v6518_v4, %s6415_s26  ;;  %1129 = vrot.lane.b32.xlu0 %v6521_v5, %s6415_s26 }
  0x7d   : > { %1139 = vrot.lane.b32.xlu1 %v6528_v6, %s6415_s26  ;;  %1137 = vrot.lane.b32.xlu0 %v6531_v7, %s6415_s26 }
  0x81   : > { %1119 = vrot.lane.b32.xlu1 %v6538_v8, %s6415_s26  ;;  %1117 = vrot.lane.b32.xlu0 %v6541_v9, %s6415_s26 }
  0x83   : > { %v502_v22 = vpop.permute.xlu1 %501  ;;  %v494_v23 = vpop.permute.xlu0 %493 }
  0x84   : > { %v534_v25 = vsel %vm525_vm0, %v494_v23, %v502_v22 }
  0x85   : > { %1127 = vrot.lane.b32.xlu1 %v6548_v10, %s6415_s26  ;;  %1125 = vrot.lane.b32.xlu0 %v6551_v11, %s6415_s26  ;;  %v566_v30 = vmul.f32 %v6676_v24, %v534_v25 }
  0x87   : > { %v504_v26 = vpop.permute.xlu1 %503  ;;  %v496_v27 = vpop.permute.xlu0 %495 }
  0x88   : > { %v535_v29 = vsel %vm525_vm0, %v496_v27, %v504_v26 }
  0x89   : > { %1135 = vrot.lane.b32.xlu1 %v6558_v12, %s6415_s26  ;;  %1133 = vrot.lane.b32.xlu0 %v6561_v13, %s6415_s26  ;;  %v570_v31 = vmul.f32 %v6676_v24, %v535_v29 }
  0x8b   : > { %v512_v34 = vpop.permute.xlu1 %511  ;;  %v510_v35 = vpop.permute.xlu0 %509  ;;  %v6079_v36 = vpack.c.bf16 %v570_v31, %v566_v30 }
  0x8c   : > { %v531_v38 = vsel %vm525_vm0, %v504_v26, %v512_v34  ;;  %v530_v39 = vsel %vm525_vm0, %v502_v22, %v510_v35 }
  0x8d   : > { %1143 = vrot.lane.b32.xlu1 %v6568_v14, %s6415_s26  ;;  %1141 = vrot.lane.b32.xlu0 %v6571_v15, %s6415_s26  ;;  %v567_v44 = vmul.f32 %v6695_v37, %v530_v39  ;;  %v571_v45 = vmul.f32 %v6695_v37, %v531_v38 }
  0x8e   : > { %6080 = vmatprep.subr.bf16.mxu0 %v6079_v36 }
  0x8f   : > { %v520_v42 = vpop.permute.xlu1 %519  ;;  %v518_v43 = vpop.permute.xlu0 %517  ;;  %v6089_v58 = vpack.c.bf16 %v571_v45, %v567_v44  ;;  %v454_v44 = vld [vmem:[%s8101_s1] ss:$8 sm:$0xf] }
  0x90   : > { %v539_v46 = vsel %vm525_vm0, %v520_v42, %v496_v27  ;;  %v538_v47 = vsel %vm525_vm0, %v518_v43, %v494_v23  ;;  %v526_v48 = vsel %vm525_vm0, %v510_v35, %v518_v43  ;;  %v527_v49 = vsel %vm525_vm0, %v512_v34, %v520_v42 }
  0x91   : > { %1513 = vrot.lane.b32.xlu1 %v6508_v2, %s6416_s29  ;;  %1511 = vrot.lane.b32.xlu0 %v6498_v0, %s6416_s29  ;;  %v565_v50 = vmul.f32 %v6706_v40, %v538_v47  ;;  %v569_v51 = vmul.f32 %v6706_v40, %v539_v46  ;;  %v568_v52 = vmul.f32 %v6709_v41, %v526_v48 }
  0x92   : > { %v572_v53 = vmul.f32 %v6709_v41, %v527_v49 }
  0x93   : > { %v500_v54 = vpop.permute.xlu1 %499  ;;  %v498_v55 = vpop.permute.xlu0 %497  ;;  %v6081_v56 = vpack.c.bf16 %v569_v51, %v565_v50  ;;  %v6776_v50 = vrot.slane %v454_v44, %v6665_v20  ;;  %v5911_v51 = vld [vmem:[%s8102_s2 + $0x8] sm:$0xff] }
  0x94   : > { %v6087_v57 = vpack.c.bf16 %v572_v53, %v568_v52 }
  0x95   : > { %1521 = vrot.lane.b32.xlu1 %v6518_v4, %s6416_s29  ;;  %1519 = vrot.lane.b32.xlu0 %v6521_v5, %s6416_s29 }
  0x96   : > { %6082 = vmatpush1.bf16.msra.mxu0 %v6081_v56  ;;  %6088 = vmatprep.subr.bf16.mxu1 %v6087_v57 }
  0x97   : > { %6090 = vmatpush1.bf16.msra.mxu1 %v6089_v58  ;;  %v508_v59 = vpop.permute.xlu1 %507  ;;  %v506_v60 = vpop.permute.xlu0 %505  ;;  %v6797_v58 = vrot.slane %v454_v44, %v6680_v28 }
  0x98   : > { %v537_v61 = vsel %vm525_vm0, %v500_v54, %v508_v59  ;;  %v536_v62 = vsel %vm525_vm0, %v498_v55, %v506_v60 }
  0x99   : > { %v578_v63 = vmul.f32 %v6676_v24, %v537_v61  ;;  %v574_v17 = vmul.f32 %v6676_v24, %v536_v62  ;;  %1505 = vrot.lane.b32.xlu1 %v6511_v3, %s6416_s29  ;;  %1503 = vrot.lane.b32.xlu0 %v6501_v1, %s6416_s29 }
  0x9b   : > { %v516_v18 = vpop.permute.xlu1 %515  ;;  %v514_v21 = vpop.permute.xlu0 %513  ;;  %v6083_v22 = vpack.c.bf16 %v578_v63, %v574_v17  ;;  %v6807_v17 = vrot.slane %v454_v44, %v6690_v32 }
  0x9c   : > { %v533_v23 = vsel %vm525_vm0, %v508_v59, %v516_v18  ;;  %v532_v25 = vsel %vm525_vm0, %v506_v60, %v514_v21 }
  0x9d   : > { %1529 = vrot.lane.b32.xlu1 %v6528_v6, %s6416_s29  ;;  %1527 = vrot.lane.b32.xlu0 %v6531_v7, %s6416_s29  ;;  %v579_v26 = vmul.f32 %v6695_v37, %v533_v23  ;;  %v575_v27 = vmul.f32 %v6695_v37, %v532_v25 }
  0x9e   : > { %6084 = vmatprep.subr.bf16.mxu0 %v6083_v22 }
  0x9f   : > { %v524_v29 = vpop.permute.xlu1 %523  ;;  %v522_v30 = vpop.permute.xlu0 %521  ;;  %v6093_v49 = vpack.c.bf16 %v579_v26, %v575_v27 }
  0xa0   : > { %v529_v31 = vsel %vm525_vm0, %v516_v18, %v524_v29  ;;  %v541_v34 = vsel %vm525_vm0, %v524_v29, %v500_v54  ;;  %v528_v35 = vsel %vm525_vm0, %v514_v21, %v522_v30  ;;  %v540_v36 = vsel %vm525_vm0, %v522_v30, %v498_v55 }
  0xa1   : > { %v577_v38 = vmul.f32 %v6706_v40, %v541_v34  ;;  %v580_v39 = vmul.f32 %v6709_v41, %v529_v31  ;;  %v573_v42 = vmul.f32 %v6706_v40, %v540_v36  ;;  %v576_v43 = vmul.f32 %v6709_v41, %v528_v35  ;;  %1517 = vrot.lane.b32.xlu1 %v6548_v10, %s6416_s29 }
  0xa2   : > { %1515 = vrot.lane.b32.xlu0 %v6551_v11, %s6416_s29  ;;  %v6810_v18 = vrot.slane %v454_v44, %v6692_v33 }
  0xa3   : > { %v406_v45 = vpop.permute.xlu1 %405  ;;  %v404_v46 = vpop.permute.xlu0 %403  ;;  %v6085_v47 = vpack.c.bf16 %v577_v38, %v573_v42  ;;  %v6091_v48 = vpack.c.bf16 %v580_v39, %v576_v43 }
  0xa5   : > { %1525 = vrot.lane.b32.xlu1 %v6558_v12, %s6416_s29  ;;  %6086 = vmatpush1.bf16.msra.mxu0 %v6085_v47 }
  0xa6   : > { %1523 = vrot.lane.b32.xlu0 %v6561_v13, %s6416_s29  ;;  %6092 = vmatprep.subr.bf16.mxu1 %v6091_v48 }
  0xa7   : > { %6094 = vmatpush1.bf16.msra.mxu1 %v6093_v49  ;;  %v414_v52 = vpop.permute.xlu1 %413  ;;  %v412_v53 = vpop.permute.xlu0 %411 }
  0xa8   : > { %v447_v54 = vsel %vm437_vm1, %v406_v45, %v414_v52  ;;  %v446_v55 = vsel %vm437_vm1, %v404_v46, %v412_v53  ;;  %5912 = vmatmul.mubr.msk.f32.vlgmr.msra.gmra.mrb[0].mxu0 %vm583_vm2, %v5911_v51 }
  0xa9   : > { %v481_v56 = vmul.f32 %v6776_v50, %v447_v54  ;;  %v477_v57 = vmul.f32 %v6776_v50, %v446_v55  ;;  %1509 = vrot.lane.b32.xlu1 %v6538_v8, %s6416_s29  ;;  %796 = vmatprep.mubr.f32.mxu0 %v6413_v16 }
  0xaa   : > { %1507 = vrot.lane.b32.xlu0 %v6541_v9, %s6416_s29  ;;  %5913 = vmatmul.mubr.msk.f32.vlgmr.msra.gmra.mrb[0].mxu1 %vm583_vm2, %v5911_v51 }
  0xab   : > { %v422_v59 = vpop.permute.xlu1 %421  ;;  %v420_v60 = vpop.permute.xlu0 %419  ;;  %v6095_v61 = vpack.c.bf16 %v481_v56, %v477_v57  ;;  %867 = vmatprep.mubr.f32.mxu1 %v6413_v16 }
  0xac   : > { %v443_v62 = vsel %vm437_vm1, %v414_v52, %v422_v59  ;;  %v442_v63 = vsel %vm437_vm1, %v412_v53, %v420_v60 }
  0xad   : > { %1533 = vrot.lane.b32.xlu1 %v6568_v14, %s6416_s29  ;;  %6096 = vmatprep.subr.bf16.mxu0 %v6095_v61  ;;  %v482_v21 = vmul.f32 %v6797_v58, %v443_v62  ;;  %v478_v22 = vmul.f32 %v6797_v58, %v442_v63 }
  0xae   : > { %1531 = vrot.lane.b32.xlu0 %v6571_v15, %s6416_s29 }
  0xaf   : > { %v430_v23 = vpop.permute.xlu1 %429  ;;  %v428_v25 = vpop.permute.xlu0 %427  ;;  %v6105_v44 = vpack.c.bf16 %v482_v21, %v478_v22 }
  0xb0   : > { %v439_v26 = vsel %vm437_vm1, %v422_v59, %v430_v23  ;;  %v451_v27 = vsel %vm437_vm1, %v430_v23, %v406_v45  ;;  %v438_v29 = vsel %vm437_vm1, %v420_v60, %v428_v25  ;;  %v450_v30 = vsel %vm437_vm1, %v428_v25, %v404_v46 }
  0xb1   : > { %v480_v31 = vmul.f32 %v6807_v17, %v451_v27  ;;  %v483_v34 = vmul.f32 %v6810_v18, %v439_v26  ;;  %v476_v35 = vmul.f32 %v6807_v17, %v450_v30  ;;  %v479_v36 = vmul.f32 %v6810_v18, %v438_v29  ;;  %1752 = vrot.lane.b32.xlu1 %v6508_v2, %s6417_s15  ;;  %v5916_v29 = vld [vmem:[%s8101_s1 + $0x2] ss:$8 sm:$0xf] }
  0xb2   : > { %1750 = vrot.lane.b32.xlu0 %v6498_v0, %s6417_s15 }
  0xb3   : > { %v6097_v38 = vpack.c.bf16 %v480_v31, %v476_v35  ;;  %v410_v39 = vpop.permute.xlu1 %409  ;;  %v408_v42 = vpop.permute.xlu0 %407  ;;  %v6103_v43 = vpack.c.bf16 %v483_v34, %v479_v36 }
  0xb5   : > { %1760 = vrot.lane.b32.xlu1 %v6518_v4, %s6417_s15  ;;  %6098 = vmatpush1.bf16.msra.mxu0 %v6097_v38  ;;  %v6879_v38 = vrot.slane %v5916_v29, %v6665_v20 }
  0xb6   : > { %1758 = vrot.lane.b32.xlu0 %v6521_v5, %s6417_s15  ;;  %6104 = vmatprep.subr.bf16.mxu1 %v6103_v43 }
  0xb7   : > { %6106 = vmatpush1.bf16.msra.mxu1 %v6105_v44  ;;  %v418_v45 = vpop.permute.xlu1 %417  ;;  %v416_v46 = vpop.permute.xlu0 %415 }
  0xb8   : > { %v449_v47 = vsel %vm437_vm1, %v410_v39, %v418_v45  ;;  %v448_v48 = vsel %vm437_vm1, %v408_v42, %v416_v46 }
  0xb9   : > { %v489_v49 = vmul.f32 %v6776_v50, %v449_v47  ;;  %v485_v51 = vmul.f32 %v6776_v50, %v448_v48  ;;  %1744 = vrot.lane.b32.xlu1 %v6511_v3, %s6417_s15  ;;  %v6900_v48 = vrot.slane %v5916_v29, %v6680_v28 }
  0xba   : > { %1742 = vrot.lane.b32.xlu0 %v6501_v1, %s6417_s15 }
  0xbb   : > { %v426_v52 = vpop.permute.xlu1 %425  ;;  %v424_v53 = vpop.permute.xlu0 %423  ;;  %v6099_v54 = vpack.c.bf16 %v489_v49, %v485_v51 }
  0xbc   : > { %v445_v55 = vsel %vm437_vm1, %v418_v45, %v426_v52  ;;  %v444_v56 = vsel %vm437_vm1, %v416_v46, %v424_v53 }
  0xbd   : > { %1768 = vrot.lane.b32.xlu1 %v6528_v6, %s6417_s15  ;;  %6100 = vmatprep.subr.bf16.mxu0 %v6099_v54  ;;  %v490_v57 = vmul.f32 %v6797_v58, %v445_v55  ;;  %v486_v59 = vmul.f32 %v6797_v58, %v444_v56  ;;  %v6910_v55 = vrot.slane %v5916_v29, %v6690_v32 }
  0xbe   : > { %1766 = vrot.lane.b32.xlu0 %v6531_v7, %s6417_s15  ;;  %v6913_v56 = vrot.slane %v5916_v29, %v6692_v33 }
  0xbf   : > { %v434_v60 = vpop.permute.xlu1 %433  ;;  %v432_v61 = vpop.permute.xlu0 %431  ;;  %v6109_v36 = vpack.c.bf16 %v490_v57, %v486_v59 }
  0xc0   : > { %v441_v62 = vsel %vm437_vm1, %v426_v52, %v434_v60  ;;  %v453_v63 = vsel %vm437_vm1, %v434_v60, %v410_v39  ;;  %v440_v21 = vsel %vm437_vm1, %v424_v53, %v432_v61  ;;  %v452_v22 = vsel %vm437_vm1, %v432_v61, %v408_v42  ;;  %v492_v39 = vld [vmem:[%s8102_s2] sm:$0xff] }
  0xc1   : > { %v488_v23 = vmul.f32 %v6807_v17, %v453_v63  ;;  %v491_v25 = vmul.f32 %v6810_v18, %v441_v62  ;;  %v484_v26 = vmul.f32 %v6807_v17, %v452_v22  ;;  %v487_v27 = vmul.f32 %v6810_v18, %v440_v21  ;;  %1756 = vrot.lane.b32.xlu1 %v6548_v10, %s6417_s15 }
  0xc2   : > { %1754 = vrot.lane.b32.xlu0 %v6551_v11, %s6417_s15 }
  0xc3   : > { %v6101_v30 = vpack.c.bf16 %v488_v23, %v484_v26  ;;  %v877_v31 = vpop.permute.xlu1 %876  ;;  %v875_v34 = vpop.permute.xlu0 %874  ;;  %v6107_v35 = vpack.c.bf16 %v491_v25, %v487_v27 }
  0xc5   : > { %1764 = vrot.lane.b32.xlu1 %v6558_v12, %s6417_s15  ;;  %6102 = vmatpush1.bf16.msra.mxu0 %v6101_v30 }
  0xc6   : > { %1762 = vrot.lane.b32.xlu0 %v6561_v13, %s6417_s15  ;;  %6108 = vmatprep.subr.bf16.mxu1 %v6107_v35 }
  0xc7   : > { %6110 = vmatpush1.bf16.msra.mxu1 %v6109_v36  ;;  %v885_v42 = vpop.permute.xlu1 %884  ;;  %v883_v43 = vpop.permute.xlu0 %882 }
  0xc8   : > { %v916_v44 = vsel %vm906_vm3, %v877_v31, %v885_v42  ;;  %v915_v45 = vsel %vm906_vm3, %v875_v34, %v883_v43  ;;  %5914 = vmatmul.mubr.msk.f32.vlgmr.msra.gmra.mrb[0].mxu0 %vm583_vm2, %v492_v39 }
  0xc9   : > { %v951_v46 = vmul.f32 %v6879_v38, %v916_v44  ;;  %v947_v47 = vmul.f32 %v6879_v38, %v915_v45  ;;  %1748 = vrot.lane.b32.xlu1 %v6538_v8, %s6417_s15  ;;  %1031 = vmatprep.mubr.f32.mxu0 %v6413_v16 }
  0xca   : > { %1746 = vrot.lane.b32.xlu0 %v6541_v9, %s6417_s15  ;;  %5915 = vmatmul.mubr.msk.f32.vlgmr.msra.gmra.mrb[0].mxu1 %vm583_vm2, %v492_v39 }
  0xcb   : > { %v893_v49 = vpop.permute.xlu1 %892  ;;  %v891_v51 = vpop.permute.xlu0 %890  ;;  %v6111_v52 = vpack.c.bf16 %v951_v46, %v947_v47  ;;  %1102 = vmatprep.mubr.f32.mxu1 %v6413_v16 }
  0xcc   : > { %v912_v53 = vsel %vm906_vm3, %v885_v42, %v893_v49  ;;  %v911_v54 = vsel %vm906_vm3, %v883_v43, %v891_v51 }
  0xcd   : > { %1772 = vrot.lane.b32.xlu1 %v6568_v14, %s6417_s15  ;;  %6112 = vmatprep.subr.bf16.mxu0 %v6111_v52  ;;  %v952_v57 = vmul.f32 %v6900_v48, %v912_v53  ;;  %v948_v59 = vmul.f32 %v6900_v48, %v911_v54 }
  0xce   : > { %1770 = vrot.lane.b32.xlu0 %v6571_v15, %s6417_s15 }
  0xcf   : > { %v901_v60 = vpop.permute.xlu1 %900  ;;  %v899_v61 = vpop.permute.xlu0 %898 }
  0xd0   : > { %v908_v62 = vsel %vm906_vm3, %v893_v49, %v901_v60  ;;  %v920_v63 = vsel %vm906_vm3, %v901_v60, %v877_v31  ;;  %v907_v21 = vsel %vm906_vm3, %v891_v51, %v899_v61  ;;  %v919_v22 = vsel %vm906_vm3, %v899_v61, %v875_v34 }
  0xd1   : > { %v950_v23 = vmul.f32 %v6910_v55, %v920_v63  ;;  %v953_v25 = vmul.f32 %v6913_v56, %v908_v62  ;;  %v946_v26 = vmul.f32 %v6910_v55, %v919_v22  ;;  %v949_v27 = vmul.f32 %v6913_v56, %v907_v21  ;;  %1991 = vrot.lane.b32.xlu1 %v6508_v2, %s6418_s22 }
  0xd2   : > { %1989 = vrot.lane.b32.xlu0 %v6498_v0, %s6418_s22  ;;  %v6121_v34 = vpack.c.bf16 %v952_v57, %v948_v59 }
  0xd3   : > { %v6113_v29 = vpack.c.bf16 %v950_v23, %v946_v26  ;;  %v881_v30 = vpop.permute.xlu1 %880  ;;  %v879_v31 = vpop.permute.xlu0 %878  ;;  %v6119_v35 = vpack.c.bf16 %v953_v25, %v949_v27  ;;  %v5920_v26 = vld [vmem:[%s8101_s1 + $0x3] ss:$8 sm:$0xf] }
  0xd5   : > { %1999 = vrot.lane.b32.xlu1 %v6518_v4, %s6418_s22  ;;  %6114 = vmatpush1.bf16.msra.mxu0 %v6113_v29 }
  0xd6   : > { %1997 = vrot.lane.b32.xlu0 %v6521_v5, %s6418_s22  ;;  %6120 = vmatprep.subr.bf16.mxu1 %v6119_v35 }
  0xd7   : > { %6122 = vmatpush1.bf16.msra.mxu1 %v6121_v34  ;;  %v889_v36 = vpop.permute.xlu1 %888  ;;  %v887_v39 = vpop.permute.xlu0 %886  ;;  %v6982_v34 = vrot.slane %v5920_v26, %v6665_v20 }
  0xd8   : > { %v918_v42 = vsel %vm906_vm3, %v881_v30, %v889_v36  ;;  %v917_v43 = vsel %vm906_vm3, %v879_v31, %v887_v39 }
  0xd9   : > { %v959_v44 = vmul.f32 %v6879_v38, %v918_v42  ;;  %v955_v45 = vmul.f32 %v6879_v38, %v917_v43  ;;  %1983 = vrot.lane.b32.xlu1 %v6511_v3, %s6418_s22 }
  0xda   : > { %1981 = vrot.lane.b32.xlu0 %v6501_v1, %s6418_s22 }
  0xdb   : > { %v897_v46 = vpop.permute.xlu1 %896  ;;  %v895_v47 = vpop.permute.xlu0 %894  ;;  %v6115_v49 = vpack.c.bf16 %v959_v44, %v955_v45 }
  0xdc   : > { %v914_v51 = vsel %vm906_vm3, %v889_v36, %v897_v46  ;;  %v913_v52 = vsel %vm906_vm3, %v887_v39, %v895_v47  ;;  %v5917_v36 = vld [vmem:[%s8102_s2 + $0x10] sm:$0xff] }
  0xdd   : > { %2007 = vrot.lane.b32.xlu1 %v6528_v6, %s6418_s22  ;;  %6116 = vmatprep.subr.bf16.mxu0 %v6115_v49  ;;  %v960_v53 = vmul.f32 %v6900_v48, %v914_v51  ;;  %v956_v54 = vmul.f32 %v6900_v48, %v913_v52 }
  0xde   : > { %2005 = vrot.lane.b32.xlu0 %v6531_v7, %s6418_s22 }
  0xdf   : > { %v905_v57 = vpop.permute.xlu1 %904  ;;  %v903_v59 = vpop.permute.xlu0 %902  ;;  %v6125_v35 = vpack.c.bf16 %v960_v53, %v956_v54 }
  0xe0   : > { %v910_v60 = vsel %vm906_vm3, %v897_v46, %v905_v57  ;;  %v922_v61 = vsel %vm906_vm3, %v905_v57, %v881_v30  ;;  %v909_v62 = vsel %vm906_vm3, %v895_v47, %v903_v59  ;;  %v921_v63 = vsel %vm906_vm3, %v903_v59, %v879_v31 }
  0xe1   : > { %v958_v21 = vmul.f32 %v6910_v55, %v922_v61  ;;  %v961_v22 = vmul.f32 %v6913_v56, %v910_v60  ;;  %v954_v23 = vmul.f32 %v6910_v55, %v921_v63  ;;  %v957_v25 = vmul.f32 %v6913_v56, %v909_v62  ;;  %1995 = vrot.lane.b32.xlu1 %v6548_v10, %s6418_s22 }
  0xe2   : > { %1993 = vrot.lane.b32.xlu0 %v6551_v11, %s6418_s22  ;;  %v7003_v47 = vrot.slane %v5920_v26, %v6680_v28  ;;  %v7013_v57 = vrot.slane %v5920_v26, %v6690_v32  ;;  %v7016_v59 = vrot.slane %v5920_v26, %v6692_v33 }
  0xe3   : > { %v6117_v27 = vpack.c.bf16 %v958_v21, %v954_v23  ;;  %v1116_v29 = vpop.permute.xlu1 %1115  ;;  %v1114_v30 = vpop.permute.xlu0 %1113  ;;  %v6123_v31 = vpack.c.bf16 %v961_v22, %v957_v25 }
  0xe5   : > { %2003 = vrot.lane.b32.xlu1 %v6558_v12, %s6418_s22  ;;  %6118 = vmatpush1.bf16.msra.mxu0 %v6117_v27 }
  0xe6   : > { %2001 = vrot.lane.b32.xlu0 %v6561_v13, %s6418_s22  ;;  %6124 = vmatprep.subr.bf16.mxu1 %v6123_v31 }
  0xe7   : > { %6126 = vmatpush1.bf16.msra.mxu1 %v6125_v35  ;;  %v1124_v39 = vpop.permute.xlu1 %1123  ;;  %v1122_v42 = vpop.permute.xlu0 %1121 }
  0xe8   : > { %v1155_v43 = vsel %vm1145_vm4, %v1116_v29, %v1124_v39  ;;  %v1154_v44 = vsel %vm1145_vm4, %v1114_v30, %v1122_v42  ;;  %5918 = vmatmul.mubr.msk.f32.vlgmr.msra.gmra.mrb[0].mxu0 %vm583_vm2, %v5917_v36 }
  0xe9   : > { %v1190_v45 = vmul.f32 %v6982_v34, %v1155_v43  ;;  %v1186_v46 = vmul.f32 %v6982_v34, %v1154_v44  ;;  %1987 = vrot.lane.b32.xlu1 %v6538_v8, %s6418_s22  ;;  %1270 = vmatprep.mubr.f32.mxu0 %v6413_v16 }
  0xea   : > { %1985 = vrot.lane.b32.xlu0 %v6541_v9, %s6418_s22  ;;  %5919 = vmatmul.mubr.msk.f32.vlgmr.msra.gmra.mrb[0].mxu1 %vm583_vm2, %v5917_v36 }
  0xeb   : > { %v1132_v49 = vpop.permute.xlu1 %1131  ;;  %v1130_v51 = vpop.permute.xlu0 %1129  ;;  %v6127_v52 = vpack.c.bf16 %v1190_v45, %v1186_v46  ;;  %1341 = vmatprep.mubr.f32.mxu1 %v6413_v16 }
  0xec   : > { %v1151_v53 = vsel %vm1145_vm4, %v1124_v39, %v1132_v49  ;;  %v1150_v54 = vsel %vm1145_vm4, %v1122_v42, %v1130_v51 }
  0xed   : > { %2011 = vrot.lane.b32.xlu1 %v6568_v14, %s6418_s22  ;;  %6128 = vmatprep.subr.bf16.mxu0 %v6127_v52  ;;  %v1191_v60 = vmul.f32 %v7003_v47, %v1151_v53  ;;  %v1187_v61 = vmul.f32 %v7003_v47, %v1150_v54 }
  0xee   : > { %2009 = vrot.lane.b32.xlu0 %v6571_v15, %s6418_s22 }
  0xef   : > { %v1140_v62 = vpop.permute.xlu1 %1139  ;;  %v1138_v63 = vpop.permute.xlu0 %1137 }
  0xf0   : > { %v1147_v21 = vsel %vm1145_vm4, %v1132_v49, %v1140_v62  ;;  %v1159_v22 = vsel %vm1145_vm4, %v1140_v62, %v1116_v29  ;;  %v1146_v23 = vsel %vm1145_vm4, %v1130_v51, %v1138_v63  ;;  %v1158_v25 = vsel %vm1145_vm4, %v1138_v63, %v1114_v30 }
  0xf1   : > { %v1189_v26 = vmul.f32 %v7013_v57, %v1159_v22  ;;  %v1192_v27 = vmul.f32 %v7016_v59, %v1147_v21  ;;  %v1185_v31 = vmul.f32 %v7013_v57, %v1158_v25  ;;  %v1188_v35 = vmul.f32 %v7016_v59, %v1146_v23  ;;  %2230 = vrot.lane.b32.xlu1 %v6508_v2, %s6419_s13 }
  0xf2   : > { %2228 = vrot.lane.b32.xlu0 %v6498_v0, %s6419_s13  ;;  %v6137_v30 = vpack.c.bf16 %v1191_v60, %v1187_v61 }
  0xf3   : > { %v6129_v29 = vpack.c.bf16 %v1189_v26, %v1185_v31  ;;  %v1120_v36 = vpop.permute.xlu1 %1119  ;;  %v1118_v39 = vpop.permute.xlu0 %1117  ;;  %v6135_v42 = vpack.c.bf16 %v1192_v27, %v1188_v35 }
  0xf5   : > { %2238 = vrot.lane.b32.xlu1 %v6518_v4, %s6419_s13  ;;  %6130 = vmatpush1.bf16.msra.mxu0 %v6129_v29 }
  0xf6   : > { %2236 = vrot.lane.b32.xlu0 %v6521_v5, %s6419_s13  ;;  %6136 = vmatprep.subr.bf16.mxu1 %v6135_v42 }
  0xf7   : > { %6138 = vmatpush1.bf16.msra.mxu1 %v6137_v30  ;;  %v1128_v43 = vpop.permute.xlu1 %1127  ;;  %v1126_v44 = vpop.permute.xlu0 %1125 }
  0xf8   : > { %v1157_v45 = vsel %vm1145_vm4, %v1120_v36, %v1128_v43  ;;  %v1156_v46 = vsel %vm1145_vm4, %v1118_v39, %v1126_v44 }
  0xf9   : > { %v1198_v49 = vmul.f32 %v6982_v34, %v1157_v45  ;;  %v1194_v51 = vmul.f32 %v6982_v34, %v1156_v46  ;;  %2222 = vrot.lane.b32.xlu1 %v6511_v3, %s6419_s13  ;;  %v6143_v45 = vpack.c.bf16 %v6508_v2, %v6498_v0  ;;  %v6151_v46 = vpack.c.bf16 %v6528_v6, %v6531_v7 }
  0xfa   : > { %2220 = vrot.lane.b32.xlu0 %v6501_v1, %s6419_s13  ;;  %v6145_v0 = vpack.c.bf16 %v6511_v3, %v6501_v1  ;;  %v6147_v2 = vpack.c.bf16 %v6548_v10, %v6551_v11  ;;  %v6153_v3 = vpack.c.bf16 %v6518_v4, %v6521_v5  ;;  %v6155_v5 = vpack.c.bf16 %v6568_v14, %v6571_v15 }
  0xfb   : > { %v1136_v52 = vpop.permute.xlu1 %1135  ;;  %v1134_v53 = vpop.permute.xlu0 %1133  ;;  %v6131_v54 = vpack.c.bf16 %v1198_v49, %v1194_v51 }
  0xfc   : > { %v1153_v60 = vsel %vm1145_vm4, %v1128_v43, %v1136_v52  ;;  %v1152_v61 = vsel %vm1145_vm4, %v1126_v44, %v1134_v53 }
  0xfd   : > { %2246 = vrot.lane.b32.xlu1 %v6528_v6, %s6419_s13  ;;  %6132 = vmatprep.subr.bf16.mxu0 %v6131_v54  ;;  %v1199_v62 = vmul.f32 %v7003_v47, %v1153_v60  ;;  %v1195_v63 = vmul.f32 %v7003_v47, %v1152_v61  ;;  %v6149_v60 = vpack.c.bf16 %v6538_v8, %v6541_v9 }
  0xfe   : > { %2244 = vrot.lane.b32.xlu0 %v6531_v7, %s6419_s13 }
  0xff   : > { %v1144_v21 = vpop.permute.xlu1 %1143  ;;  %v1142_v22 = vpop.permute.xlu0 %1141  ;;  %v6141_v49 = vpack.c.bf16 %v1199_v62, %v1195_v63 }
 0x100   : > { %v1149_v23 = vsel %vm1145_vm4, %v1136_v52, %v1144_v21  ;;  %v1161_v25 = vsel %vm1145_vm4, %v1144_v21, %v1120_v36  ;;  %v1148_v26 = vsel %vm1145_vm4, %v1134_v53, %v1142_v22  ;;  %v1160_v27 = vsel %vm1145_vm4, %v1142_v22, %v1118_v39  ;;  %v5927_v36 = vld [vmem:[%s8101_s1 + $0x5] ss:$8 sm:$0xf] }
 0x101   : > { %v1197_v31 = vmul.f32 %v7013_v57, %v1161_v25  ;;  %v1200_v35 = vmul.f32 %v7016_v59, %v1149_v23  ;;  %v1193_v29 = vmul.f32 %v7013_v57, %v1160_v27  ;;  %v1196_v42 = vmul.f32 %v7016_v59, %v1148_v26  ;;  %2234 = vrot.lane.b32.xlu1 %v6548_v10, %s6419_s13  ;;  %v5921_v52 = vld [vmem:[%s8102_s2 + $0x18] sm:$0xff]  ;;  %v5924_v25 = vld [vmem:[%s8102_s2 + $0x20] sm:$0xff] }
 0x102   : > { %2232 = vrot.lane.b32.xlu0 %v6551_v11, %s6419_s13  ;;  %v7089_v51 = vrot.slane %v5927_v36, %v6665_v20  ;;  %v7101_v53 = vrot.slane %v5927_v36, %v6690_v32  ;;  %v7135_v23 = vrot.slane %v5927_v36, %v6692_v33  ;;  %v6157_v26 = vpack.c.bf16 %v6558_v12, %v6561_v13 }
 0x103   : > { %v6133_v30 = vpack.c.bf16 %v1197_v31, %v1193_v29  ;;  %v1514_v39 = vpop.permute.xlu1 %1513  ;;  %v1512_v43 = vpop.permute.xlu0 %1511  ;;  %v6139_v44 = vpack.c.bf16 %v1200_v35, %v1196_v42 }
 0x105   : > { %2242 = vrot.lane.b32.xlu1 %v6558_v12, %s6419_s13  ;;  %6134 = vmatpush1.bf16.msra.mxu0 %v6133_v30  ;;  %v2459_v12 = vld [vmem:[%s8103_s3] sm:$0xff] }
 0x106   : > { %2240 = vrot.lane.b32.xlu0 %v6561_v13, %s6419_s13  ;;  %6140 = vmatprep.subr.bf16.mxu1 %v6139_v44 }
 0x107   : > { %6142 = vmatpush1.bf16.msra.mxu1 %v6141_v49  ;;  %v1522_v6 = vpop.permute.xlu1 %1521  ;;  %v1520_v7 = vpop.permute.xlu0 %1519  ;;  %6144 = vmatprep.subr.bf16.mxu0 %v6143_v45 }
 0x108   : > { %v1541_v54 = vsel %vm1535_vm5, %v1514_v39, %v1522_v6  ;;  %v1540_v1 = vsel %vm1535_vm5, %v1512_v43, %v1520_v7  ;;  %5922 = vmatmul.mubr.msk.f32.vlgmr.msra.gmra.mrb[0].mxu0 %vm583_vm2, %v5921_v52  ;;  %6152 = vmatprep.subr.bf16.mxu1 %v6151_v46 }
 0x109   : > { %v1580_v10 = vmul.f32 %v7089_v51, %v1541_v54  ;;  %v1576_v11 = vmul.f32 %v7089_v51, %v1540_v1  ;;  %2226 = vrot.lane.b32.xlu1 %v6538_v8, %s6419_s13  ;;  %6146 = vmatpush1.bf16.msra.mxu0 %v6145_v0 }
 0x10a   : > { %2224 = vrot.lane.b32.xlu0 %v6541_v9, %s6419_s13  ;;  %6148 = vmatprep.subr.bf16.mxu0 %v6147_v2  ;;  %v7127_v9 = vrot.slane %v5927_v36, %v6680_v28 }
 0x10b   : > { %v1506_v61 = vpop.permute.xlu1 %1505  ;;  %v1504_v62 = vpop.permute.xlu0 %1503  ;;  %5923 = vmatmul.mubr.msk.f32.vlgmr.msra.gmra.mrb[0].mxu1 %vm583_vm2, %v5921_v52  ;;  %v6159_v4 = vpack.c.bf16 %v1580_v10, %v1576_v11  ;;  %1421 = vmatprep.mubr.f32.mxu0 %v6413_v16 }
 0x10c   : > { %v1545_v63 = vsel %vm1535_vm5, %v1506_v61, %v1514_v39  ;;  %v1544_v8 = vsel %vm1535_vm5, %v1504_v62, %v1512_v43  ;;  %6154 = vmatpush1.bf16.msra.mxu1 %v6153_v3  ;;  %1492 = vmatprep.mubr.f32.mxu1 %v6413_v16 }
 0x10d   : > { %v1579_v21 = vmul.f32 %v7101_v53, %v1545_v63  ;;  %v1575_v22 = vmul.f32 %v7101_v53, %v1544_v8  ;;  %2250 = vrot.lane.b32.xlu1 %v6568_v14, %s6419_s13  ;;  %6150 = vmatpush1.bf16.msra.mxu0 %v6149_v60  ;;  %v6420_v14 = vmov 0  }
 0x10e   : > { %2248 = vrot.lane.b32.xlu0 %v6571_v15, %s6419_s13  ;;  %6160 = vmatprep.subr.bf16.mxu0 %v6159_v4 }
 0x10f   : > { %v6161_v27 = vpack.c.bf16 %v1579_v21, %v1575_v22  ;;  %v1530_v31 = vpop.permute.xlu1 %1529  ;;  %v1528_v35 = vpop.permute.xlu0 %1527  ;;  %6156 = vmatprep.subr.bf16.mxu1 %v6155_v5  ;;  %6401 = vset.pattern.permute.xlu0 %v6420_v14 }
 0x110   : > { %v1537_v29 = vsel %vm1535_vm5, %v1522_v6, %v1530_v31  ;;  %v1549_v42 = vsel %vm1535_vm5, %v1530_v31, %v1506_v61  ;;  %v1536_v36 = vsel %vm1535_vm5, %v1520_v7, %v1528_v35  ;;  %v1548_v15 = vsel %vm1535_vm5, %v1528_v35, %v1504_v62  ;;  %5925 = vmatmul.mubr.msk.f32.vlgmr.msra.gmra.mrb[0].mxu0 %vm583_vm2, %v5924_v25 }
 0x111   : > { %v1581_v13 = vmul.f32 %v7127_v9, %v1537_v29  ;;  %v1582_v30 = vmul.f32 %v7135_v23, %v1549_v42  ;;  %v1577_v39 = vmul.f32 %v7127_v9, %v1536_v36  ;;  %v1578_v43 = vmul.f32 %v7135_v23, %v1548_v15  ;;  %6162 = vmatpush1.bf16.msra.mxu0 %v6161_v27  ;;  %v5928_v29 = vld [vmem:[%s8102_s2 + $0x28] sm:$0xff] }
 0x112   : > { %6158 = vmatpush1.bf16.msra.mxu1 %v6157_v26  ;;  %1660 = vmatprep.mubr.f32.mxu0 %v6413_v16 }
 0x113   : > { %v6169_v44 = vpack.c.bf16 %v1581_v13, %v1577_v39  ;;  %v1518_v45 = vpop.permute.xlu1 %1517  ;;  %v6167_v46 = vpack.c.bf16 %v1582_v30, %v1578_v43  ;;  %2462 = vperm.xlu0 %6401, %v2459_v12   ;;  %6402 = vset.pattern.permute.xlu1 %v6420_v14  ;;  %v5931_v14 = vld [vmem:[%s8101_s1 + $0x6] ss:$8 sm:$0xf] }
 0x114   : > { %v1516_v49 = vpop.permute.xlu0 %1515  ;;  %v7195_v13 = vrot.slane %v5931_v14, %v6665_v20 }
 0x115   : > { %6168 = vmatprep.subr.bf16.mxu1 %v6167_v46  ;;  %5926 = vmatmul.mubr.msk.f32.vlgmr.msra.gmra.mrb[0].mxu1 %vm583_vm2, %v5924_v25  ;;  %v7205_v46 = vrot.slane %v5931_v14, %v6690_v32 }
 0x116   : > { %6170 = vmatpush1.bf16.msra.mxu1 %v6169_v44  ;;  %1731 = vmatprep.mubr.f32.mxu1 %v6413_v16 }
 0x117   : > { %v1526_v52 = vpop.permute.xlu1 %1525 }
 0x118   : > { %v1543_v0 = vsel %vm1535_vm5, %v1518_v45, %v1526_v52  ;;  %v1524_v2 = vpop.permute.xlu0 %1523 }
 0x119   : > { %v1588_v6 = vmul.f32 %v7089_v51, %v1543_v0  ;;  %v1542_v7 = vsel %vm1535_vm5, %v1516_v49, %v1524_v2 }
 0x11a   : > { %v1584_v54 = vmul.f32 %v7089_v51, %v1542_v7 }
 0x11b   : > { %v1510_v1 = vpop.permute.xlu1 %1509 }
 0x11c   : > { %v1547_v3 = vsel %vm1535_vm5, %v1510_v1, %v1518_v45  ;;  %v1508_v10 = vpop.permute.xlu0 %1507  ;;  %v6163_v11 = vpack.c.bf16 %v1588_v6, %v1584_v54 }
 0x11d   : > { %v1587_v60 = vmul.f32 %v7101_v53, %v1547_v3  ;;  %v1546_v61 = vsel %vm1535_vm5, %v1508_v10, %v1516_v49  ;;  %v7219_v3 = vrot.slane %v5931_v14, %v6692_v33 }
 0x11e   : > { %v1583_v62 = vmul.f32 %v7101_v53, %v1546_v61  ;;  %6164 = vmatprep.subr.bf16.mxu0 %v6163_v11 }
 0x11f   : > { %v1534_v4 = vpop.permute.xlu1 %1533 }
 0x120   : > { %v6165_v5 = vpack.c.bf16 %v1587_v60, %v1583_v62  ;;  %v1539_v63 = vsel %vm1535_vm5, %v1526_v52, %v1534_v4  ;;  %v1551_v8 = vsel %vm1535_vm5, %v1534_v4, %v1510_v1  ;;  %v1532_v21 = vpop.permute.xlu0 %1531  ;;  %v7216_v1 = vrot.slane %v5931_v14, %v6680_v28 }
 0x121   : > { %v1589_v22 = vmul.f32 %v7127_v9, %v1539_v63  ;;  %v1590_v25 = vmul.f32 %v7135_v23, %v1551_v8  ;;  %v1538_v26 = vsel %vm1535_vm5, %v1524_v2, %v1532_v21  ;;  %v1550_v27 = vsel %vm1535_vm5, %v1532_v21, %v1508_v10 }
 0x122   : > { %v1585_v31 = vmul.f32 %v7127_v9, %v1538_v26  ;;  %v1586_v35 = vmul.f32 %v7135_v23, %v1550_v27  ;;  %6166 = vmatpush1.bf16.msra.mxu0 %v6165_v5 }
 0x123   : > { %v1753_v42 = vpop.permute.xlu1 %1752 }
 0x124   : > { %v6173_v36 = vpack.c.bf16 %v1589_v22, %v1585_v31  ;;  %v1751_v15 = vpop.permute.xlu0 %1750  ;;  %v6171_v12 = vpack.c.bf16 %v1590_v25, %v1586_v35 }
 0x125   : > { %5929 = vmatmul.mubr.msk.f32.vlgmr.msra.gmra.mrb[0].mxu0 %vm583_vm2, %v5928_v29 }
 0x126   : > { %6172 = vmatprep.subr.bf16.mxu1 %v6171_v12  ;;  %1899 = vmatprep.mubr.f32.mxu0 %v6413_v16 }
 0x127   : > { %6174 = vmatpush1.bf16.msra.mxu1 %v6173_v36  ;;  %v1761_v30 = vpop.permute.xlu1 %1760 }
 0x128   : > { %v1780_v39 = vsel %vm1774_vm6, %v1753_v42, %v1761_v30  ;;  %v1759_v43 = vpop.permute.xlu0 %1758 }
 0x129   : > { %v1819_v44 = vmul.f32 %v7195_v13, %v1780_v39  ;;  %v1779_v45 = vsel %vm1774_vm6, %v1751_v15, %v1759_v43 }
 0x12a   : > { %v1815_v49 = vmul.f32 %v7195_v13, %v1779_v45  ;;  %5930 = vmatmul.mubr.msk.f32.vlgmr.msra.gmra.mrb[0].mxu1 %vm583_vm2, %v5928_v29 }
 0x12b   : > { %v1745_v52 = vpop.permute.xlu1 %1744  ;;  %1970 = vmatprep.mubr.f32.mxu1 %v6413_v16 }
 0x12c   : > { %v1784_v0 = vsel %vm1774_vm6, %v1745_v52, %v1753_v42  ;;  %v1743_v2 = vpop.permute.xlu0 %1742  ;;  %v6175_v6 = vpack.c.bf16 %v1819_v44, %v1815_v49 }
 0x12d   : > { %v1818_v7 = vmul.f32 %v7205_v46, %v1784_v0  ;;  %v1783_v54 = vsel %vm1774_vm6, %v1743_v2, %v1751_v15 }
 0x12e   : > { %v1814_v10 = vmul.f32 %v7205_v46, %v1783_v54  ;;  %6176 = vmatprep.subr.bf16.mxu0 %v6175_v6 }
 0x12f   : > { %v1769_v11 = vpop.permute.xlu1 %1768 }
 0x130   : > { %v6177_v60 = vpack.c.bf16 %v1818_v7, %v1814_v10  ;;  %v1776_v61 = vsel %vm1774_vm6, %v1761_v30, %v1769_v11  ;;  %v1788_v62 = vsel %vm1774_vm6, %v1769_v11, %v1745_v52  ;;  %v1767_v4 = vpop.permute.xlu0 %1766 }
 0x131   : > { %v1820_v5 = vmul.f32 %v7216_v1, %v1776_v61  ;;  %v1821_v63 = vmul.f32 %v7219_v3, %v1788_v62  ;;  %v1775_v8 = vsel %vm1774_vm6, %v1759_v43, %v1767_v4  ;;  %v1787_v21 = vsel %vm1774_vm6, %v1767_v4, %v1743_v2 }
 0x132   : > { %v1816_v22 = vmul.f32 %v7216_v1, %v1775_v8  ;;  %v1817_v25 = vmul.f32 %v7219_v3, %v1787_v21  ;;  %6178 = vmatpush1.bf16.msra.mxu0 %v6177_v60 }
 0x133   : > { %v1757_v26 = vpop.permute.xlu1 %1756 }
 0x134   : > { %v6185_v27 = vpack.c.bf16 %v1820_v5, %v1816_v22  ;;  %v1755_v31 = vpop.permute.xlu0 %1754  ;;  %v6183_v35 = vpack.c.bf16 %v1821_v63, %v1817_v25  ;;  %v5935_v5 = vld [vmem:[%s8101_s1 + $0x7] ss:$8 sm:$0xf] }
 0x135   : > { %v5932_v63 = vld [vmem:[%s8102_s2 + $0x30] sm:$0xff] }
 0x136   : > { %6184 = vmatprep.subr.bf16.mxu1 %v6183_v35 }
 0x137   : > { %6186 = vmatpush1.bf16.msra.mxu1 %v6185_v27  ;;  %v1765_v14 = vpop.permute.xlu1 %1764 }
 0x138   : > { %v1782_v29 = vsel %vm1774_vm6, %v1757_v26, %v1765_v14  ;;  %v1763_v42 = vpop.permute.xlu0 %1762 }
 0x139   : > { %v1827_v36 = vmul.f32 %v7195_v13, %v1782_v29  ;;  %v1781_v15 = vsel %vm1774_vm6, %v1755_v31, %v1763_v42 }
 0x13a   : > { %v1823_v12 = vmul.f32 %v7195_v13, %v1781_v15 }
 0x13b   : > { %v1749_v30 = vpop.permute.xlu1 %1748 }
 0x13c   : > { %v1786_v39 = vsel %vm1774_vm6, %v1749_v30, %v1757_v26  ;;  %v1747_v43 = vpop.permute.xlu0 %1746  ;;  %v6179_v44 = vpack.c.bf16 %v1827_v36, %v1823_v12  ;;  %v7266_v26 = vrot.slane %v5935_v5, %v6665_v20 }
 0x13d   : > { %v1826_v45 = vmul.f32 %v7205_v46, %v1786_v39  ;;  %v1785_v49 = vsel %vm1774_vm6, %v1747_v43, %v1755_v31 }
 0x13e   : > { %v1822_v52 = vmul.f32 %v7205_v46, %v1785_v49  ;;  %6180 = vmatprep.subr.bf16.mxu0 %v6179_v44  ;;  %v7290_v49 = vrot.slane %v5935_v5, %v6692_v33 }
 0x13f   : > { %v1773_v0 = vpop.permute.xlu1 %1772 }
 0x140   : > { %v6181_v2 = vpack.c.bf16 %v1826_v45, %v1822_v52  ;;  %v1778_v6 = vsel %vm1774_vm6, %v1765_v14, %v1773_v0  ;;  %v1790_v7 = vsel %vm1774_vm6, %v1773_v0, %v1749_v30  ;;  %v1771_v54 = vpop.permute.xlu0 %1770  ;;  %v7287_v45 = vrot.slane %v5935_v5, %v6680_v28 }
 0x141   : > { %v1828_v10 = vmul.f32 %v7216_v1, %v1778_v6  ;;  %v1829_v11 = vmul.f32 %v7219_v3, %v1790_v7  ;;  %v1777_v60 = vsel %vm1774_vm6, %v1763_v42, %v1771_v54  ;;  %v1789_v61 = vsel %vm1774_vm6, %v1771_v54, %v1747_v43 }
 0x142   : > { %v1824_v62 = vmul.f32 %v7216_v1, %v1777_v60  ;;  %v1825_v4 = vmul.f32 %v7219_v3, %v1789_v61  ;;  %6182 = vmatpush1.bf16.msra.mxu0 %v6181_v2  ;;  %v7276_v42 = vrot.slane %v5935_v5, %v6690_v32 }
 0x143   : > { %v1992_v8 = vpop.permute.xlu1 %1991 }
 0x144   : > { %v6189_v21 = vpack.c.bf16 %v1828_v10, %v1824_v62  ;;  %v1990_v22 = vpop.permute.xlu0 %1989  ;;  %v6187_v25 = vpack.c.bf16 %v1829_v11, %v1825_v4 }
 0x145   : > { %5933 = vmatmul.mubr.msk.f32.vlgmr.msra.gmra.mrb[0].mxu0 %vm583_vm2, %v5932_v63 }
 0x146   : > { %6188 = vmatprep.subr.bf16.mxu1 %v6187_v25  ;;  %2138 = vmatprep.mubr.f32.mxu0 %v6413_v16 }
 0x147   : > { %6190 = vmatpush1.bf16.msra.mxu1 %v6189_v21  ;;  %v2000_v27 = vpop.permute.xlu1 %1999 }
 0x148   : > { %v2019_v31 = vsel %vm2013_vm7, %v1992_v8, %v2000_v27  ;;  %v1998_v35 = vpop.permute.xlu0 %1997 }
 0x149   : > { %v2058_v14 = vmul.f32 %v7266_v26, %v2019_v31  ;;  %v2018_v29 = vsel %vm2013_vm7, %v1990_v22, %v1998_v35 }
 0x14a   : > { %v2054_v36 = vmul.f32 %v7266_v26, %v2018_v29  ;;  %5934 = vmatmul.mubr.msk.f32.vlgmr.msra.gmra.mrb[0].mxu1 %vm583_vm2, %v5932_v63 }
 0x14b   : > { %v1984_v15 = vpop.permute.xlu1 %1983  ;;  %2209 = vmatprep.mubr.f32.mxu1 %v6413_v16 }
 0x14c   : > { %v2023_v12 = vsel %vm2013_vm7, %v1984_v15, %v1992_v8  ;;  %v1982_v30 = vpop.permute.xlu0 %1981  ;;  %v6191_v39 = vpack.c.bf16 %v2058_v14, %v2054_v36 }
 0x14d   : > { %v2057_v43 = vmul.f32 %v7276_v42, %v2023_v12  ;;  %v2022_v44 = vsel %vm2013_vm7, %v1982_v30, %v1990_v22 }
 0x14e   : > { %v2053_v52 = vmul.f32 %v7276_v42, %v2022_v44  ;;  %6192 = vmatprep.subr.bf16.mxu0 %v6191_v39 }
 0x14f   : > { %v2008_v0 = vpop.permute.xlu1 %2007 }
 0x150   : > { %v6193_v2 = vpack.c.bf16 %v2057_v43, %v2053_v52  ;;  %v2015_v6 = vsel %vm2013_vm7, %v2000_v27, %v2008_v0  ;;  %v2027_v7 = vsel %vm2013_vm7, %v2008_v0, %v1984_v15  ;;  %v2006_v54 = vpop.permute.xlu0 %2005 }
 0x151   : > { %v2059_v10 = vmul.f32 %v7287_v45, %v2015_v6  ;;  %v2060_v11 = vmul.f32 %v7290_v49, %v2027_v7  ;;  %v2014_v60 = vsel %vm2013_vm7, %v1998_v35, %v2006_v54  ;;  %v2026_v61 = vsel %vm2013_vm7, %v2006_v54, %v1982_v30 }
 0x152   : > { %v2055_v62 = vmul.f32 %v7287_v45, %v2014_v60  ;;  %v2056_v4 = vmul.f32 %v7290_v49, %v2026_v61  ;;  %6194 = vmatpush1.bf16.msra.mxu0 %v6193_v2 }
 0x153   : > { %v1996_v5 = vpop.permute.xlu1 %1995 }
 0x154   : > { %v6201_v63 = vpack.c.bf16 %v2059_v10, %v2055_v62  ;;  %v1994_v8 = vpop.permute.xlu0 %1993  ;;  %v6199_v21 = vpack.c.bf16 %v2060_v11, %v2056_v4  ;;  %v5939_v62 = vld [vmem:[%s8101_s1 + $0x20] ss:$8 sm:$0xf] }
 0x155   : > { %v5936_v4 = vld [vmem:[%s8102_s2 + $0x38] sm:$0xff] }
 0x156   : > { %6200 = vmatprep.subr.bf16.mxu1 %v6199_v21 }
 0x157   : > { %6202 = vmatpush1.bf16.msra.mxu1 %v6201_v63  ;;  %v2004_v22 = vpop.permute.xlu1 %2003 }
 0x158   : > { %v2021_v25 = vsel %vm2013_vm7, %v1996_v5, %v2004_v22  ;;  %v2002_v27 = vpop.permute.xlu0 %2001 }
 0x159   : > { %v2066_v31 = vmul.f32 %v7266_v26, %v2021_v25  ;;  %v2020_v35 = vsel %vm2013_vm7, %v1994_v8, %v2002_v27 }
 0x15a   : > { %v2062_v14 = vmul.f32 %v7266_v26, %v2020_v35 }
 0x15b   : > { %v1988_v29 = vpop.permute.xlu1 %1987 }
 0x15c   : > { %v2025_v36 = vsel %vm2013_vm7, %v1988_v29, %v1996_v5  ;;  %v1986_v15 = vpop.permute.xlu0 %1985  ;;  %v6195_v12 = vpack.c.bf16 %v2066_v31, %v2062_v14 }
 0x15d   : > { %v2065_v30 = vmul.f32 %v7276_v42, %v2025_v36  ;;  %v2024_v39 = vsel %vm2013_vm7, %v1986_v15, %v1994_v8 }
 0x15e   : > { %v2061_v43 = vmul.f32 %v7276_v42, %v2024_v39  ;;  %6196 = vmatprep.subr.bf16.mxu0 %v6195_v12 }
 0x15f   : > { %v2012_v44 = vpop.permute.xlu1 %2011 }
 0x160   : > { %v6197_v52 = vpack.c.bf16 %v2065_v30, %v2061_v43  ;;  %v2017_v0 = vsel %vm2013_vm7, %v2004_v22, %v2012_v44  ;;  %v2029_v2 = vsel %vm2013_vm7, %v2012_v44, %v1988_v29  ;;  %v2010_v6 = vpop.permute.xlu0 %2009  ;;  %v7337_v22 = vrot.slane %v5939_v62, %v6665_v20 }
 0x161   : > { %v2067_v7 = vmul.f32 %v7287_v45, %v2017_v0  ;;  %v2068_v54 = vmul.f32 %v7290_v49, %v2029_v2  ;;  %v2016_v10 = vsel %vm2013_vm7, %v2002_v27, %v2010_v6  ;;  %v2028_v11 = vsel %vm2013_vm7, %v2010_v6, %v1986_v15 }
 0x162   : > { %v2063_v60 = vmul.f32 %v7287_v45, %v2016_v10  ;;  %v2064_v61 = vmul.f32 %v7290_v49, %v2028_v11  ;;  %6198 = vmatpush1.bf16.msra.mxu0 %v6197_v52  ;;  %v7347_v29 = vrot.slane %v5939_v62, %v6690_v32  ;;  %v7358_v32 = vrot.slane %v5939_v62, %v6680_v28 }
 0x163   : > { %v2231_v5 = vpop.permute.xlu1 %2230  ;;  %v7361_v44 = vrot.slane %v5939_v62, %v6692_v33 }
 0x164   : > { %v6205_v63 = vpack.c.bf16 %v2067_v7, %v2063_v60  ;;  %v2229_v8 = vpop.permute.xlu0 %2228  ;;  %v6203_v21 = vpack.c.bf16 %v2068_v54, %v2064_v61 }
 0x165   : > { %5937 = vmatmul.mubr.msk.f32.vlgmr.msra.gmra.mrb[0].mxu0 %vm583_vm2, %v5936_v4 }
 0x166   : > { %6204 = vmatprep.subr.bf16.mxu1 %v6203_v21  ;;  %2377 = vmatprep.mubr.f32.mxu0 %v6413_v16 }
 0x167   : > { %6206 = vmatpush1.bf16.msra.mxu1 %v6205_v63  ;;  %v2239_v25 = vpop.permute.xlu1 %2238 }
 0x168   : > { %v2258_v27 = vsel %vm2252_vm8, %v2231_v5, %v2239_v25  ;;  %v2237_v31 = vpop.permute.xlu0 %2236 }
 0x169   : > { %v2297_v35 = vmul.f32 %v7337_v22, %v2258_v27  ;;  %v2257_v14 = vsel %vm2252_vm8, %v2229_v8, %v2237_v31 }
 0x16a   : > { %v2293_v20 = vmul.f32 %v7337_v22, %v2257_v14  ;;  %5938 = vmatmul.mubr.msk.f32.vlgmr.msra.gmra.mrb[0].mxu1 %vm583_vm2, %v5936_v4 }
 0x16b   : > { %v2223_v36 = vpop.permute.xlu1 %2222  ;;  %2448 = vmatprep.mubr.f32.mxu1 %v6413_v16 }
 0x16c   : > { %v2262_v15 = vsel %vm2252_vm8, %v2223_v36, %v2231_v5  ;;  %v2221_v12 = vpop.permute.xlu0 %2220  ;;  %v6207_v30 = vpack.c.bf16 %v2297_v35, %v2293_v20 }
 0x16d   : > { %v2296_v39 = vmul.f32 %v7347_v29, %v2262_v15  ;;  %v2261_v43 = vsel %vm2252_vm8, %v2221_v12, %v2229_v8 }
 0x16e   : > { %v2292_v52 = vmul.f32 %v7347_v29, %v2261_v43  ;;  %6208 = vmatprep.subr.bf16.mxu0 %v6207_v30 }
 0x16f   : > { %v2247_v0 = vpop.permute.xlu1 %2246 }
 0x170   : > { %v6209_v2 = vpack.c.bf16 %v2296_v39, %v2292_v52  ;;  %v2254_v6 = vsel %vm2252_vm8, %v2239_v25, %v2247_v0  ;;  %v2266_v7 = vsel %vm2252_vm8, %v2247_v0, %v2223_v36  ;;  %v2245_v54 = vpop.permute.xlu0 %2244 }
 0x171   : > { %v2298_v10 = vmul.f32 %v7358_v32, %v2254_v6  ;;  %v2299_v28 = vmul.f32 %v7361_v44, %v2266_v7  ;;  %v2253_v33 = vsel %vm2252_vm8, %v2237_v31, %v2245_v54  ;;  %v2265_v11 = vsel %vm2252_vm8, %v2245_v54, %v2221_v12 }
 0x172   : > { %v2294_v60 = vmul.f32 %v7358_v32, %v2253_v33  ;;  %v2295_v61 = vmul.f32 %v7361_v44, %v2265_v11  ;;  %6210 = vmatpush1.bf16.msra.mxu0 %v6209_v2 }
 0x173   : > { %v2235_v62 = vpop.permute.xlu1 %2234 }
 0x174   : > { %v6217_v4 = vpack.c.bf16 %v2298_v10, %v2294_v60  ;;  %v2233_v5 = vpop.permute.xlu0 %2232  ;;  %v6215_v63 = vpack.c.bf16 %v2299_v28, %v2295_v61  ;;  %v5940_v60 = vld [vmem:[%s8102_s2 + $0x40] sm:$0xff] }
 0x176   : > { %6216 = vmatprep.subr.bf16.mxu1 %v6215_v63 }
 0x177   : > { %6218 = vmatpush1.bf16.msra.mxu1 %v6217_v4  ;;  %v2243_v8 = vpop.permute.xlu1 %2242 }
 0x178   : > { %v2260_v21 = vsel %vm2252_vm8, %v2235_v62, %v2243_v8  ;;  %v2241_v25 = vpop.permute.xlu0 %2240 }
 0x179   : > { %v2305_v27 = vmul.f32 %v7337_v22, %v2260_v21  ;;  %v2259_v31 = vsel %vm2252_vm8, %v2233_v5, %v2241_v25 }
 0x17a   : > { %v2301_v35 = vmul.f32 %v7337_v22, %v2259_v31 }
 0x17b   : > { %v2227_v14 = vpop.permute.xlu1 %2226 }
 0x17c   : > { %v2264_v20 = vsel %vm2252_vm8, %v2227_v14, %v2235_v62  ;;  %v2225_v36 = vpop.permute.xlu0 %2224  ;;  %v6211_v15 = vpack.c.bf16 %v2305_v27, %v2301_v35 }
 0x17d   : > { %v2304_v12 = vmul.f32 %v7347_v29, %v2264_v20  ;;  %v2263_v30 = vsel %vm2252_vm8, %v2225_v36, %v2233_v5 }
 0x17e   : > { %v2300_v39 = vmul.f32 %v7347_v29, %v2263_v30  ;;  %6212 = vmatprep.subr.bf16.mxu0 %v6211_v15 }
 0x17f   : > { %v2251_v43 = vpop.permute.xlu1 %2250 }
 0x180   : > { %v6213_v52 = vpack.c.bf16 %v2304_v12, %v2300_v39  ;;  %v2256_v0 = vsel %vm2252_vm8, %v2243_v8, %v2251_v43  ;;  %v2268_v2 = vsel %vm2252_vm8, %v2251_v43, %v2227_v14  ;;  %v2249_v6 = vpop.permute.xlu0 %2248  ;;  %v3952_v12 = vld [vmem:[%s8105_s5] sm:$0xff] }
 0x181   : > { %v2306_v7 = vmul.f32 %v7358_v32, %v2256_v0  ;;  %v2307_v54 = vmul.f32 %v7361_v44, %v2268_v2  ;;  %v2255_v10 = vsel %vm2252_vm8, %v2241_v25, %v2249_v6  ;;  %v2267_v28 = vsel %vm2252_vm8, %v2249_v6, %v2225_v36 }
 0x182   : > { %v2302_v33 = vmul.f32 %v7358_v32, %v2255_v10  ;;  %v2303_v11 = vmul.f32 %v7361_v44, %v2267_v28  ;;  %6214 = vmatpush1.bf16.msra.mxu0 %v6213_v52 }
 0x184   : > { %v6221_v61 = vpack.c.bf16 %v2306_v7, %v2302_v33  ;;  %v6219_v62 = vpack.c.bf16 %v2307_v54, %v2303_v11  ;;  %v5943_v11 = vld [vmem:[%s8104_s4 + $0x8] sm:$0xff] }
 0x185   : > { %5941 = vmatmul.mubr.msk.f32.vlgmr.msra.gmra.mrb[0].mxu0 %vm583_vm2, %v5940_v60 }
 0x186   : > { %6220 = vmatprep.subr.bf16.mxu1 %v6219_v62  ;;  %2576 = vmatprep.mubr.f32.mxu0 %v6413_v16 }
 0x187   : > { %6222 = vmatpush1.bf16.msra.mxu1 %v6221_v61 }
 0x18a   : > { %5942 = vmatmul.mubr.msk.f32.vlgmr.msra.gmra.mrb[0].mxu1 %vm583_vm2, %v5940_v60 }
 0x18b   : > { %2647 = vmatprep.mubr.f32.mxu1 %v6413_v16 }
 0x192   : > { %v2463_v4 = vpop.permute.xlu0 %2462 }
 0x258   : > { %v2379_v5 = vpop.f32.mrb[0].mxu0 }
 0x259   : > { %v2465_v63 = vadd.f32 %v2463_v4, %v2379_v5  ;;  %v2381_v8 = vpop.f32.mrb[1].mxu0 }
 0x25a   : > { %v2466_v25 = vadd.f32 %v2463_v4, %v2381_v8 }
 0x25b   : > { %v7407_v21 = vmax.f32 %v2465_v63, 0.0 }
 0x25c   : > { %v7411_v14 = vmax.f32 %v2466_v25, 0.0 }
 0x25d   : > { %v2450_v27 = vpop.f32.mrb[0].mxu1  ;;  %2490 = vrot.lane.b32.xlu1 %v7407_v21, %s6411_s23 }
 0x25e   : > { %v2467_v31 = vadd.f32 %v2463_v4, %v2450_v27  ;;  %v2452_v35 = vpop.f32.mrb[1].mxu1 }
 0x25f   : > { %v2468_v20 = vadd.f32 %v2463_v4, %v2452_v35 }
 0x260   : > { %v7413_v36 = vmax.f32 %v2467_v31, 0.0 }
 0x261   : > { %2492 = vrot.lane.b32.xlu1 %v7411_v14, %s6411_s23  ;;  %v7419_v15 = vmax.f32 %v2468_v20, 0.0 }
 0x262   : > { %2494 = vrot.lane.b32.xlu0 %v7413_v36, %s6411_s23 }
 0x265   : > { %2496 = vrot.lane.b32.xlu1 %v7419_v15, %s6411_s23 }
 0x266   : > { %2473 = vrot.lane.b32.xlu0 %v7407_v21, %s6412_s24 }
 0x269   : > { %2475 = vrot.lane.b32.xlu1 %v7411_v14, %s6412_s24 }
 0x26a   : > { %2477 = vrot.lane.b32.xlu0 %v7413_v36, %s6412_s24 }
 0x26d   : > { %2479 = vrot.lane.b32.xlu1 %v7419_v15, %s6412_s24 }
 0x26e   : > { %2799 = vrot.lane.b32.xlu0 %v7407_v21, %s6414_s25 }
 0x271   : > { %2801 = vrot.lane.b32.xlu1 %v7411_v14, %s6414_s25 }
 0x272   : > { %2803 = vrot.lane.b32.xlu0 %v7413_v36, %s6414_s25 }
 0x275   : > { %2805 = vrot.lane.b32.xlu1 %v7419_v15, %s6414_s25 }
 0x276   : > { %2966 = vrot.lane.b32.xlu0 %v7407_v21, %s6415_s26 }
 0x279   : > { %2968 = vrot.lane.b32.xlu1 %v7411_v14, %s6415_s26 }
 0x27a   : > { %2970 = vrot.lane.b32.xlu0 %v7413_v36, %s6415_s26 }
 0x27d   : > { %2972 = vrot.lane.b32.xlu1 %v7419_v15, %s6415_s26 }
 0x27e   : > { %3286 = vrot.lane.b32.xlu0 %v7411_v14, %s6416_s29 }
 0x281   : > { %3288 = vrot.lane.b32.xlu1 %v7413_v36, %s6416_s29 }
 0x282   : > { %3284 = vrot.lane.b32.xlu0 %v7407_v21, %s6416_s29 }
 0x285   : > { %3290 = vrot.lane.b32.xlu1 %v7419_v15, %s6416_s29 }
 0x286   : > { %3453 = vrot.lane.b32.xlu0 %v7411_v14, %s6417_s15 }
 0x289   : > { %3455 = vrot.lane.b32.xlu1 %v7413_v36, %s6417_s15 }
 0x28a   : > { %3451 = vrot.lane.b32.xlu0 %v7407_v21, %s6417_s15 }
 0x28d   : > { %3457 = vrot.lane.b32.xlu1 %v7419_v15, %s6417_s15 }
 0x28e   : > { %3620 = vrot.lane.b32.xlu0 %v7411_v14, %s6418_s22 }
 0x291   : > { %3622 = vrot.lane.b32.xlu1 %v7413_v36, %s6418_s22 }
 0x292   : > { %3618 = vrot.lane.b32.xlu0 %v7407_v21, %s6418_s22 }
 0x295   : > { %3624 = vrot.lane.b32.xlu1 %v7419_v15, %s6418_s22 }
 0x296   : > { %3787 = vrot.lane.b32.xlu0 %v7411_v14, %s6419_s13 }
 0x299   : > { %3789 = vrot.lane.b32.xlu1 %v7413_v36, %s6419_s13 }
 0x29a   : > { %3785 = vrot.lane.b32.xlu0 %v7407_v21, %s6419_s13 }
 0x29d   : > { %3791 = vrot.lane.b32.xlu1 %v7419_v15, %s6419_s13 }
 0x29e   : > { %3955 = vperm.xlu0 %6401, %v3952_v12   ;;  %v2489_v12 = vld [vmem:[%s8104_s4] sm:$0xff] }
 0x2cf   : > { %v2491_v30 = vpop.permute.xlu1 %2490 }
 0x2d3   : > { %v2493_v39 = vpop.permute.xlu1 %2492 }
 0x2d4   : > { %v2500_v43 = vsel %vm525_vm0, %v2491_v30, %v2493_v39  ;;  %v2495_v52 = vpop.permute.xlu0 %2494 }
 0x2d5   : > { %v2503_v0 = vmul.f32 %v2500_v43, %v6676_v24  ;;  %v2499_v2 = vsel %vm525_vm0, %v2493_v39, %v2495_v52 }
 0x2d6   : > { %v2504_v60 = vmul.f32 %v2499_v2, %v6695_v37 }
 0x2d7   : > { %2512 = vmatprep.subr.mxu0 %v2503_v0  ;;  %v2497_v6 = vpop.permute.xlu1 %2496 }
 0x2d8   : > { %v2498_v7 = vsel %vm525_vm0, %v2495_v52, %v2497_v6  ;;  %v2501_v54 = vsel %vm525_vm0, %v2497_v6, %v2491_v30  ;;  %v2474_v10 = vpop.permute.xlu0 %2473 }
 0x2d9   : > { %v2502_v28 = vmul.f32 %v2501_v54, %v6706_v40  ;;  %v2505_v33 = vmul.f32 %v2498_v7, %v6709_v41 }
 0x2db   : > { %2513 = vmatpush1.msra.mxu0 %v2502_v28  ;;  %2583 = vmatprep.subr.mxu1 %v2505_v33  ;;  %v2476_v61 = vpop.permute.xlu1 %2475 }
 0x2dc   : > { %v2483_v62 = vsel %vm437_vm1, %v2474_v10, %v2476_v61  ;;  %v2478_v4 = vpop.permute.xlu0 %2477  ;;  %5944 = vmatmul.mubr.msk.f32.vlgmr.msra.gmra.mrb[2].mxu0 %vm2508_vm9, %v5943_v11  ;;  %2584 = vmatpush1.msra.mxu1 %v2504_v60 }
 0x2dd   : > { %v2486_v5 = vmul.f32 %v2483_v62, %v6776_v50  ;;  %5945 = vmatmul.mubr.msk.f32.vlgmr.msra.gmra.mrb[2].mxu1 %vm2508_vm9, %v5943_v11  ;;  %2721 = vmatprep.mubr.f32.mxu0 %v6413_v16  ;;  %v2482_v63 = vsel %vm437_vm1, %v2476_v61, %v2478_v4  ;;  %v5948_v11 = vld [vmem:[%s8104_s4 + $0x10] sm:$0xff] }
 0x2de   : > { %2792 = vmatprep.mubr.f32.mxu1 %v6413_v16  ;;  %v2487_v30 = vmul.f32 %v2482_v63, %v6797_v58 }
 0x2df   : > { %2657 = vmatprep.subr.mxu0 %v2486_v5  ;;  %v2480_v8 = vpop.permute.xlu1 %2479 }
 0x2e0   : > { %v2481_v25 = vsel %vm437_vm1, %v2478_v4, %v2480_v8  ;;  %v2484_v27 = vsel %vm437_vm1, %v2480_v8, %v2474_v10  ;;  %v2800_v31 = vpop.permute.xlu0 %2799 }
 0x2e1   : > { %v2485_v35 = vmul.f32 %v2484_v27, %v6807_v17  ;;  %v2488_v20 = vmul.f32 %v2481_v25, %v6810_v18 }
 0x2e3   : > { %2658 = vmatpush1.msra.mxu0 %v2485_v35  ;;  %2728 = vmatprep.subr.mxu1 %v2488_v20  ;;  %v2802_v39 = vpop.permute.xlu1 %2801 }
 0x2e4   : > { %v2809_v43 = vsel %vm906_vm3, %v2800_v31, %v2802_v39  ;;  %v2804_v52 = vpop.permute.xlu0 %2803  ;;  %5946 = vmatmul.mubr.msk.f32.vlgmr.msra.gmra.mrb[2].mxu0 %vm2508_vm9, %v2489_v12  ;;  %2729 = vmatpush1.msra.mxu1 %v2487_v30 }
 0x2e5   : > { %v2812_v0 = vmul.f32 %v2809_v43, %v6879_v38  ;;  %5947 = vmatmul.mubr.msk.f32.vlgmr.msra.gmra.mrb[2].mxu1 %vm2508_vm9, %v2489_v12  ;;  %2884 = vmatprep.mubr.f32.mxu0 %v6413_v16  ;;  %v2808_v2 = vsel %vm906_vm3, %v2802_v39, %v2804_v52  ;;  %v5951_v12 = vld [vmem:[%s8104_s4 + $0x18] sm:$0xff] }
 0x2e6   : > { %2955 = vmatprep.mubr.f32.mxu1 %v6413_v16  ;;  %v2813_v60 = vmul.f32 %v2808_v2, %v6900_v48 }
 0x2e7   : > { %2820 = vmatprep.subr.mxu0 %v2812_v0  ;;  %v2806_v6 = vpop.permute.xlu1 %2805 }
 0x2e8   : > { %v2807_v7 = vsel %vm906_vm3, %v2804_v52, %v2806_v6  ;;  %v2810_v54 = vsel %vm906_vm3, %v2806_v6, %v2800_v31  ;;  %v2967_v10 = vpop.permute.xlu0 %2966 }
 0x2e9   : > { %v2811_v28 = vmul.f32 %v2810_v54, %v6910_v55  ;;  %v2814_v33 = vmul.f32 %v2807_v7, %v6913_v56 }
 0x2eb   : > { %2821 = vmatpush1.msra.mxu0 %v2811_v28  ;;  %2891 = vmatprep.subr.mxu1 %v2814_v33  ;;  %v2969_v61 = vpop.permute.xlu1 %2968 }
 0x2ec   : > { %v2976_v62 = vsel %vm1145_vm4, %v2967_v10, %v2969_v61  ;;  %v2971_v4 = vpop.permute.xlu0 %2970  ;;  %5949 = vmatmul.mubr.msk.f32.vlgmr.msra.gmra.mrb[2].mxu0 %vm2508_vm9, %v5948_v11  ;;  %2892 = vmatpush1.msra.mxu1 %v2813_v60 }
 0x2ed   : > { %v2979_v5 = vmul.f32 %v2976_v62, %v6982_v34  ;;  %5950 = vmatmul.mubr.msk.f32.vlgmr.msra.gmra.mrb[2].mxu1 %vm2508_vm9, %v5948_v11  ;;  %3051 = vmatprep.mubr.f32.mxu0 %v6413_v16  ;;  %v2975_v63 = vsel %vm1145_vm4, %v2969_v61, %v2971_v4 }
 0x2ee   : > { %3122 = vmatprep.mubr.f32.mxu1 %v6413_v16  ;;  %v2980_v30 = vmul.f32 %v2975_v63, %v7003_v47 }
 0x2ef   : > { %2987 = vmatprep.subr.mxu0 %v2979_v5  ;;  %v2973_v8 = vpop.permute.xlu1 %2972 }
 0x2f0   : > { %v2974_v25 = vsel %vm1145_vm4, %v2971_v4, %v2973_v8  ;;  %v2977_v27 = vsel %vm1145_vm4, %v2973_v8, %v2967_v10  ;;  %v3287_v31 = vpop.permute.xlu0 %3286 }
 0x2f1   : > { %v2978_v35 = vmul.f32 %v2977_v27, %v7013_v57  ;;  %v2981_v20 = vmul.f32 %v2974_v25, %v7016_v59  ;;  %v5957_v25 = vld [vmem:[%s8104_s4 + $0x28] sm:$0xff] }
 0x2f3   : > { %2988 = vmatpush1.msra.mxu0 %v2978_v35  ;;  %3058 = vmatprep.subr.mxu1 %v2981_v20  ;;  %v3289_v39 = vpop.permute.xlu1 %3288 }
 0x2f4   : > { %v3293_v43 = vsel %vm1535_vm5, %v3287_v31, %v3289_v39  ;;  %v3285_v52 = vpop.permute.xlu0 %3284  ;;  %5952 = vmatmul.mubr.msk.f32.vlgmr.msra.gmra.mrb[2].mxu0 %vm2508_vm9, %v5951_v12  ;;  %3059 = vmatpush1.msra.mxu1 %v2980_v30 }
 0x2f5   : > { %v3297_v0 = vmul.f32 %v3293_v43, %v7089_v51  ;;  %3138 = vmatprep.subr.mxu0 %v7411_v14  ;;  %5953 = vmatmul.mubr.msk.f32.vlgmr.msra.gmra.mrb[2].mxu1 %vm2508_vm9, %v5951_v12  ;;  %v3294_v6 = vsel %vm1535_vm5, %v3285_v52, %v3287_v31 }
 0x2f6   : > { %3139 = vmatpush1.msra.mxu0 %v7407_v21  ;;  %3209 = vmatprep.subr.mxu1 %v7419_v15  ;;  %v3296_v15 = vmul.f32 %v3294_v6, %v7101_v53 }
 0x2f7   : > { %3210 = vmatpush1.msra.mxu1 %v7413_v36  ;;  %3305 = vmatprep.subr.mxu0 %v3297_v0  ;;  %v3291_v2 = vpop.permute.xlu1 %3290  ;;  %v5954_v36 = vld [vmem:[%s8104_s4 + $0x20] sm:$0xff] }
 0x2f8   : > { %v3295_v7 = vsel %vm1535_vm5, %v3291_v2, %v3285_v52  ;;  %v3454_v54 = vpop.permute.xlu0 %3453  ;;  %3202 = vmatprep.mubr.f32.mxu0 %v6413_v16  ;;  %3273 = vmatprep.mubr.f32.mxu1 %v6413_v16  ;;  %v3292_v21 = vsel %vm1535_vm5, %v3289_v39, %v3291_v2 }
 0x2f9   : > { %v3299_v14 = vmul.f32 %v3295_v7, %v7135_v23  ;;  %v3298_v28 = vmul.f32 %v3292_v21, %v7127_v9  ;;  %v5960_v7 = vld [vmem:[%s8104_s4 + $0x30] sm:$0xff] }
 0x2fb   : > { %3376 = vmatprep.subr.mxu1 %v3299_v14  ;;  %v3456_v10 = vpop.permute.xlu1 %3455 }
 0x2fc   : > { %v3460_v33 = vsel %vm1774_vm6, %v3454_v54, %v3456_v10  ;;  %v3452_v11 = vpop.permute.xlu0 %3451  ;;  %5955 = vmatmul.mubr.msk.f32.vlgmr.msra.gmra.mrb[2].mxu0 %vm2508_vm9, %v5954_v36 }
 0x2fd   : > { %v3464_v60 = vmul.f32 %v3460_v33, %v7195_v13  ;;  %3306 = vmatpush1.msra.mxu0 %v3296_v15  ;;  %5956 = vmatmul.mubr.msk.f32.vlgmr.msra.gmra.mrb[2].mxu1 %vm2508_vm9, %v5954_v36  ;;  %v3461_v62 = vsel %vm1774_vm6, %v3452_v11, %v3454_v54 }
 0x2fe   : > { %3377 = vmatpush1.msra.mxu1 %v3298_v28  ;;  %3369 = vmatprep.mubr.f32.mxu0 %v6413_v16  ;;  %v3463_v27 = vmul.f32 %v3461_v62, %v7205_v46  ;;  %v5963_v62 = vld [vmem:[%s8104_s4 + $0x38] sm:$0xff] }
 0x2ff   : > { %3472 = vmatprep.subr.mxu0 %v3464_v60  ;;  %v3458_v61 = vpop.permute.xlu1 %3457  ;;  %3440 = vmatprep.mubr.f32.mxu1 %v6413_v16 }
 0x300   : > { %v3462_v4 = vsel %vm1774_vm6, %v3458_v61, %v3452_v11  ;;  %v3621_v5 = vpop.permute.xlu0 %3620  ;;  %v3459_v63 = vsel %vm1774_vm6, %v3456_v10, %v3458_v61 }
 0x301   : > { %v3466_v8 = vmul.f32 %v3462_v4, %v7219_v3  ;;  %v3465_v35 = vmul.f32 %v3459_v63, %v7216_v1  ;;  %v5966_v63 = vld [vmem:[%s8104_s4 + $0x40] sm:$0xff] }
 0x303   : > { %3543 = vmatprep.subr.mxu1 %v3466_v8  ;;  %v3623_v31 = vpop.permute.xlu1 %3622 }
 0x304   : > { %v3627_v20 = vsel %vm2013_vm7, %v3621_v5, %v3623_v31  ;;  %v3619_v12 = vpop.permute.xlu0 %3618  ;;  %5958 = vmatmul.mubr.msk.f32.vlgmr.msra.gmra.mrb[2].mxu0 %vm2508_vm9, %v5957_v25 }
 0x305   : > { %v3631_v30 = vmul.f32 %v3627_v20, %v7266_v26  ;;  %3473 = vmatpush1.msra.mxu0 %v3463_v27  ;;  %5959 = vmatmul.mubr.msk.f32.vlgmr.msra.gmra.mrb[2].mxu1 %vm2508_vm9, %v5957_v25  ;;  %v3628_v43 = vsel %vm2013_vm7, %v3619_v12, %v3621_v5 }
 0x306   : > { %3544 = vmatpush1.msra.mxu1 %v3465_v35  ;;  %3536 = vmatprep.mubr.f32.mxu0 %v6413_v16  ;;  %v3630_v54 = vmul.f32 %v3628_v43, %v7276_v42 }
 0x307   : > { %3639 = vmatprep.subr.mxu0 %v3631_v30  ;;  %v3625_v39 = vpop.permute.xlu1 %3624  ;;  %3607 = vmatprep.mubr.f32.mxu1 %v6413_v16 }
 0x308   : > { %v3629_v52 = vsel %vm2013_vm7, %v3625_v39, %v3619_v12  ;;  %v3788_v0 = vpop.permute.xlu0 %3787  ;;  %v3626_v2 = vsel %vm2013_vm7, %v3623_v31, %v3625_v39 }
 0x309   : > { %v3633_v6 = vmul.f32 %v3629_v52, %v7290_v49  ;;  %v3632_v14 = vmul.f32 %v3626_v2, %v7287_v45 }
 0x30b   : > { %3710 = vmatprep.subr.mxu1 %v3633_v6  ;;  %v3790_v21 = vpop.permute.xlu1 %3789  ;;  %v5680_v6 = vld [vmem:[%s8109_s9] sm:$0xff] }
 0x30c   : > { %v3794_v36 = vsel %vm2252_vm8, %v3788_v0, %v3790_v21  ;;  %5961 = vmatmul.mubr.msk.f32.vlgmr.msra.gmra.mrb[2].mxu0 %vm2508_vm9, %v5960_v7  ;;  %v3786_v10 = vpop.permute.xlu0 %3785 }
 0x30d   : > { %v3798_v15 = vmul.f32 %v3794_v36, %v7337_v22  ;;  %3640 = vmatpush1.msra.mxu0 %v3630_v54  ;;  %5962 = vmatmul.mubr.msk.f32.vlgmr.msra.gmra.mrb[2].mxu1 %vm2508_vm9, %v5960_v7  ;;  %v3795_v33 = vsel %vm2252_vm8, %v3786_v10, %v3788_v0  ;;  %v5444_v7 = vld [vmem:[%s8107_s7] sm:$0xff]  ;;  %v5681_v54 = vld [vmem:[%s8109_s9 + $0x8] sm:$0x3] }
 0x30e   : > { %3711 = vmatpush1.msra.mxu1 %v3632_v14  ;;  %3703 = vmatprep.mubr.f32.mxu0 %v6413_v16  ;;  %v3797_v4 = vmul.f32 %v3795_v33, %v7347_v29 }
 0x30f   : > { %3806 = vmatprep.subr.mxu0 %v3798_v15  ;;  %v3792_v28 = vpop.permute.xlu1 %3791  ;;  %3774 = vmatprep.mubr.f32.mxu1 %v6413_v16 }
 0x310   : > { %v3796_v11 = vsel %vm2252_vm8, %v3792_v28, %v3786_v10  ;;  %v3793_v60 = vsel %vm2252_vm8, %v3790_v21, %v3792_v28 }
 0x311   : > { %v3800_v61 = vmul.f32 %v3796_v11, %v7361_v44  ;;  %v3799_v5 = vmul.f32 %v3793_v60, %v7358_v32 }
 0x313   : > { %3877 = vmatprep.subr.mxu1 %v3800_v61 }
 0x314   : > { %5964 = vmatmul.mubr.msk.f32.vlgmr.msra.gmra.mrb[2].mxu0 %vm2508_vm9, %v5963_v62 }
 0x315   : > { %3807 = vmatpush1.msra.mxu0 %v3797_v4  ;;  %5965 = vmatmul.mubr.msk.f32.vlgmr.msra.gmra.mrb[2].mxu1 %vm2508_vm9, %v5963_v62  ;;  %v5969_v62 = vld [vmem:[%s8106_s6 + $0x8] sm:$0xff] }
 0x316   : > { %3878 = vmatpush1.msra.mxu1 %v3799_v5  ;;  %3870 = vmatprep.mubr.f32.mxu0 %v6413_v16 }
 0x317   : > { %3941 = vmatprep.mubr.f32.mxu1 %v6413_v16 }
 0x31c   : > { %5967 = vmatmul.mubr.msk.f32.vlgmr.msra.gmra.mrb[2].mxu0 %vm2508_vm9, %v5966_v63 }
 0x31d   : > { %5968 = vmatmul.mubr.msk.f32.vlgmr.msra.gmra.mrb[2].mxu1 %vm2508_vm9, %v5966_v63  ;;  %4068 = vmatprep.mubr.f32.mxu0 %v6413_v16  ;;  %v3956_v8 = vpop.permute.xlu0 %3955 }
 0x31e   : > { %4139 = vmatprep.mubr.f32.mxu1 %v6413_v16 }
 0x3ef   : > { %v3872_v25 = vpop.f32.mrb[2].mxu0 }
 0x3f0   : > { %v3958_v27 = vadd.f32 %v3956_v8, %v3872_v25  ;;  %v3874_v31 = vpop.f32.mrb[3].mxu0  ;;  %v3943_v35 = vpop.f32.mrb[2].mxu1 }
 0x3f1   : > { %v3959_v20 = vadd.f32 %v3956_v8, %v3874_v31  ;;  %v3945_v12 = vpop.f32.mrb[3].mxu1  ;;  %v3960_v52 = vadd.f32 %v3956_v8, %v3943_v35 }
 0x3f2   : > { %v7645_v30 = vmax.f32 %v3958_v27, 0.0  ;;  %v3961_v39 = vadd.f32 %v3956_v8, %v3945_v12 }
 0x3f3   : > { %v7647_v43 = vmax.f32 %v3959_v20, 0.0  ;;  %v7655_v2 = vmax.f32 %v3960_v52, 0.0 }
 0x3f4   : > { %3983 = vrot.lane.b32.xlu1 %v7645_v30, %s6411_s23  ;;  %v7653_v0 = vmax.f32 %v3961_v39, 0.0 }
 0x3f5   : > { %3985 = vrot.lane.b32.xlu0 %v7647_v43, %s6411_s23 }
 0x3f8   : > { %3989 = vrot.lane.b32.xlu1 %v7653_v0, %s6411_s23 }
 0x3f9   : > { %3987 = vrot.lane.b32.xlu0 %v7655_v2, %s6411_s23 }
 0x3fc   : > { %3966 = vrot.lane.b32.xlu1 %v7645_v30, %s6412_s24 }
 0x3fd   : > { %3968 = vrot.lane.b32.xlu0 %v7647_v43, %s6412_s24 }
 0x400   : > { %3972 = vrot.lane.b32.xlu1 %v7653_v0, %s6412_s24 }
 0x401   : > { %3970 = vrot.lane.b32.xlu0 %v7655_v2, %s6412_s24 }
 0x404   : > { %4291 = vrot.lane.b32.xlu1 %v7645_v30, %s6414_s25 }
 0x405   : > { %4293 = vrot.lane.b32.xlu0 %v7647_v43, %s6414_s25 }
 0x408   : > { %4297 = vrot.lane.b32.xlu1 %v7653_v0, %s6414_s25 }
 0x409   : > { %4295 = vrot.lane.b32.xlu0 %v7655_v2, %s6414_s25 }
 0x40c   : > { %4458 = vrot.lane.b32.xlu1 %v7645_v30, %s6415_s26 }
 0x40d   : > { %4460 = vrot.lane.b32.xlu0 %v7647_v43, %s6415_s26 }
 0x410   : > { %4464 = vrot.lane.b32.xlu1 %v7653_v0, %s6415_s26 }
 0x411   : > { %4462 = vrot.lane.b32.xlu0 %v7655_v2, %s6415_s26  ;;  %s6002_s26 = sshll.u32 %s8113_s18, 4 }
 0x414   : > { %4778 = vrot.lane.b32.xlu1 %v7647_v43, %s6416_s29 }
 0x415   : > { %4780 = vrot.lane.b32.xlu0 %v7655_v2, %s6416_s29 }
 0x418   : > { %4776 = vrot.lane.b32.xlu1 %v7645_v30, %s6416_s29 }
 0x419   : > { %4782 = vrot.lane.b32.xlu0 %v7653_v0, %s6416_s29 }
 0x41c   : > { %4945 = vrot.lane.b32.xlu1 %v7647_v43, %s6417_s15 }
 0x41d   : > { %4947 = vrot.lane.b32.xlu0 %v7655_v2, %s6417_s15 }
 0x420   : > { %4943 = vrot.lane.b32.xlu1 %v7645_v30, %s6417_s15 }
 0x421   : > { %4949 = vrot.lane.b32.xlu0 %v7653_v0, %s6417_s15 }
 0x424   : > { %5112 = vrot.lane.b32.xlu1 %v7647_v43, %s6418_s22 }
 0x425   : > { %5114 = vrot.lane.b32.xlu0 %v7655_v2, %s6418_s22 }
 0x428   : > { %5110 = vrot.lane.b32.xlu1 %v7645_v30, %s6418_s22 }
 0x429   : > { %5116 = vrot.lane.b32.xlu0 %v7653_v0, %s6418_s22  ;;  %s386_s22 = scalar_lea.vmem %s8111_s11, %s6002_s26 }
 0x42c   : > { %5279 = vrot.lane.b32.xlu1 %v7647_v43, %s6419_s13 }
 0x42d   : > { %5281 = vrot.lane.b32.xlu0 %v7655_v2, %s6419_s13 }
 0x430   : > { %5277 = vrot.lane.b32.xlu1 %v7645_v30, %s6419_s13 }
 0x431   : > { %5283 = vrot.lane.b32.xlu0 %v7653_v0, %s6419_s13 }
 0x434   : > { %5447 = vperm.xlu1 %6402, %v5444_v7  }
 0x435   : > { %5684 = vperm.xlu0 %6401, %v5680_v6  }
 0x438   : > { %5689 = vperm.xlu1 %6402, %v5681_v54  }
 0x466   : > { %v3984_v21 = vpop.permute.xlu1 %3983 }
 0x467   : > { %v3986_v14 = vpop.permute.xlu0 %3985 }
 0x468   : > { %v3993_v36 = vsel %vm525_vm0, %v3984_v21, %v3986_v14 }
 0x469   : > { %v3996_v15 = vmul.f32 %v3993_v36, %v6676_v24 }
 0x46a   : > { %v3990_v10 = vpop.permute.xlu1 %3989 }
 0x46b   : > { %v3994_v28 = vsel %vm525_vm0, %v3990_v10, %v3984_v21  ;;  %v3988_v33 = vpop.permute.xlu0 %3987  ;;  %4004 = vmatprep.subr.mxu0 %v3996_v15 }
 0x46c   : > { %v3995_v11 = vmul.f32 %v3994_v28, %v6706_v40  ;;  %v3991_v60 = vsel %vm525_vm0, %v3988_v33, %v3990_v10  ;;  %v3992_v61 = vsel %vm525_vm0, %v3986_v14, %v3988_v33 }
 0x46d   : > { %v3997_v24 = vmul.f32 %v3992_v61, %v6695_v37  ;;  %v3998_v4 = vmul.f32 %v3991_v60, %v6709_v41 }
 0x46e   : > { %4005 = vmatpush1.msra.mxu0 %v3995_v11  ;;  %v3967_v5 = vpop.permute.xlu1 %3966 }
 0x46f   : > { %v3969_v63 = vpop.permute.xlu0 %3968  ;;  %5970 = vmatmul.mubr.msk.f32.vlgmr.msra.gmra.mrb[4].mxu0 %vm2508_vm9, %v5969_v62  ;;  %4075 = vmatprep.subr.mxu1 %v3998_v4 }
 0x470   : > { %v3976_v40 = vsel %vm437_vm1, %v3967_v5, %v3969_v63  ;;  %4076 = vmatpush1.msra.mxu1 %v3997_v24  ;;  %4213 = vmatprep.mubr.f32.mxu0 %v6413_v16 }
 0x471   : > { %v3979_v8 = vmul.f32 %v3976_v40, %v6776_v50  ;;  %5971 = vmatmul.mubr.msk.f32.vlgmr.msra.gmra.mrb[4].mxu1 %vm2508_vm9, %v5969_v62  ;;  %v3982_v50 = vld [vmem:[%s8106_s6] sm:$0xff] }
 0x472   : > { %v3973_v25 = vpop.permute.xlu1 %3972  ;;  %4284 = vmatprep.mubr.f32.mxu1 %v6413_v16 }
 0x473   : > { %v3977_v37 = vsel %vm437_vm1, %v3973_v25, %v3967_v5  ;;  %v3971_v41 = vpop.permute.xlu0 %3970  ;;  %4149 = vmatprep.subr.mxu0 %v3979_v8 }
 0x474   : > { %v3978_v27 = vmul.f32 %v3977_v37, %v6807_v17  ;;  %v3974_v31 = vsel %vm437_vm1, %v3971_v41, %v3973_v25  ;;  %v3975_v35 = vsel %vm437_vm1, %v3969_v63, %v3971_v41 }
 0x475   : > { %v3980_v20 = vmul.f32 %v3975_v35, %v6797_v58  ;;  %v3981_v12 = vmul.f32 %v3974_v31, %v6810_v18 }
 0x476   : > { %4150 = vmatpush1.msra.mxu0 %v3978_v27  ;;  %v4292_v39 = vpop.permute.xlu1 %4291 }
 0x477   : > { %v4294_v52 = vpop.permute.xlu0 %4293  ;;  %5972 = vmatmul.mubr.msk.f32.vlgmr.msra.gmra.mrb[4].mxu0 %vm2508_vm9, %v3982_v50  ;;  %4220 = vmatprep.subr.mxu1 %v3981_v12 }
 0x478   : > { %v4301_v17 = vsel %vm906_vm3, %v4292_v39, %v4294_v52  ;;  %4221 = vmatpush1.msra.mxu1 %v3980_v20  ;;  %4376 = vmatprep.mubr.f32.mxu0 %v6413_v16 }
 0x479   : > { %v4304_v6 = vmul.f32 %v4301_v17, %v6879_v38  ;;  %5973 = vmatmul.mubr.msk.f32.vlgmr.msra.gmra.mrb[4].mxu1 %vm2508_vm9, %v3982_v50  ;;  %v5974_v38 = vld [vmem:[%s8106_s6 + $0x10] sm:$0xff] }
 0x47a   : > { %v4298_v7 = vpop.permute.xlu1 %4297  ;;  %4447 = vmatprep.mubr.f32.mxu1 %v6413_v16 }
 0x47b   : > { %v4302_v58 = vsel %vm906_vm3, %v4298_v7, %v4292_v39  ;;  %v4296_v18 = vpop.permute.xlu0 %4295  ;;  %4312 = vmatprep.subr.mxu0 %v4304_v6 }
 0x47c   : > { %v4303_v54 = vmul.f32 %v4302_v58, %v6910_v55  ;;  %v4299_v21 = vsel %vm906_vm3, %v4296_v18, %v4298_v7  ;;  %v4300_v14 = vsel %vm906_vm3, %v4294_v52, %v4296_v18 }
 0x47d   : > { %v4305_v36 = vmul.f32 %v4300_v14, %v6900_v48  ;;  %v4306_v15 = vmul.f32 %v4299_v21, %v6913_v56 }
 0x47e   : > { %4313 = vmatpush1.msra.mxu0 %v4303_v54  ;;  %v4459_v10 = vpop.permute.xlu1 %4458 }
 0x47f   : > { %v4461_v28 = vpop.permute.xlu0 %4460  ;;  %5975 = vmatmul.mubr.msk.f32.vlgmr.msra.gmra.mrb[4].mxu0 %vm2508_vm9, %v5974_v38  ;;  %4383 = vmatprep.subr.mxu1 %v4306_v15 }
 0x480   : > { %v4468_v55 = vsel %vm1145_vm4, %v4459_v10, %v4461_v28  ;;  %4384 = vmatpush1.msra.mxu1 %v4305_v36  ;;  %4543 = vmatprep.mubr.f32.mxu0 %v6413_v16 }
 0x481   : > { %v4471_v33 = vmul.f32 %v4468_v55, %v6982_v34  ;;  %5976 = vmatmul.mubr.msk.f32.vlgmr.msra.gmra.mrb[4].mxu1 %vm2508_vm9, %v5974_v38  ;;  %v5977_v34 = vld [vmem:[%s8106_s6 + $0x18] sm:$0xff] }
 0x482   : > { %v4465_v11 = vpop.permute.xlu1 %4464  ;;  %4614 = vmatprep.mubr.f32.mxu1 %v6413_v16 }
 0x483   : > { %v4469_v48 = vsel %vm1145_vm4, %v4465_v11, %v4459_v10  ;;  %v4463_v56 = vpop.permute.xlu0 %4462  ;;  %4479 = vmatprep.subr.mxu0 %v4471_v33 }
 0x484   : > { %v4470_v60 = vmul.f32 %v4469_v48, %v7013_v57  ;;  %v4466_v61 = vsel %vm1145_vm4, %v4463_v56, %v4465_v11  ;;  %v4467_v62 = vsel %vm1145_vm4, %v4461_v28, %v4463_v56  ;;  %v5632_v56 = vld [vmem:[%s8110_s10 + $0x80] sm:$0xff] }
 0x485   : > { %v4472_v24 = vmul.f32 %v4467_v62, %v7003_v47  ;;  %v4473_v4 = vmul.f32 %v4466_v61, %v7016_v59 }
 0x486   : > { %4480 = vmatpush1.msra.mxu0 %v4470_v60  ;;  %v4779_v5 = vpop.permute.xlu1 %4778  ;;  %v5633_v60 = vld [vmem:[%s8110_s10 + $0x88] sm:$0xff] }
 0x487   : > { %v4781_v63 = vpop.permute.xlu0 %4780  ;;  %5978 = vmatmul.mubr.msk.f32.vlgmr.msra.gmra.mrb[4].mxu0 %vm2508_vm9, %v5977_v34  ;;  %4550 = vmatprep.subr.mxu1 %v4473_v4  ;;  %v5617_v4 = vld [vmem:[%s8110_s10 + $0x8] sm:$0xff] }
 0x488   : > { %v4785_v57 = vsel %vm1535_vm5, %v4779_v5, %v4781_v63  ;;  %4630 = vmatprep.subr.mxu0 %v7647_v43  ;;  %4551 = vmatpush1.msra.mxu1 %v4472_v24  ;;  %v5616_v24 = vld [vmem:[%s8110_s10] sm:$0xff] }
 0x489   : > { %v4789_v40 = vmul.f32 %v4785_v57, %v7089_v51  ;;  %4631 = vmatpush1.msra.mxu0 %v7645_v30  ;;  %5979 = vmatmul.mubr.msk.f32.vlgmr.msra.gmra.mrb[4].mxu1 %vm2508_vm9, %v5977_v34  ;;  %v5980_v30 = vld [vmem:[%s8106_s6 + $0x20] sm:$0xff] }
 0x48a   : > { %4701 = vmatprep.subr.mxu1 %v7653_v0  ;;  %v4777_v47 = vpop.permute.xlu1 %4776  ;;  %4694 = vmatprep.mubr.f32.mxu0 %v6413_v16  ;;  %v5454_v34 = vld [vmem:[%s8108_s8] sm:$0xff] }
 0x48b   : > { %4702 = vmatpush1.msra.mxu1 %v7655_v2  ;;  %v4786_v59 = vsel %vm1535_vm5, %v4777_v47, %v4779_v5  ;;  %v4783_v8 = vpop.permute.xlu0 %4782  ;;  %4797 = vmatprep.subr.mxu0 %v4789_v40  ;;  %v5664_v57 = vld [vmem:[%s8110_s10 + $0x180] sm:$0xff]  ;;  %v5665_v40 = vld [vmem:[%s8110_s10 + $0x188] sm:$0xff] }
 0x48c   : > { %v4788_v43 = vmul.f32 %v4786_v59, %v7101_v53  ;;  %v4787_v51 = vsel %vm1535_vm5, %v4783_v8, %v4777_v47  ;;  %4765 = vmatprep.mubr.f32.mxu1 %v6413_v16  ;;  %v4784_v0 = vsel %vm1535_vm5, %v4781_v63, %v4783_v8  ;;  %v5648_v47 = vld [vmem:[%s8110_s10 + $0x100] sm:$0xff]  ;;  %v6223_v8 = vpack.c.bf16 %v5633_v60, %v5632_v56  ;;  %v5643_v56 = vld [vmem:[%s8110_s10 + $0xd8] sm:$0xff] }
 0x48d   : > { %v4791_v2 = vmul.f32 %v4787_v51, %v7135_v23  ;;  %v4790_v53 = vmul.f32 %v4784_v0, %v7127_v9  ;;  %v5634_v51 = vld [vmem:[%s8110_s10 + $0x90] sm:$0xff] }
 0x48e   : > { %v4946_v25 = vpop.permute.xlu1 %4945 }
 0x48f   : > { %v4948_v37 = vpop.permute.xlu0 %4947  ;;  %5981 = vmatmul.mubr.msk.f32.vlgmr.msra.gmra.mrb[4].mxu0 %vm2508_vm9, %v5980_v30  ;;  %4868 = vmatprep.subr.mxu1 %v4791_v2  ;;  %v6225_v2 = vpack.c.bf16 %v5617_v4, %v5616_v24  ;;  %v5674_v24 = vld [vmem:[%s8110_s10 + $0x1d0] sm:$0xff]  ;;  %v5675_v4 = vld [vmem:[%s8110_s10 + $0x1d8] sm:$0xff] }
 0x490   : > { %v4952_v41 = vsel %vm1774_vm6, %v4946_v25, %v4948_v37  ;;  %4798 = vmatpush1.msra.mxu0 %v4788_v43  ;;  %4861 = vmatprep.mubr.f32.mxu0 %v6413_v16  ;;  %v5649_v43 = vld [vmem:[%s8110_s10 + $0x108] sm:$0xff] }
 0x491   : > { %v4956_v27 = vmul.f32 %v4952_v41, %v7195_v13  ;;  %5982 = vmatmul.mubr.msk.f32.vlgmr.msra.gmra.mrb[4].mxu1 %vm2508_vm9, %v5980_v30  ;;  %v5983_v13 = vld [vmem:[%s8106_s6 + $0x28] sm:$0xff]  ;;  %v5635_v30 = vld [vmem:[%s8110_s10 + $0x98] sm:$0xff]  ;;  %v5618_v41 = vld [vmem:[%s8110_s10 + $0x10] sm:$0xff] }
 0x492   : > { %4869 = vmatpush1.msra.mxu1 %v4790_v53  ;;  %v4944_v31 = vpop.permute.xlu1 %4943  ;;  %4932 = vmatprep.mubr.f32.mxu1 %v6413_v16  ;;  %v6255_v53 = vpack.c.bf16 %v5665_v40, %v5664_v57  ;;  %v5627_v57 = vld [vmem:[%s8110_s10 + $0x58] sm:$0xff] }
 0x493   : > { %v4953_v23 = vsel %vm1774_vm6, %v4944_v31, %v4946_v25  ;;  %v4950_v35 = vpop.permute.xlu0 %4949  ;;  %4964 = vmatprep.subr.mxu0 %v4956_v27  ;;  %v5666_v25 = vld [vmem:[%s8110_s10 + $0x190] sm:$0xff]  ;;  %v5619_v27 = vld [vmem:[%s8110_s10 + $0x18] sm:$0xff] }
 0x494   : > { %v4955_v9 = vmul.f32 %v4953_v23, %v7205_v46  ;;  %v4954_v50 = vsel %vm1774_vm6, %v4950_v35, %v4944_v31  ;;  %v4951_v20 = vsel %vm1774_vm6, %v4948_v37, %v4950_v35  ;;  %v5667_v37 = vld [vmem:[%s8110_s10 + $0x198] sm:$0xff]  ;;  %v5455_v31 = vld [vmem:[%s8108_s8 + $0x8] sm:$0x3]  ;;  %v6257_v23 = vpack.c.bf16 %v5649_v43, %v5648_v47  ;;  %v5644_v47 = vld [vmem:[%s8110_s10 + $0xe0] sm:$0xff] }
 0x495   : > { %v4958_v12 = vmul.f32 %v4954_v50, %v7219_v3  ;;  %v4957_v17 = vmul.f32 %v4951_v20, %v7216_v1  ;;  %v6227_v35 = vpack.c.bf16 %v5635_v30, %v5634_v51  ;;  %v5637_v50 = vld [vmem:[%s8110_s10 + $0xa8] sm:$0xff]  ;;  %v5650_v20 = vld [vmem:[%s8110_s10 + $0x110] sm:$0xff]  ;;  %v5659_v51 = vld [vmem:[%s8110_s10 + $0x158] sm:$0xff] }
 0x496   : > { %v5113_v39 = vpop.permute.xlu1 %5112  ;;  %v5658_v43 = vld [vmem:[%s8110_s10 + $0x150] sm:$0xff] }
 0x497   : > { %v5115_v52 = vpop.permute.xlu0 %5114  ;;  %5984 = vmatmul.mubr.msk.f32.vlgmr.msra.gmra.mrb[4].mxu0 %vm2508_vm9, %v5983_v13  ;;  %5035 = vmatprep.subr.mxu1 %v4958_v12  ;;  %v5651_v12 = vld [vmem:[%s8110_s10 + $0x118] sm:$0xff] }
 0x498   : > { %v5119_v46 = vsel %vm2013_vm7, %v5113_v39, %v5115_v52  ;;  %4965 = vmatpush1.msra.mxu0 %v4955_v9  ;;  %5028 = vmatprep.mubr.f32.mxu0 %v6413_v16  ;;  %v5636_v9 = vld [vmem:[%s8110_s10 + $0xa0] sm:$0xff] }
 0x499   : > { %v5123_v6 = vmul.f32 %v5119_v46, %v7266_v26  ;;  %5985 = vmatmul.mubr.msk.f32.vlgmr.msra.gmra.mrb[4].mxu1 %vm2508_vm9, %v5983_v13  ;;  %v5986_v26 = vld [vmem:[%s8106_s6 + $0x30] sm:$0xff]  ;;  %v6259_v13 = vpack.c.bf16 %v5667_v37, %v5666_v25  ;;  %v6231_v46 = vpack.c.bf16 %v5637_v50, %v5636_v9  ;;  %v5628_v37 = vld [vmem:[%s8110_s10 + $0x60] sm:$0xff]  ;;  %v5661_v9 = vld [vmem:[%s8110_s10 + $0x168] sm:$0xff] }
 0x49a   : > { %5036 = vmatpush1.msra.mxu1 %v4957_v17  ;;  %v5111_v7 = vpop.permute.xlu1 %5110  ;;  %5099 = vmatprep.mubr.f32.mxu1 %v6413_v16  ;;  %v5669_v17 = vld [vmem:[%s8110_s10 + $0x1a8] sm:$0xff] }
 0x49b   : > { %v5120_v3 = vsel %vm2013_vm7, %v5111_v7, %v5113_v39  ;;  %v5117_v58 = vpop.permute.xlu0 %5116  ;;  %5131 = vmatprep.subr.mxu0 %v5123_v6  ;;  %v6229_v39 = vpack.c.bf16 %v5619_v27, %v5618_v41  ;;  %v5620_v6 = vld [vmem:[%s8110_s10 + $0x20] sm:$0xff]  ;;  %v6277_v41 = vpack.c.bf16 %v5659_v51, %v5658_v43  ;;  %v5646_v27 = vld [vmem:[%s8110_s10 + $0xf0] sm:$0xff] }
 0x49c   : > { %v5122_v1 = vmul.f32 %v5120_v3, %v7276_v42  ;;  %v5121_v18 = vsel %vm2013_vm7, %v5117_v58, %v5111_v7  ;;  %v5118_v54 = vsel %vm2013_vm7, %v5115_v52, %v5117_v58  ;;  %v5668_v52 = vld [vmem:[%s8110_s10 + $0x1a0] sm:$0xff]  ;;  %v6261_v7 = vpack.c.bf16 %v5651_v12, %v5650_v20  ;;  %v5638_v3 = vld [vmem:[%s8110_s10 + $0xb0] sm:$0xff]  ;;  %v5639_v58 = vld [vmem:[%s8110_s10 + $0xb8] sm:$0xff] }
 0x49d   : > { %v5125_v21 = vmul.f32 %v5121_v18, %v7290_v49  ;;  %v5124_v36 = vmul.f32 %v5118_v54, %v7287_v45  ;;  %v5652_v18 = vld [vmem:[%s8110_s10 + $0x120] sm:$0xff]  ;;  %v5630_v12 = vld [vmem:[%s8110_s10 + $0x70] sm:$0xff] }
 0x49e   : > { %v5280_v14 = vpop.permute.xlu1 %5279 }
 0x49f   : > { %v5282_v38 = vpop.permute.xlu0 %5281  ;;  %5987 = vmatmul.mubr.msk.f32.vlgmr.msra.gmra.mrb[4].mxu0 %vm2508_vm9, %v5986_v26  ;;  %5202 = vmatprep.subr.mxu1 %v5125_v21  ;;  %v5670_v21 = vld [vmem:[%s8110_s10 + $0x1b0] sm:$0xff] }
 0x4a0   : > { %v5286_v42 = vsel %vm2252_vm8, %v5280_v14, %v5282_v38  ;;  %5132 = vmatpush1.msra.mxu0 %v5122_v1  ;;  %5195 = vmatprep.mubr.f32.mxu0 %v6413_v16  ;;  %v6263_v1 = vpack.c.bf16 %v5669_v17, %v5668_v52  ;;  %v5678_v17 = vld [vmem:[%s8110_s10 + $0x1f0] sm:$0xff] }
 0x4a1   : > { %v5290_v15 = vmul.f32 %v5286_v42, %v7337_v22  ;;  %5988 = vmatmul.mubr.msk.f32.vlgmr.msra.gmra.mrb[4].mxu1 %vm2508_vm9, %v5986_v26  ;;  %v5989_v22 = vld [vmem:[%s8106_s6 + $0x38] sm:$0xff]  ;;  %v5653_v26 = vld [vmem:[%s8110_s10 + $0x128] sm:$0xff] }
 0x4a2   : > { %5203 = vmatpush1.msra.mxu1 %v5124_v36  ;;  %v5278_v10 = vpop.permute.xlu1 %5277  ;;  %5266 = vmatprep.mubr.f32.mxu1 %v6413_v16  ;;  %v5622_v36 = vld [vmem:[%s8110_s10 + $0x30] sm:$0xff]  ;;  %v5623_v42 = vld [vmem:[%s8110_s10 + $0x38] sm:$0xff] }
 0x4a3   : > { %v5287_v49 = vsel %vm2252_vm8, %v5278_v10, %v5280_v14  ;;  %v5284_v28 = vpop.permute.xlu0 %5283  ;;  %5298 = vmatprep.subr.mxu0 %v5290_v15  ;;  %v5671_v14 = vld [vmem:[%s8110_s10 + $0x1b8] sm:$0xff]  ;;  %v6265_v15 = vpack.c.bf16 %v5653_v26, %v5652_v18 }
 0x4a4   : > { %v5289_v45 = vmul.f32 %v5287_v49, %v7347_v29  ;;  %v5288_v55 = vsel %vm2252_vm8, %v5284_v28, %v5278_v10  ;;  %v5285_v33 = vsel %vm2252_vm8, %v5282_v38, %v5284_v28  ;;  %v6235_v38 = vpack.c.bf16 %v5639_v58, %v5638_v3  ;;  %v5640_v10 = vld [vmem:[%s8110_s10 + $0xc0] sm:$0xff]  ;;  %v5641_v49 = vld [vmem:[%s8110_s10 + $0xc8] sm:$0xff] }
 0x4a5   : > { %v5292_v11 = vmul.f32 %v5288_v55, %v7361_v44  ;;  %v5291_v48 = vmul.f32 %v5285_v33, %v7358_v32  ;;  %v6267_v28 = vpack.c.bf16 %v5671_v14, %v5670_v21  ;;  %v5655_v55 = vld [vmem:[%s8110_s10 + $0x138] sm:$0xff]  ;;  %v5672_v33 = vld [vmem:[%s8110_s10 + $0x1c0] sm:$0xff] }
 0x4a7   : > { %5990 = vmatmul.mubr.msk.f32.vlgmr.msra.gmra.mrb[4].mxu0 %vm2508_vm9, %v5989_v22  ;;  %5369 = vmatprep.subr.mxu1 %v5292_v11  ;;  %v5673_v11 = vld [vmem:[%s8110_s10 + $0x1c8] sm:$0xff] }
 0x4a8   : > { %5299 = vmatpush1.msra.mxu0 %v5289_v45  ;;  %5362 = vmatprep.mubr.f32.mxu0 %v6413_v16  ;;  %v5654_v45 = vld [vmem:[%s8110_s10 + $0x130] sm:$0xff]  ;;  %v6271_v60 = vpack.c.bf16 %v5673_v11, %v5672_v33 }
 0x4a9   : > { %5991 = vmatmul.mubr.msk.f32.vlgmr.msra.gmra.mrb[4].mxu1 %vm2508_vm9, %v5989_v22  ;;  %v6237_v22 = vpack.c.bf16 %v5623_v42, %v5622_v36 }
 0x4aa   : > { %5370 = vmatpush1.msra.mxu1 %v5291_v48  ;;  %5433 = vmatprep.mubr.f32.mxu1 %v6413_v16  ;;  %v6239_v48 = vpack.c.bf16 %v5641_v49, %v5640_v10 }
 0x4af   : > { %5993 = vmatmul.mubr.msk.f32.vlgmr.msra.gmra.mrb[4].mxu0 %vm2508_vm9, %v5992_v19 }
 0x4b0   : > { %5526 = vmatprep.mubr.f32.mxu0 %v6413_v16 }
 0x4b1   : > { %5994 = vmatmul.mubr.msk.f32.vlgmr.msra.gmra.mrb[4].mxu1 %vm2508_vm9, %v5992_v19  ;;  %v5624_v19 = vld [vmem:[%s8110_s10 + $0x40] sm:$0xff] }
 0x4b2   : > { %5603 = vmatprep.mubr.f32.mxu1 %v6413_v16 }
 0x4b3   : > { %v5448_v32 = vpop.permute.xlu1 %5447 }
 0x4b4   : > { %v5685_v49 = vpop.permute.xlu0 %5684 }
 0x582   : > { %v5364_v29 = vpop.f32.mrb[4].mxu0 }
 0x583   : > { %v5366_v44 = vpop.f32.mrb[5].mxu0  ;;  %v5450_v5 = vadd.f32 %v5448_v32, %v5364_v29  ;;  %v5625_v29 = vld [vmem:[%s8110_s10 + $0x48] sm:$0xff] }
 0x584   : > { %v5451_v61 = vadd.f32 %v5448_v32, %v5366_v44  ;;  %v5435_v62 = vpop.f32.mrb[4].mxu1  ;;  %v5642_v44 = vld [vmem:[%s8110_s10 + $0xd0] sm:$0xff] }
 0x585   : > { %v5437_v63 = vpop.f32.mrb[5].mxu1  ;;  %v5452_v0 = vadd.f32 %v5448_v32, %v5435_v62  ;;  %v5657_v62 = vld [vmem:[%s8110_s10 + $0x148] sm:$0xff] }
 0x586   : > { %v5453_v59 = vadd.f32 %v5448_v32, %v5437_v63  ;;  %5462 = vmatprep.subr.mxu0 %v5451_v61  ;;  %v6269_v32 = vpack.c.bf16 %v5655_v55, %v5654_v45  ;;  %v5656_v61 = vld [vmem:[%s8110_s10 + $0x140] sm:$0xff]  ;;  %v5626_v63 = vld [vmem:[%s8110_s10 + $0x50] sm:$0xff] }
 0x587   : > { %5463 = vmatpush1.msra.mxu0 %v5450_v5  ;;  %v6243_v5 = vpack.c.bf16 %v5643_v56, %v5642_v44  ;;  %v6273_v40 = vpack.c.bf16 %v5657_v62, %v5656_v61  ;;  %v6245_v30 = vpack.c.bf16 %v5627_v57, %v5626_v63 }
 0x588   : > { %5995 = vmatmul.mubr.msk.f32.vlgmr.msra.gmra.mrb[6].mxu0 %vm2508_vm9, %v5454_v34  ;;  %5539 = vmatprep.subr.mxu1 %v5453_v59  ;;  %v5645_v59 = vld [vmem:[%s8110_s10 + $0xe8] sm:$0xff] }
 0x589   : > { %5540 = vmatpush1.msra.mxu1 %v5452_v0  ;;  %5532 = vmatprep.mubr.f32.mxu0 %v6413_v16  ;;  %v5676_v0 = vld [vmem:[%s8110_s10 + $0x1e0] sm:$0xff]  ;;  %v6247_v25 = vpack.c.bf16 %v5645_v59, %v5644_v47 }
 0x58a   : > { %5997 = vmatmul.mubr.msk.f32.vlgmr.msra.gmra.mrb[6].mxu1 %vm2508_vm9, %v5454_v34  ;;  %6224 = vmatprep.subr.bf16.mxu0 %v6223_v8  ;;  %v6241_v34 = vpack.c.bf16 %v5625_v29, %v5624_v19  ;;  %v6275_v8 = vpack.c.bf16 %v5675_v4, %v5674_v24  ;;  %v5690_v29 = vpop.permute.xlu1 %5689 }
 0x58b   : > { %5609 = vmatprep.mubr.f32.mxu1 %v6413_v16  ;;  %6226 = vmatpush3.bf16.msra.mxu0 %v6225_v2  ;;  %v5621_v16 = vld [vmem:[%s8110_s10 + $0x28] sm:$0xff] }
 0x58c   : > { %5996 = vmatmul.mubr.msk.f32.gmra.mrb[8].mxu0 %vm2508_vm9, %v5455_v31  ;;  %6256 = vmatprep.subr.bf16.mxu1 %v6255_v53  ;;  %v6233_v54 = vpack.c.bf16 %v5621_v16, %v5620_v6  ;;  %v5677_v2 = vld [vmem:[%s8110_s10 + $0x1e8] sm:$0xff]  ;;  %v5662_v16 = vld [vmem:[%s8110_s10 + $0x170] sm:$0xff] }
 0x58d   : > { %6258 = vmatpush3.bf16.msra.mxu1 %v6257_v23  ;;  %6228 = vmatprep.subr.bf16.mxu0 %v6227_v35  ;;  %v5629_v53 = vld [vmem:[%s8110_s10 + $0x68] sm:$0xff]  ;;  %v6279_v23 = vpack.c.bf16 %v5677_v2, %v5676_v0  ;;  %v5660_v35 = vld [vmem:[%s8110_s10 + $0x160] sm:$0xff] }
 0x58e   : > { %5998 = vmatmul.mubr.msk.f32.gmra.mrb[8].mxu1 %vm2508_vm9, %v5455_v31  ;;  %6260 = vmatprep.subr.bf16.mxu1 %v6259_v13  ;;  %v5647_v31 = vld [vmem:[%s8110_s10 + $0xf8] sm:$0xff]  ;;  %v6249_v50 = vpack.c.bf16 %v5629_v53, %v5628_v37  ;;  %v6281_v20 = vpack.c.bf16 %v5661_v9, %v5660_v35 }
 0x58f   : > { %6230 = vmatpush3.bf16.msra.mxu0 %v6229_v39  ;;  %v6251_v13 = vpack.c.bf16 %v5647_v31, %v5646_v27  ;;  %v5631_v39 = vld [vmem:[%s8110_s10 + $0x78] sm:$0xff] }
 0x590   : > { %6232 = vmatprep.subr.bf16.mxu0 %v6231_v46  ;;  %v6253_v52 = vpack.c.bf16 %v5631_v39, %v5630_v12  ;;  %v5679_v46 = vld [vmem:[%s8110_s10 + $0x1f8] sm:$0xff] }
 0x591   : > { %6262 = vmatpush3.bf16.msra.mxu1 %v6261_v7  ;;  %v6283_v6 = vpack.c.bf16 %v5679_v46, %v5678_v17  ;;  %v5663_v7 = vld [vmem:[%s8110_s10 + $0x178] sm:$0xff] }
 0x592   : > { %6264 = vmatprep.subr.bf16.mxu1 %v6263_v1  ;;  %v6285_v3 = vpack.c.bf16 %v5663_v7, %v5662_v16 }
 0x593   : > { %6234 = vmatpush3.bf16.msra.mxu0 %v6233_v54 }
 0x594   : > { %6236 = vmatprep.subr.bf16.mxu0 %v6235_v38 }
 0x595   : > { %6266 = vmatpush3.bf16.msra.mxu1 %v6265_v15 }
 0x596   : > { %6268 = vmatprep.subr.bf16.mxu1 %v6267_v28 }
 0x597   : > { %6238 = vmatpush3.bf16.msra.mxu0 %v6237_v22 }
 0x598   : > { %6240 = vmatprep.subr.bf16.mxu0 %v6239_v48 }
 0x599   : > { %6270 = vmatpush3.bf16.msra.mxu1 %v6269_v32 }
 0x59a   : > { %6272 = vmatprep.subr.bf16.mxu1 %v6271_v60 }
 0x59b   : > { %6242 = vmatpush3.bf16.msra.mxu0 %v6241_v34 }
 0x59c   : > { %6244 = vmatprep.subr.bf16.mxu0 %v6243_v5 }
 0x59d   : > { %6274 = vmatpush3.bf16.msra.mxu1 %v6273_v40 }
 0x59e   : > { %6276 = vmatprep.subr.bf16.mxu1 %v6275_v8 }
 0x59f   : > { %6246 = vmatpush3.bf16.msra.mxu0 %v6245_v30 }
 0x5a0   : > { %6248 = vmatprep.subr.bf16.mxu0 %v6247_v25 }
 0x5a1   : > { %6278 = vmatpush3.bf16.msra.mxu1 %v6277_v41 }
 0x5a2   : > { %6280 = vmatprep.subr.bf16.mxu1 %v6279_v23 }
 0x5a3   : > { %6250 = vmatpush3.bf16.msra.mxu0 %v6249_v50 }
 0x5a4   : > { %6252 = vmatprep.subr.bf16.mxu0 %v6251_v13 }
 0x5a5   : > { %6282 = vmatpush3.bf16.msra.mxu1 %v6281_v20 }
 0x5a6   : > { %6284 = vmatprep.subr.bf16.mxu1 %v6283_v6 }
 0x5a7   : > { %6254 = vmatpush3.bf16.msra.mxu0 %v6253_v52 }
 0x5a9   : > { %6286 = vmatpush3.bf16.msra.mxu1 %v6285_v3 }
 0x65b   : > { %v5528_v58 = vpop.f32.mrb[6].mxu0 }
 0x65c   : > { %v5530_v1 = vpop.f32.mrb[7].mxu0 }
 0x65d   : > { %v5605_v18 = vpop.f32.mrb[6].mxu1  ;;  %5756 = vmatprep.mubr.f32.mxu0 %v5530_v1 }
 0x65e   : > { %v5607_v26 = vpop.f32.mrb[7].mxu1  ;;  %5757 = vmatmul.mubr.f32.vlgmr.msra.gmra.mrb[10].mxu0 %v5528_v58 }
 0x65f   : > { %v5534_v54 = vpop.f32.mrb[8].mxu0  ;;  %5831 = vmatprep.mubr.f32.mxu1 %v5607_v26 }
 0x660   : > { %v5536_v21 = vpop.f32.mrb[9].mxu0  ;;  %5832 = vmatmul.mubr.f32.vlgmr.msra.gmra.mrb[10].mxu1 %v5605_v18 }
 0x661   : > { %v5611_v14 = vpop.f32.mrb[8].mxu1  ;;  %5761 = vmatprep.mubr.f32.mxu0 %v5536_v21 }
 0x662   : > { %v5613_v38 = vpop.f32.mrb[9].mxu1  ;;  %5762 = vmatmul.mubr.f32.gmra.mrb[12].mxu0 %v5534_v54 }
 0x663   : > { %5836 = vmatprep.mubr.f32.mxu1 %v5613_v38 }
 0x664   : > { %5837 = vmatmul.mubr.f32.gmra.mrb[12].mxu1 %v5611_v14 }
 0x731   : > { %v6035_v36 = vpop.f32.mrb[10].mxu0 }
 0x732   : > { %v6036_v42 = vpop.f32.mrb[11].mxu0 }
 0x733   : > { %v6037_v15 = vadd.f32 %v6036_v42, %v6035_v36  ;;  %v6073_v10 = vpop.f32.mrb[10].mxu1 }
 0x734   : > { %v6074_v28 = vpop.f32.mrb[11].mxu1 }
 0x735   : > { %v5759_v45 = vadd.f32 %v6037_v15, %v5685_v49  ;;  %v6075_v55 = vadd.f32 %v6074_v28, %v6073_v10  ;;  %v6038_v22 = vpop.f32.mrb[12].mxu0 }
 0x736   : > { %v6039_v33 = vpop.f32.mrb[13].mxu0 }
 0x737   : > { %v5834_v11 = vadd.f32 %v6075_v55, %v5759_v45  ;;  %v6040_v48 = vadd.f32 %v6039_v33, %v6038_v22  ;;  %v6076_v19 = vpop.f32.mrb[12].mxu1 }
 0x738   : > { %v6077_v32 = vpop.f32.mrb[13].mxu1 }
 0x739   : > { %5843 = vst.msk [vmem:[%s386_s22] sm:$0xff] %vm5842_vm10, %v5834_v11  ;;  %v5764_v44 = vadd.f32 %v6040_v48, %v5690_v29  ;;  %v6078_v56 = vadd.f32 %v6077_v32, %v6076_v19 }
 0x73b   : > { %v5839_v60 = vadd.f32 %v6078_v56, %v5764_v44 }
 0x73d   : > { %5845 = vst.msk [vmem:[%s386_s22 + $0x8] sm:$0x3] %vm5844_vm11, %v5839_v60 }
 0x73e PF: > { %s21_s17 = sadd.s32 1, %s6409_s17  }
 0x73f   : > { %p18_p4 = scmp.ge.s32.totalorder %s21_s17, 4  }
 0x741   :  { %20 = sbr.rel (!%p18_p4) target bundleno = 1 (0x1), region = 125 }

</bundles_post_ra>
